<compile_context>
chip_gen: v5e
topology: v5e:2x2
jax: 0.10.0
libtpu: 0.0.40
codegen_flags: <defaults>
</compile_context>

<pallas_src>
import functools

import jax
import jax.numpy as jnp
import numpy as np
from jax import lax
from jax.experimental import pallas as pl
from jax.experimental.pallas import tpu as pltpu

INDIM, HIDDIM, OUTDIM = 9, 50, 1   # RBNN defaults: MLP(9, 50, 1)
DT = 0.001
ALPHA = 0.5
NEWTON_STEPS = 5

# Packed-parameter slab layout (row offsets are multiples of 8; 128 lanes).
SLAB_COLS = 128
ROW_W1 = 0        # (50, 9)  torch nn.Linear layout (out_features, in_features)
ROW_W2 = 56       # (50, 50)
ROW_W3 = 112      # (1, 50)
ROW_B1 = 120      # (1, 50)
ROW_B2 = 128      # (1, 50)
SLAB_ROWS = 136


# ---------------- small scalar-algebra helpers (trace-time python) ----------
def _matvec(A, v):
    return [sum(A[i][j] * v[j] for j in range(3)) for i in range(3)]


def _matmat(A, B):
    return [[sum(A[i][k] * B[k][j] for k in range(3)) for j in range(3)]
            for i in range(3)]


def _hat(v):
    return [[0.0, -v[2], v[1]],
            [v[2], 0.0, -v[0]],
            [-v[1], v[0], 0.0]]


def _cross(u, v):
    return [u[1] * v[2] - u[2] * v[1],
            u[2] * v[0] - u[0] * v[2],
            u[0] * v[1] - u[1] * v[0]]


def _inv3(A):
    a, b, c = A[0]
    d, e, f = A[1]
    g, h, i = A[2]
    det = a * (e * i - f * h) - b * (d * i - f * g) + c * (d * h - e * g)
    inv_det = 1.0 / det
    return [[(e * i - f * h) * inv_det, (c * h - b * i) * inv_det, (b * f - c * e) * inv_det],
            [(f * g - d * i) * inv_det, (a * i - c * g) * inv_det, (c * d - a * f) * inv_det],
            [(d * h - e * g) * inv_det, (b * g - a * h) * inv_det, (a * e - b * d) * inv_det]]


# ------------------------------- kernel -------------------------------------
def rbnn_kernel(R_s, I_s, om_s, q0_ref, slab_ref, R_out, om_out, g_ref, *, dt):
    f32 = jnp.float32
    lane = lax.broadcasted_iota(jnp.int32, (1, INDIM), 1)

    # Static views into the single packed parameter slab (one DMA'd VMEM input).
    w1 = slab_ref[ROW_W1:ROW_W1 + HIDDIM, 0:INDIM]      # (50, 9)
    w2 = slab_ref[ROW_W2:ROW_W2 + HIDDIM, 0:HIDDIM]     # (50, 50)
    w3 = slab_ref[ROW_W3:ROW_W3 + 1, 0:HIDDIM]          # (1, 50)
    b1 = slab_ref[ROW_B1:ROW_B1 + 1, 0:HIDDIM]          # (1, 50)
    b2 = slab_ref[ROW_B2:ROW_B2 + 1, 0:HIDDIM]          # (1, 50)

    def matT(x, w):
        # y = x @ W^T without materialising W^T (contract on in_features axis).
        return lax.dot_general(x, w, (((1,), (1,)), ((), ())),
                               preferred_element_type=f32)

    def dV_dq(q):
        # V(q) forward — only the pre-activation ReLU masks are needed
        # (b3 does not affect dV/dq, so it is not an input).
        h1p = matT(q, w1) + b1
        d1 = (h1p > 0.0).astype(f32)
        h1 = h1p * d1
        h2p = matT(h1, w2) + b2
        d2 = (h2p > 0.0).astype(f32)
        # analytic dV/dq (replaces torch.autograd.grad)
        u2 = w3 * d2                                              # (1, 50)
        u1 = jnp.dot(u2, w2, preferred_element_type=f32) * d1     # (1, 50)
        return jnp.dot(u1, w1, preferred_element_type=f32)        # (1, 9)

    def vee_skew(g_row, Rm):
        # g -> small VMEM scratch, then scalar readback of the 9 entries.
        g_ref[...] = g_row
        dV = [[g_ref[0, 3 * a + b] for b in range(3)] for a in range(3)]

        # SM = dV^T R - R^T dV ; M = (SM[2,1], SM[0,2], SM[1,0])
        def sm(i, j):
            acc = 0.0
            for k in range(3):
                acc = acc + dV[k][i] * Rm[k][j] - Rm[k][i] * dV[k][j]
            return acc

        return [sm(2, 1), sm(0, 2), sm(1, 0)]

    def q_row_from(Rm):
        # Balanced select tree: 9 independent lane-selects then a log-depth sum.
        parts = [jnp.where(lane == (3 * a + b), Rm[a][b], 0.0)
                 for a in range(3) for b in range(3)]
        while len(parts) > 1:
            nxt = [parts[i] + parts[i + 1] for i in range(0, len(parts) - 1, 2)]
            if len(parts) % 2:
                nxt.append(parts[-1])
            parts = nxt
        return parts[0].astype(f32)

    # ---- scalar rigid-body state (SMEM) ----
    R = [[R_s[i, j] for j in range(3)] for i in range(3)]
    Imat = [[I_s[i, j] for j in range(3)] for i in range(3)]
    om = [om_s[i] for i in range(3)]
    eye = [[1.0, 0.0, 0.0], [0.0, 1.0, 0.0], [0.0, 0.0, 1.0]]

    I_inv = _inv3(Imat)
    p = _matvec(Imat, om)

    # explicit_update(R): q comes straight from the (1, 9) VMEM row of R.
    M = vee_skew(dV_dq(q0_ref[...]), R)

    a = [dt * p[i] + dt * dt * M[i] * (1.0 - ALPHA) for i in range(3)]
    f = [0.0, 0.0, 0.0]
    for _ in range(NEWTON_STEPS):
        aTf = a[0] * f[0] + a[1] * f[1] + a[2] * f[2]
        c = _cross(a, f)
        If = _matvec(Imat, f)
        phi = [a[i] + c[i] + f[i] * aTf - 2.0 * If[i] for i in range(3)]
        ha = _hat(a)
        dphi = [[ha[i][j] + aTf * eye[i][j] - 2.0 * Imat[i][j] + f[i] * a[j]
                 for j in range(3)] for i in range(3)]
        step = _matvec(_inv3(dphi), phi)
        f = [f[i] - step[i] for i in range(3)]

    hf = _hat(f)
    Aplus = [[eye[i][j] + hf[i][j] for j in range(3)] for i in range(3)]
    Bminus = [[eye[i][j] - hf[i][j] for j in range(3)] for i in range(3)]
    F = _matmat(Aplus, _inv3(Bminus))
    R_next = _matmat(R, F)

    # explicit_update(R_next): rebuild q in the vector domain (balanced tree).
    M_next = vee_skew(dV_dq(q_row_from(R_next)), R_next)

    Ft = [[F[j][i] for j in range(3)] for i in range(3)]
    Ftp = _matvec(Ft, p)
    FtM = _matvec(Ft, M)
    p_next = [Ftp[i] + ALPHA * dt * FtM[i] + (1.0 - ALPHA) * dt * M_next[i]
              for i in range(3)]
    om_next = _matvec(I_inv, p_next)

    for i in range(3):
        om_out[i] = om_next[i]
        for j in range(3):
            R_out[i, j] = R_next[i][j]


# ------------------------------ wrapper --------------------------------------
def pack_params(W1, b1, W2, b2, W3):
    """Packs the MLP parameters into a single lane-padded VMEM slab (done once)."""
    slab = np.zeros((SLAB_ROWS, SLAB_COLS), np.float32)
    slab[ROW_W1:ROW_W1 + HIDDIM, :INDIM] = np.asarray(W1, np.float32)
    slab[ROW_W2:ROW_W2 + HIDDIM, :HIDDIM] = np.asarray(W2, np.float32)
    slab[ROW_W3, :HIDDIM] = np.asarray(W3, np.float32).reshape(HIDDIM)
    slab[ROW_B1, :HIDDIM] = np.asarray(b1, np.float32)
    slab[ROW_B2, :HIDDIM] = np.asarray(b2, np.float32)
    return jnp.asarray(slab)


@functools.partial(jax.jit, static_argnames=("dt",))
def rbnn_forward(R, omega, I, slab, dt=DT):
    f32 = jnp.float32
    R = R.astype(f32)
    omega = omega.astype(f32)
    I = I.astype(f32)
    q0 = R.reshape(1, INDIM)          # free layout plumbing: q for the first update

    smem = pl.BlockSpec(memory_space=pltpu.MemorySpace.SMEM)
    vmem = pl.BlockSpec(memory_space=pltpu.MemorySpace.VMEM)

    kernel = functools.partial(rbnn_kernel, dt=dt)
    R_next, omega_next = pl.pallas_call(
        kernel,
        out_shape=(jax.ShapeDtypeStruct((3, 3), f32),
                   jax.ShapeDtypeStruct((3,), f32)),
        in_specs=[smem, smem, smem,   # R, I, omega  (scalar access)
                  vmem, vmem],        # q0 row, packed parameter slab
        out_specs=(smem, smem),
        scratch_shapes=[pltpu.VMEM((1, INDIM), f32)],
    )(R, I, omega, q0, slab)
    return R_next, omega_next


# --------------------------- reference ----------------------------------------
def rbnn_reference(R, omega, I, W1, b1, W2, b2, W3, b3, dt):
    """dV via jax autodiff (independent check of the kernel's analytic backward);
    all 3x3 rigid-body algebra in float64 numpy (precision-robust)."""

    def V(q):
        h1 = jax.nn.relu(W1 @ q + b1)
        h2 = jax.nn.relu(W2 @ h1 + b2)
        return (W3 @ h2 + b3)[0]

    def dV_of(Rm):
        q = jnp.asarray(np.asarray(Rm, np.float32).reshape(9))
        return np.asarray(jax.grad(V)(q), np.float64).reshape(3, 3)

    R = np.asarray(R, np.float64)
    I = np.asarray(I, np.float64)
    omega = np.asarray(omega, np.float64)

    def hat(v):
        return np.array([[0.0, -v[2], v[1]],
                         [v[2], 0.0, -v[0]],
                         [-v[1], v[0], 0.0]])

    def explicit_update(Rm):
        dV = dV_of(Rm)
        SM = dV.T @ Rm - Rm.T @ dV
        return np.array([SM[2, 1], SM[0, 2], SM[1, 0]])

    I33 = np.eye(3)
    I_inv = np.linalg.inv(I)
    p = I @ omega
    M = explicit_update(R)
    a = dt * p + dt ** 2 * M * (1 - ALPHA)
    f = np.zeros(3)
    for _ in range(NEWTON_STEPS):
        aTf = a @ f
        phi = a + np.cross(a, f) + f * aTf - 2.0 * (I @ f)
        dphi = hat(a) + aTf * I33 - 2.0 * I + np.outer(f, a)
        f = f - np.linalg.inv(dphi) @ phi
    F = (I33 + hat(f)) @ np.linalg.inv(I33 - hat(f))
    R_next = R @ F
    M_next = explicit_update(R_next)
    p_next = F.T @ p + ALPHA * dt * (F.T @ M) + (1 - ALPHA) * dt * M_next
    omega_next = I_inv @ p_next
    return R_next, omega_next


# ------------------------------- main ----------------------------------------
def init_params(key):
    ks = jax.random.split(key, 7)

    def linear_init(kw, kb, fan_in, fan_out):
        bound = 1.0 / np.sqrt(fan_in)
        W = jax.random.uniform(kw, (fan_out, fan_in), jnp.float32, -bound, bound)
        b = jax.random.uniform(kb, (fan_out,), jnp.float32, -bound, bound)
        return W, b

    W1, b1 = linear_init(ks[0], ks[1], INDIM, HIDDIM)
    W2, b2 = linear_init(ks[2], ks[3], HIDDIM, HIDDIM)
    W3, b3 = linear_init(ks[4], ks[5], HIDDIM, OUTDIM)
    # torch init is randn(3,3)/3; add a diagonal shift so the synthetic
    # inertia tensor is comfortably invertible.
    I = (jax.random.normal(ks[6], (3, 3), jnp.float32) / 3.0
         + 0.75 * jnp.eye(3, dtype=jnp.float32))
    return W1, b1, W2, b2, W3, b3, I


if __name__ == "__main__":
    key = jax.random.PRNGKey(0)
    kparam, kR, kw = jax.random.split(key, 3)
    W1, b1, W2, b2, W3, b3, I = init_params(kparam)

    # R: an orthonormal rotation matrix; omega: small angular velocity.
    R, _ = jnp.linalg.qr(jax.random.normal(kR, (3, 3), jnp.float32))
    R = R.astype(jnp.float32)
    omega = 0.3 * jax.random.normal(kw, (3,), jnp.float32)

    slab = pack_params(W1, b1, W2, b2, W3)   # one-time packing, outside the step

    R_next, omega_next = rbnn_forward(R, omega, I, slab, dt=DT)
    jax.block_until_ready((R_next, omega_next))

    R_ref, om_ref = rbnn_reference(R, omega, I, W1, b1, W2, b2, W3, b3, DT)
    assert np.allclose(np.asarray(R_next), np.asarray(R_ref),
                       rtol=5e-3, atol=5e-4), "R_next mismatch"
    assert np.allclose(np.asarray(omega_next), np.asarray(om_ref),
                       rtol=5e-3, atol=5e-4), "omega_next mismatch"
    print("KERNEL_OK")
</pallas_src>

<mosaic_0001>
module attributes {stable_mosaic.version = 11 : i64} {
  func.func @rbnn_kernel(%arg0: memref<3x3xf32, #tpu.memory_space<smem>>, %arg1: memref<3x3xf32, #tpu.memory_space<smem>>, %arg2: memref<3xf32, #tpu.memory_space<smem>>, %arg3: memref<1x9xf32, #tpu.memory_space<vmem>>, %arg4: memref<136x128xf32, #tpu.memory_space<vmem>>, %arg5: memref<3x3xf32, #tpu.memory_space<smem>>, %arg6: memref<3xf32, #tpu.memory_space<smem>>, %arg7: memref<1x9xf32, #tpu.memory_space<vmem>>) attributes {dimension_semantics = [], scalar_prefetch = 0 : i64, scratch_operands = 1 : i64, tpu.core_type = #tpu.core_type<tc>} {
    %0 = tpu.iota {dimensions = array<i32: 1>} : vector<1x9xi32>
    %c0 = arith.constant 0 : index
    %c0_0 = arith.constant 0 : index
    %1 = vector.load %arg4[%c0, %c0_0] : memref<136x128xf32, #tpu.memory_space<vmem>>, vector<50x9xf32>
    %c56 = arith.constant 56 : index
    %c0_1 = arith.constant 0 : index
    %2 = vector.load %arg4[%c56, %c0_1] : memref<136x128xf32, #tpu.memory_space<vmem>>, vector<50x50xf32>
    %c112 = arith.constant 112 : index
    %c0_2 = arith.constant 0 : index
    %3 = vector.load %arg4[%c112, %c0_2] : memref<136x128xf32, #tpu.memory_space<vmem>>, vector<1x50xf32>
    %c120 = arith.constant 120 : index
    %c0_3 = arith.constant 0 : index
    %4 = vector.load %arg4[%c120, %c0_3] : memref<136x128xf32, #tpu.memory_space<vmem>>, vector<1x50xf32>
    %c128 = arith.constant 128 : index
    %c0_4 = arith.constant 0 : index
    %5 = vector.load %arg4[%c128, %c0_4] : memref<136x128xf32, #tpu.memory_space<vmem>>, vector<1x50xf32>
    %c0_5 = arith.constant 0 : index
    %c0_6 = arith.constant 0 : index
    %6 = memref.load %arg0[%c0_5, %c0_6] : memref<3x3xf32, #tpu.memory_space<smem>>
    %c0_7 = arith.constant 0 : index
    %c1 = arith.constant 1 : index
    %7 = memref.load %arg0[%c0_7, %c1] : memref<3x3xf32, #tpu.memory_space<smem>>
    %c0_8 = arith.constant 0 : index
    %c2 = arith.constant 2 : index
    %8 = memref.load %arg0[%c0_8, %c2] : memref<3x3xf32, #tpu.memory_space<smem>>
    %c1_9 = arith.constant 1 : index
    %c0_10 = arith.constant 0 : index
    %9 = memref.load %arg0[%c1_9, %c0_10] : memref<3x3xf32, #tpu.memory_space<smem>>
    %c1_11 = arith.constant 1 : index
    %c1_12 = arith.constant 1 : index
    %10 = memref.load %arg0[%c1_11, %c1_12] : memref<3x3xf32, #tpu.memory_space<smem>>
    %c1_13 = arith.constant 1 : index
    %c2_14 = arith.constant 2 : index
    %11 = memref.load %arg0[%c1_13, %c2_14] : memref<3x3xf32, #tpu.memory_space<smem>>
    %c2_15 = arith.constant 2 : index
    %c0_16 = arith.constant 0 : index
    %12 = memref.load %arg0[%c2_15, %c0_16] : memref<3x3xf32, #tpu.memory_space<smem>>
    %c2_17 = arith.constant 2 : index
    %c1_18 = arith.constant 1 : index
    %13 = memref.load %arg0[%c2_17, %c1_18] : memref<3x3xf32, #tpu.memory_space<smem>>
    %c2_19 = arith.constant 2 : index
    %c2_20 = arith.constant 2 : index
    %14 = memref.load %arg0[%c2_19, %c2_20] : memref<3x3xf32, #tpu.memory_space<smem>>
    %c0_21 = arith.constant 0 : index
    %c0_22 = arith.constant 0 : index
    %15 = memref.load %arg1[%c0_21, %c0_22] : memref<3x3xf32, #tpu.memory_space<smem>>
    %c0_23 = arith.constant 0 : index
    %c1_24 = arith.constant 1 : index
    %16 = memref.load %arg1[%c0_23, %c1_24] : memref<3x3xf32, #tpu.memory_space<smem>>
    %c0_25 = arith.constant 0 : index
    %c2_26 = arith.constant 2 : index
    %17 = memref.load %arg1[%c0_25, %c2_26] : memref<3x3xf32, #tpu.memory_space<smem>>
    %c1_27 = arith.constant 1 : index
    %c0_28 = arith.constant 0 : index
    %18 = memref.load %arg1[%c1_27, %c0_28] : memref<3x3xf32, #tpu.memory_space<smem>>
    %c1_29 = arith.constant 1 : index
    %c1_30 = arith.constant 1 : index
    %19 = memref.load %arg1[%c1_29, %c1_30] : memref<3x3xf32, #tpu.memory_space<smem>>
    %c1_31 = arith.constant 1 : index
    %c2_32 = arith.constant 2 : index
    %20 = memref.load %arg1[%c1_31, %c2_32] : memref<3x3xf32, #tpu.memory_space<smem>>
    %c2_33 = arith.constant 2 : index
    %c0_34 = arith.constant 0 : index
    %21 = memref.load %arg1[%c2_33, %c0_34] : memref<3x3xf32, #tpu.memory_space<smem>>
    %c2_35 = arith.constant 2 : index
    %c1_36 = arith.constant 1 : index
    %22 = memref.load %arg1[%c2_35, %c1_36] : memref<3x3xf32, #tpu.memory_space<smem>>
    %c2_37 = arith.constant 2 : index
    %c2_38 = arith.constant 2 : index
    %23 = memref.load %arg1[%c2_37, %c2_38] : memref<3x3xf32, #tpu.memory_space<smem>>
    %c0_39 = arith.constant 0 : index
    %24 = memref.load %arg2[%c0_39] : memref<3xf32, #tpu.memory_space<smem>>
    %c1_40 = arith.constant 1 : index
    %25 = memref.load %arg2[%c1_40] : memref<3xf32, #tpu.memory_space<smem>>
    %c2_41 = arith.constant 2 : index
    %26 = memref.load %arg2[%c2_41] : memref<3xf32, #tpu.memory_space<smem>>
    %27 = arith.mulf %19, %23 : f32
    %28 = arith.mulf %20, %22 : f32
    %29 = arith.subf %27, %28 : f32
    %30 = arith.mulf %15, %29 : f32
    %31 = arith.mulf %18, %23 : f32
    %32 = arith.mulf %20, %21 : f32
    %33 = arith.subf %31, %32 : f32
    %34 = arith.mulf %16, %33 : f32
    %35 = arith.subf %30, %34 : f32
    %36 = arith.mulf %18, %22 : f32
    %37 = arith.mulf %19, %21 : f32
    %38 = arith.subf %36, %37 : f32
    %39 = arith.mulf %17, %38 : f32
    %40 = arith.addf %35, %39 : f32
    %cst = arith.constant 1.000000e+00 : f32
    %41 = arith.divf %cst, %40 : f32
    %42 = arith.mulf %19, %23 : f32
    %43 = arith.mulf %20, %22 : f32
    %44 = arith.subf %42, %43 : f32
    %45 = arith.mulf %44, %41 : f32
    %46 = arith.mulf %17, %22 : f32
    %47 = arith.mulf %16, %23 : f32
    %48 = arith.subf %46, %47 : f32
    %49 = arith.mulf %48, %41 : f32
    %50 = arith.mulf %16, %20 : f32
    %51 = arith.mulf %17, %19 : f32
    %52 = arith.subf %50, %51 : f32
    %53 = arith.mulf %52, %41 : f32
    %54 = arith.mulf %20, %21 : f32
    %55 = arith.mulf %18, %23 : f32
    %56 = arith.subf %54, %55 : f32
    %57 = arith.mulf %56, %41 : f32
    %58 = arith.mulf %15, %23 : f32
    %59 = arith.mulf %17, %21 : f32
    %60 = arith.subf %58, %59 : f32
    %61 = arith.mulf %60, %41 : f32
    %62 = arith.mulf %17, %18 : f32
    %63 = arith.mulf %15, %20 : f32
    %64 = arith.subf %62, %63 : f32
    %65 = arith.mulf %64, %41 : f32
    %66 = arith.mulf %18, %22 : f32
    %67 = arith.mulf %19, %21 : f32
    %68 = arith.subf %66, %67 : f32
    %69 = arith.mulf %68, %41 : f32
    %70 = arith.mulf %16, %21 : f32
    %71 = arith.mulf %15, %22 : f32
    %72 = arith.subf %70, %71 : f32
    %73 = arith.mulf %72, %41 : f32
    %74 = arith.mulf %15, %19 : f32
    %75 = arith.mulf %16, %18 : f32
    %76 = arith.subf %74, %75 : f32
    %77 = arith.mulf %76, %41 : f32
    %78 = arith.mulf %15, %24 : f32
    %cst_42 = arith.constant 0.000000e+00 : f32
    %79 = arith.addf %cst_42, %78 : f32
    %80 = arith.mulf %16, %25 : f32
    %81 = arith.addf %79, %80 : f32
    %82 = arith.mulf %17, %26 : f32
    %83 = arith.addf %81, %82 : f32
    %84 = arith.mulf %18, %24 : f32
    %cst_43 = arith.constant 0.000000e+00 : f32
    %85 = arith.addf %cst_43, %84 : f32
    %86 = arith.mulf %19, %25 : f32
    %87 = arith.addf %85, %86 : f32
    %88 = arith.mulf %20, %26 : f32
    %89 = arith.addf %87, %88 : f32
    %90 = arith.mulf %21, %24 : f32
    %cst_44 = arith.constant 0.000000e+00 : f32
    %91 = arith.addf %cst_44, %90 : f32
    %92 = arith.mulf %22, %25 : f32
    %93 = arith.addf %91, %92 : f32
    %94 = arith.mulf %23, %26 : f32
    %95 = arith.addf %93, %94 : f32
    %c0_45 = arith.constant 0 : index
    %c0_46 = arith.constant 0 : index
    %96 = vector.load %arg3[%c0_45, %c0_46] : memref<1x9xf32, #tpu.memory_space<vmem>>, vector<1x9xf32>
    %cst_47 = arith.constant dense<0.000000e+00> : vector<1x50xf32>
    %97 = tpu.matmul %96, %1, %cst_47 {dimension_numbers = #tpu.dot_dimension_numbers<[1], [1], [0], [0], [0, 0, 1, 0], [], []>} : vector<1x9xf32>, vector<50x9xf32>, vector<1x50xf32> -> vector<1x50xf32>
    %98 = arith.addf %97, %4 : vector<1x50xf32>
    %cst_48 = arith.constant 0.000000e+00 : f32
    %99 = vector.broadcast %cst_48 : f32 to vector<1x50xf32>
    %100 = arith.cmpf ogt, %98, %99 : vector<1x50xf32>
    %101 = arith.extui %100 : vector<1x50xi1> to vector<1x50xi32>
    %102 = arith.sitofp %101 : vector<1x50xi32> to vector<1x50xf32>
    %103 = arith.mulf %98, %102 : vector<1x50xf32>
    %cst_49 = arith.constant dense<0.000000e+00> : vector<1x50xf32>
    %104 = tpu.matmul %103, %2, %cst_49 {dimension_numbers = #tpu.dot_dimension_numbers<[1], [1], [0], [0], [0, 0, 1, 0], [], []>} : vector<1x50xf32>, vector<50x50xf32>, vector<1x50xf32> -> vector<1x50xf32>
    %105 = arith.addf %104, %5 : vector<1x50xf32>
    %cst_50 = arith.constant 0.000000e+00 : f32
    %106 = vector.broadcast %cst_50 : f32 to vector<1x50xf32>
    %107 = arith.cmpf ogt, %105, %106 : vector<1x50xf32>
    %108 = arith.extui %107 : vector<1x50xi1> to vector<1x50xi32>
    %109 = arith.sitofp %108 : vector<1x50xi32> to vector<1x50xf32>
    %110 = arith.mulf %3, %109 : vector<1x50xf32>
    %cst_51 = arith.constant dense<0.000000e+00> : vector<1x50xf32>
    %111 = tpu.matmul %110, %2, %cst_51 {dimension_numbers = #tpu.dot_dimension_numbers<[1], [0], [0], [1], [0, 0, 1, 1], [], []>} : vector<1x50xf32>, vector<50x50xf32>, vector<1x50xf32> -> vector<1x50xf32>
    %112 = arith.mulf %111, %102 : vector<1x50xf32>
    %cst_52 = arith.constant dense<0.000000e+00> : vector<1x9xf32>
    %113 = tpu.matmul %112, %1, %cst_52 {dimension_numbers = #tpu.dot_dimension_numbers<[1], [0], [0], [1], [0, 0, 1, 1], [], []>} : vector<1x50xf32>, vector<50x9xf32>, vector<1x9xf32> -> vector<1x9xf32>
    %c0_53 = arith.constant 0 : index
    %c0_54 = arith.constant 0 : index
    %114 = vector.load %arg7[%c0_53, %c0_54] : memref<1x9xf32, #tpu.memory_space<vmem>>, vector<1x9xf32>
    tpu.vector_store %arg7[%c0_53, %c0_54], %113 {strides = array<i32>} : memref<1x9xf32, #tpu.memory_space<vmem>>, vector<1x9xf32>,
    %c0_55 = arith.constant 0 : index
    %c0_56 = arith.constant 0 : index
    %115 = vector.load %arg7[%c0_55, %c0_56] : memref<1x9xf32, #tpu.memory_space<vmem>>, vector<1x1xf32>
    %116 = vector.extract %115[0, 0] : f32 from vector<1x1xf32>
    %c0_57 = arith.constant 0 : index
    %c1_58 = arith.constant 1 : index
    %117 = vector.load %arg7[%c0_57, %c1_58] : memref<1x9xf32, #tpu.memory_space<vmem>>, vector<1x1xf32>
    %118 = vector.extract %117[0, 0] : f32 from vector<1x1xf32>
    %c0_59 = arith.constant 0 : index
    %c2_60 = arith.constant 2 : index
    %119 = vector.load %arg7[%c0_59, %c2_60] : memref<1x9xf32, #tpu.memory_space<vmem>>, vector<1x1xf32>
    %120 = vector.extract %119[0, 0] : f32 from vector<1x1xf32>
    %c0_61 = arith.constant 0 : index
    %c3 = arith.constant 3 : index
    %121 = vector.load %arg7[%c0_61, %c3] : memref<1x9xf32, #tpu.memory_space<vmem>>, vector<1x1xf32>
    %122 = vector.extract %121[0, 0] : f32 from vector<1x1xf32>
    %c0_62 = arith.constant 0 : index
    %c4 = arith.constant 4 : index
    %123 = vector.load %arg7[%c0_62, %c4] : memref<1x9xf32, #tpu.memory_space<vmem>>, vector<1x1xf32>
    %124 = vector.extract %123[0, 0] : f32 from vector<1x1xf32>
    %c0_63 = arith.constant 0 : index
    %c5 = arith.constant 5 : index
    %125 = vector.load %arg7[%c0_63, %c5] : memref<1x9xf32, #tpu.memory_space<vmem>>, vector<1x1xf32>
    %126 = vector.extract %125[0, 0] : f32 from vector<1x1xf32>
    %c0_64 = arith.constant 0 : index
    %c6 = arith.constant 6 : index
    %127 = vector.load %arg7[%c0_64, %c6] : memref<1x9xf32, #tpu.memory_space<vmem>>, vector<1x1xf32>
    %128 = vector.extract %127[0, 0] : f32 from vector<1x1xf32>
    %c0_65 = arith.constant 0 : index
    %c7 = arith.constant 7 : index
    %129 = vector.load %arg7[%c0_65, %c7] : memref<1x9xf32, #tpu.memory_space<vmem>>, vector<1x1xf32>
    %130 = vector.extract %129[0, 0] : f32 from vector<1x1xf32>
    %c0_66 = arith.constant 0 : index
    %c8 = arith.constant 8 : index
    %131 = vector.load %arg7[%c0_66, %c8] : memref<1x9xf32, #tpu.memory_space<vmem>>, vector<1x1xf32>
    %132 = vector.extract %131[0, 0] : f32 from vector<1x1xf32>
    %133 = arith.mulf %120, %7 : f32
    %cst_67 = arith.constant 0.000000e+00 : f32
    %134 = arith.addf %cst_67, %133 : f32
    %135 = arith.mulf %8, %118 : f32
    %136 = arith.subf %134, %135 : f32
    %137 = arith.mulf %126, %10 : f32
    %138 = arith.addf %136, %137 : f32
    %139 = arith.mulf %11, %124 : f32
    %140 = arith.subf %138, %139 : f32
    %141 = arith.mulf %132, %13 : f32
    %142 = arith.addf %140, %141 : f32
    %143 = arith.mulf %14, %130 : f32
    %144 = arith.subf %142, %143 : f32
    %145 = arith.mulf %116, %8 : f32
    %cst_68 = arith.constant 0.000000e+00 : f32
    %146 = arith.addf %cst_68, %145 : f32
    %147 = arith.mulf %6, %120 : f32
    %148 = arith.subf %146, %147 : f32
    %149 = arith.mulf %122, %11 : f32
    %150 = arith.addf %148, %149 : f32
    %151 = arith.mulf %9, %126 : f32
    %152 = arith.subf %150, %151 : f32
    %153 = arith.mulf %128, %14 : f32
    %154 = arith.addf %152, %153 : f32
    %155 = arith.mulf %12, %132 : f32
    %156 = arith.subf %154, %155 : f32
    %157 = arith.mulf %118, %6 : f32
    %cst_69 = arith.constant 0.000000e+00 : f32
    %158 = arith.addf %cst_69, %157 : f32
    %159 = arith.mulf %7, %116 : f32
    %160 = arith.subf %158, %159 : f32
    %161 = arith.mulf %124, %9 : f32
    %162 = arith.addf %160, %161 : f32
    %163 = arith.mulf %10, %122 : f32
    %164 = arith.subf %162, %163 : f32
    %165 = arith.mulf %130, %12 : f32
    %166 = arith.addf %164, %165 : f32
    %167 = arith.mulf %13, %128 : f32
    %168 = arith.subf %166, %167 : f32
    %cst_70 = arith.constant 1.000000e-03 : f32
    %169 = arith.mulf %cst_70, %83 : f32
    %cst_71 = arith.constant 9.99999997E-7 : f32
    %170 = arith.mulf %cst_71, %144 : f32
    %cst_72 = arith.constant 5.000000e-01 : f32
    %171 = arith.mulf %170, %cst_72 : f32
    %172 = arith.addf %169, %171 : f32
    %cst_73 = arith.constant 1.000000e-03 : f32
    %173 = arith.mulf %cst_73, %89 : f32
    %cst_74 = arith.constant 9.99999997E-7 : f32
    %174 = arith.mulf %cst_74, %156 : f32
    %cst_75 = arith.constant 5.000000e-01 : f32
    %175 = arith.mulf %174, %cst_75 : f32
    %176 = arith.addf %173, %175 : f32
    %cst_76 = arith.constant 1.000000e-03 : f32
    %177 = arith.mulf %cst_76, %95 : f32
    %cst_77 = arith.constant 9.99999997E-7 : f32
    %178 = arith.mulf %cst_77, %168 : f32
    %cst_78 = arith.constant 5.000000e-01 : f32
    %179 = arith.mulf %178, %cst_78 : f32
    %180 = arith.addf %177, %179 : f32
    %cst_79 = arith.constant 0.000000e+00 : f32
    %181 = arith.mulf %172, %cst_79 : f32
    %cst_80 = arith.constant 0.000000e+00 : f32
    %182 = arith.mulf %176, %cst_80 : f32
    %183 = arith.addf %181, %182 : f32
    %cst_81 = arith.constant 0.000000e+00 : f32
    %184 = arith.mulf %180, %cst_81 : f32
    %185 = arith.addf %183, %184 : f32
    %cst_82 = arith.constant 0.000000e+00 : f32
    %186 = arith.mulf %176, %cst_82 : f32
    %cst_83 = arith.constant 0.000000e+00 : f32
    %187 = arith.mulf %180, %cst_83 : f32
    %188 = arith.subf %186, %187 : f32
    %cst_84 = arith.constant 0.000000e+00 : f32
    %189 = arith.mulf %180, %cst_84 : f32
    %cst_85 = arith.constant 0.000000e+00 : f32
    %190 = arith.mulf %172, %cst_85 : f32
    %191 = arith.subf %189, %190 : f32
    %cst_86 = arith.constant 0.000000e+00 : f32
    %192 = arith.mulf %172, %cst_86 : f32
    %cst_87 = arith.constant 0.000000e+00 : f32
    %193 = arith.mulf %176, %cst_87 : f32
    %194 = arith.subf %192, %193 : f32
    %cst_88 = arith.constant 0.000000e+00 : f32
    %195 = arith.mulf %15, %cst_88 : f32
    %cst_89 = arith.constant 0.000000e+00 : f32
    %196 = arith.addf %cst_89, %195 : f32
    %cst_90 = arith.constant 0.000000e+00 : f32
    %197 = arith.mulf %16, %cst_90 : f32
    %198 = arith.addf %196, %197 : f32
    %cst_91 = arith.constant 0.000000e+00 : f32
    %199 = arith.mulf %17, %cst_91 : f32
    %200 = arith.addf %198, %199 : f32
    %cst_92 = arith.constant 0.000000e+00 : f32
    %201 = arith.mulf %18, %cst_92 : f32
    %cst_93 = arith.constant 0.000000e+00 : f32
    %202 = arith.addf %cst_93, %201 : f32
    %cst_94 = arith.constant 0.000000e+00 : f32
    %203 = arith.mulf %19, %cst_94 : f32
    %204 = arith.addf %202, %203 : f32
    %cst_95 = arith.constant 0.000000e+00 : f32
    %205 = arith.mulf %20, %cst_95 : f32
    %206 = arith.addf %204, %205 : f32
    %cst_96 = arith.constant 0.000000e+00 : f32
    %207 = arith.mulf %21, %cst_96 : f32
    %cst_97 = arith.constant 0.000000e+00 : f32
    %208 = arith.addf %cst_97, %207 : f32
    %cst_98 = arith.constant 0.000000e+00 : f32
    %209 = arith.mulf %22, %cst_98 : f32
    %210 = arith.addf %208, %209 : f32
    %cst_99 = arith.constant 0.000000e+00 : f32
    %211 = arith.mulf %23, %cst_99 : f32
    %212 = arith.addf %210, %211 : f32
    %213 = arith.addf %172, %188 : f32
    %cst_100 = arith.constant 0.000000e+00 : f32
    %214 = arith.mulf %cst_100, %185 : f32
    %215 = arith.addf %213, %214 : f32
    %cst_101 = arith.constant 2.000000e+00 : f32
    %216 = arith.mulf %cst_101, %200 : f32
    %217 = arith.subf %215, %216 : f32
    %218 = arith.addf %176, %191 : f32
    %cst_102 = arith.constant 0.000000e+00 : f32
    %219 = arith.mulf %cst_102, %185 : f32
    %220 = arith.addf %218, %219 : f32
    %cst_103 = arith.constant 2.000000e+00 : f32
    %221 = arith.mulf %cst_103, %206 : f32
    %222 = arith.subf %220, %221 : f32
    %223 = arith.addf %180, %194 : f32
    %cst_104 = arith.constant 0.000000e+00 : f32
    %224 = arith.mulf %cst_104, %185 : f32
    %225 = arith.addf %223, %224 : f32
    %cst_105 = arith.constant 2.000000e+00 : f32
    %226 = arith.mulf %cst_105, %212 : f32
    %227 = arith.subf %225, %226 : f32
    %cst_106 = arith.constant 0.000000e+00 : f32
    %228 = arith.subf %cst_106, %180 : f32
    %cst_107 = arith.constant 0.000000e+00 : f32
    %229 = arith.subf %cst_107, %172 : f32
    %cst_108 = arith.constant 0.000000e+00 : f32
    %230 = arith.subf %cst_108, %176 : f32
    %cst_109 = arith.constant 1.000000e+00 : f32
    %231 = arith.mulf %185, %cst_109 : f32
    %cst_110 = arith.constant 0.000000e+00 : f32
    %232 = arith.addf %cst_110, %231 : f32
    %cst_111 = arith.constant 2.000000e+00 : f32
    %233 = arith.mulf %cst_111, %15 : f32
    %234 = arith.subf %232, %233 : f32
    %cst_112 = arith.constant 0.000000e+00 : f32
    %235 = arith.mulf %cst_112, %172 : f32
    %236 = arith.addf %234, %235 : f32
    %cst_113 = arith.constant 0.000000e+00 : f32
    %237 = arith.mulf %185, %cst_113 : f32
    %238 = arith.addf %228, %237 : f32
    %cst_114 = arith.constant 2.000000e+00 : f32
    %239 = arith.mulf %cst_114, %16 : f32
    %240 = arith.subf %238, %239 : f32
    %cst_115 = arith.constant 0.000000e+00 : f32
    %241 = arith.mulf %cst_115, %176 : f32
    %242 = arith.addf %240, %241 : f32
    %cst_116 = arith.constant 0.000000e+00 : f32
    %243 = arith.mulf %185, %cst_116 : f32
    %244 = arith.addf %176, %243 : f32
    %cst_117 = arith.constant 2.000000e+00 : f32
    %245 = arith.mulf %cst_117, %17 : f32
    %246 = arith.subf %244, %245 : f32
    %cst_118 = arith.constant 0.000000e+00 : f32
    %247 = arith.mulf %cst_118, %180 : f32
    %248 = arith.addf %246, %247 : f32
    %cst_119 = arith.constant 0.000000e+00 : f32
    %249 = arith.mulf %185, %cst_119 : f32
    %250 = arith.addf %180, %249 : f32
    %cst_120 = arith.constant 2.000000e+00 : f32
    %251 = arith.mulf %cst_120, %18 : f32
    %252 = arith.subf %250, %251 : f32
    %cst_121 = arith.constant 0.000000e+00 : f32
    %253 = arith.mulf %cst_121, %172 : f32
    %254 = arith.addf %252, %253 : f32
    %cst_122 = arith.constant 1.000000e+00 : f32
    %255 = arith.mulf %185, %cst_122 : f32
    %cst_123 = arith.constant 0.000000e+00 : f32
    %256 = arith.addf %cst_123, %255 : f32
    %cst_124 = arith.constant 2.000000e+00 : f32
    %257 = arith.mulf %cst_124, %19 : f32
    %258 = arith.subf %256, %257 : f32
    %cst_125 = arith.constant 0.000000e+00 : f32
    %259 = arith.mulf %cst_125, %176 : f32
    %260 = arith.addf %258, %259 : f32
    %cst_126 = arith.constant 0.000000e+00 : f32
    %261 = arith.mulf %185, %cst_126 : f32
    %262 = arith.addf %229, %261 : f32
    %cst_127 = arith.constant 2.000000e+00 : f32
    %263 = arith.mulf %cst_127, %20 : f32
    %264 = arith.subf %262, %263 : f32
    %cst_128 = arith.constant 0.000000e+00 : f32
    %265 = arith.mulf %cst_128, %180 : f32
    %266 = arith.addf %264, %265 : f32
    %cst_129 = arith.constant 0.000000e+00 : f32
    %267 = arith.mulf %185, %cst_129 : f32
    %268 = arith.addf %230, %267 : f32
    %cst_130 = arith.constant 2.000000e+00 : f32
    %269 = arith.mulf %cst_130, %21 : f32
    %270 = arith.subf %268, %269 : f32
    %cst_131 = arith.constant 0.000000e+00 : f32
    %271 = arith.mulf %cst_131, %172 : f32
    %272 = arith.addf %270, %271 : f32
    %cst_132 = arith.constant 0.000000e+00 : f32
    %273 = arith.mulf %185, %cst_132 : f32
    %274 = arith.addf %172, %273 : f32
    %cst_133 = arith.constant 2.000000e+00 : f32
    %275 = arith.mulf %cst_133, %22 : f32
    %276 = arith.subf %274, %275 : f32
    %cst_134 = arith.constant 0.000000e+00 : f32
    %277 = arith.mulf %cst_134, %176 : f32
    %278 = arith.addf %276, %277 : f32
    %cst_135 = arith.constant 1.000000e+00 : f32
    %279 = arith.mulf %185, %cst_135 : f32
    %cst_136 = arith.constant 0.000000e+00 : f32
    %280 = arith.addf %cst_136, %279 : f32
    %cst_137 = arith.constant 2.000000e+00 : f32
    %281 = arith.mulf %cst_137, %23 : f32
    %282 = arith.subf %280, %281 : f32
    %cst_138 = arith.constant 0.000000e+00 : f32
    %283 = arith.mulf %cst_138, %180 : f32
    %284 = arith.addf %282, %283 : f32
    %285 = arith.mulf %260, %284 : f32
    %286 = arith.mulf %266, %278 : f32
    %287 = arith.subf %285, %286 : f32
    %288 = arith.mulf %236, %287 : f32
    %289 = arith.mulf %254, %284 : f32
    %290 = arith.mulf %266, %272 : f32
    %291 = arith.subf %289, %290 : f32
    %292 = arith.mulf %242, %291 : f32
    %293 = arith.subf %288, %292 : f32
    %294 = arith.mulf %254, %278 : f32
    %295 = arith.mulf %260, %272 : f32
    %296 = arith.subf %294, %295 : f32
    %297 = arith.mulf %248, %296 : f32
    %298 = arith.addf %293, %297 : f32
    %cst_139 = arith.constant 1.000000e+00 : f32
    %299 = arith.divf %cst_139, %298 : f32
    %300 = arith.mulf %260, %284 : f32
    %301 = arith.mulf %266, %278 : f32
    %302 = arith.subf %300, %301 : f32
    %303 = arith.mulf %302, %299 : f32
    %304 = arith.mulf %248, %278 : f32
    %305 = arith.mulf %242, %284 : f32
    %306 = arith.subf %304, %305 : f32
    %307 = arith.mulf %306, %299 : f32
    %308 = arith.mulf %242, %266 : f32
    %309 = arith.mulf %248, %260 : f32
    %310 = arith.subf %308, %309 : f32
    %311 = arith.mulf %310, %299 : f32
    %312 = arith.mulf %266, %272 : f32
    %313 = arith.mulf %254, %284 : f32
    %314 = arith.subf %312, %313 : f32
    %315 = arith.mulf %314, %299 : f32
    %316 = arith.mulf %236, %284 : f32
    %317 = arith.mulf %248, %272 : f32
    %318 = arith.subf %316, %317 : f32
    %319 = arith.mulf %318, %299 : f32
    %320 = arith.mulf %248, %254 : f32
    %321 = arith.mulf %236, %266 : f32
    %322 = arith.subf %320, %321 : f32
    %323 = arith.mulf %322, %299 : f32
    %324 = arith.mulf %254, %278 : f32
    %325 = arith.mulf %260, %272 : f32
    %326 = arith.subf %324, %325 : f32
    %327 = arith.mulf %326, %299 : f32
    %328 = arith.mulf %242, %272 : f32
    %329 = arith.mulf %236, %278 : f32
    %330 = arith.subf %328, %329 : f32
    %331 = arith.mulf %330, %299 : f32
    %332 = arith.mulf %236, %260 : f32
    %333 = arith.mulf %242, %254 : f32
    %334 = arith.subf %332, %333 : f32
    %335 = arith.mulf %334, %299 : f32
    %336 = arith.mulf %303, %217 : f32
    %cst_140 = arith.constant 0.000000e+00 : f32
    %337 = arith.addf %cst_140, %336 : f32
    %338 = arith.mulf %307, %222 : f32
    %339 = arith.addf %337, %338 : f32
    %340 = arith.mulf %311, %227 : f32
    %341 = arith.addf %339, %340 : f32
    %342 = arith.mulf %315, %217 : f32
    %cst_141 = arith.constant 0.000000e+00 : f32
    %343 = arith.addf %cst_141, %342 : f32
    %344 = arith.mulf %319, %222 : f32
    %345 = arith.addf %343, %344 : f32
    %346 = arith.mulf %323, %227 : f32
    %347 = arith.addf %345, %346 : f32
    %348 = arith.mulf %327, %217 : f32
    %cst_142 = arith.constant 0.000000e+00 : f32
    %349 = arith.addf %cst_142, %348 : f32
    %350 = arith.mulf %331, %222 : f32
    %351 = arith.addf %349, %350 : f32
    %352 = arith.mulf %335, %227 : f32
    %353 = arith.addf %351, %352 : f32
    %cst_143 = arith.constant 0.000000e+00 : f32
    %354 = arith.subf %cst_143, %341 : f32
    %cst_144 = arith.constant 0.000000e+00 : f32
    %355 = arith.subf %cst_144, %347 : f32
    %cst_145 = arith.constant 0.000000e+00 : f32
    %356 = arith.subf %cst_145, %353 : f32
    %357 = arith.mulf %172, %354 : f32
    %358 = arith.mulf %176, %355 : f32
    %359 = arith.addf %357, %358 : f32
    %360 = arith.mulf %180, %356 : f32
    %361 = arith.addf %359, %360 : f32
    %362 = arith.mulf %176, %356 : f32
    %363 = arith.mulf %180, %355 : f32
    %364 = arith.subf %362, %363 : f32
    %365 = arith.mulf %180, %354 : f32
    %366 = arith.mulf %172, %356 : f32
    %367 = arith.subf %365, %366 : f32
    %368 = arith.mulf %172, %355 : f32
    %369 = arith.mulf %176, %354 : f32
    %370 = arith.subf %368, %369 : f32
    %371 = arith.mulf %15, %354 : f32
    %cst_146 = arith.constant 0.000000e+00 : f32
    %372 = arith.addf %cst_146, %371 : f32
    %373 = arith.mulf %16, %355 : f32
    %374 = arith.addf %372, %373 : f32
    %375 = arith.mulf %17, %356 : f32
    %376 = arith.addf %374, %375 : f32
    %377 = arith.mulf %18, %354 : f32
    %cst_147 = arith.constant 0.000000e+00 : f32
    %378 = arith.addf %cst_147, %377 : f32
    %379 = arith.mulf %19, %355 : f32
    %380 = arith.addf %378, %379 : f32
    %381 = arith.mulf %20, %356 : f32
    %382 = arith.addf %380, %381 : f32
    %383 = arith.mulf %21, %354 : f32
    %cst_148 = arith.constant 0.000000e+00 : f32
    %384 = arith.addf %cst_148, %383 : f32
    %385 = arith.mulf %22, %355 : f32
    %386 = arith.addf %384, %385 : f32
    %387 = arith.mulf %23, %356 : f32
    %388 = arith.addf %386, %387 : f32
    %389 = arith.addf %172, %364 : f32
    %390 = arith.mulf %354, %361 : f32
    %391 = arith.addf %389, %390 : f32
    %cst_149 = arith.constant 2.000000e+00 : f32
    %392 = arith.mulf %cst_149, %376 : f32
    %393 = arith.subf %391, %392 : f32
    %394 = arith.addf %176, %367 : f32
    %395 = arith.mulf %355, %361 : f32
    %396 = arith.addf %394, %395 : f32
    %cst_150 = arith.constant 2.000000e+00 : f32
    %397 = arith.mulf %cst_150, %382 : f32
    %398 = arith.subf %396, %397 : f32
    %399 = arith.addf %180, %370 : f32
    %400 = arith.mulf %356, %361 : f32
    %401 = arith.addf %399, %400 : f32
    %cst_151 = arith.constant 2.000000e+00 : f32
    %402 = arith.mulf %cst_151, %388 : f32
    %403 = arith.subf %401, %402 : f32
    %cst_152 = arith.constant 0.000000e+00 : f32
    %404 = arith.subf %cst_152, %180 : f32
    %cst_153 = arith.constant 0.000000e+00 : f32
    %405 = arith.subf %cst_153, %172 : f32
    %cst_154 = arith.constant 0.000000e+00 : f32
    %406 = arith.subf %cst_154, %176 : f32
    %cst_155 = arith.constant 1.000000e+00 : f32
    %407 = arith.mulf %361, %cst_155 : f32
    %cst_156 = arith.constant 0.000000e+00 : f32
    %408 = arith.addf %cst_156, %407 : f32
    %cst_157 = arith.constant 2.000000e+00 : f32
    %409 = arith.mulf %cst_157, %15 : f32
    %410 = arith.subf %408, %409 : f32
    %411 = arith.mulf %354, %172 : f32
    %412 = arith.addf %410, %411 : f32
    %cst_158 = arith.constant 0.000000e+00 : f32
    %413 = arith.mulf %361, %cst_158 : f32
    %414 = arith.addf %404, %413 : f32
    %cst_159 = arith.constant 2.000000e+00 : f32
    %415 = arith.mulf %cst_159, %16 : f32
    %416 = arith.subf %414, %415 : f32
    %417 = arith.mulf %354, %176 : f32
    %418 = arith.addf %416, %417 : f32
    %cst_160 = arith.constant 0.000000e+00 : f32
    %419 = arith.mulf %361, %cst_160 : f32
    %420 = arith.addf %176, %419 : f32
    %cst_161 = arith.constant 2.000000e+00 : f32
    %421 = arith.mulf %cst_161, %17 : f32
    %422 = arith.subf %420, %421 : f32
    %423 = arith.mulf %354, %180 : f32
    %424 = arith.addf %422, %423 : f32
    %cst_162 = arith.constant 0.000000e+00 : f32
    %425 = arith.mulf %361, %cst_162 : f32
    %426 = arith.addf %180, %425 : f32
    %cst_163 = arith.constant 2.000000e+00 : f32
    %427 = arith.mulf %cst_163, %18 : f32
    %428 = arith.subf %426, %427 : f32
    %429 = arith.mulf %355, %172 : f32
    %430 = arith.addf %428, %429 : f32
    %cst_164 = arith.constant 1.000000e+00 : f32
    %431 = arith.mulf %361, %cst_164 : f32
    %cst_165 = arith.constant 0.000000e+00 : f32
    %432 = arith.addf %cst_165, %431 : f32
    %cst_166 = arith.constant 2.000000e+00 : f32
    %433 = arith.mulf %cst_166, %19 : f32
    %434 = arith.subf %432, %433 : f32
    %435 = arith.mulf %355, %176 : f32
    %436 = arith.addf %434, %435 : f32
    %cst_167 = arith.constant 0.000000e+00 : f32
    %437 = arith.mulf %361, %cst_167 : f32
    %438 = arith.addf %405, %437 : f32
    %cst_168 = arith.constant 2.000000e+00 : f32
    %439 = arith.mulf %cst_168, %20 : f32
    %440 = arith.subf %438, %439 : f32
    %441 = arith.mulf %355, %180 : f32
    %442 = arith.addf %440, %441 : f32
    %cst_169 = arith.constant 0.000000e+00 : f32
    %443 = arith.mulf %361, %cst_169 : f32
    %444 = arith.addf %406, %443 : f32
    %cst_170 = arith.constant 2.000000e+00 : f32
    %445 = arith.mulf %cst_170, %21 : f32
    %446 = arith.subf %444, %445 : f32
    %447 = arith.mulf %356, %172 : f32
    %448 = arith.addf %446, %447 : f32
    %cst_171 = arith.constant 0.000000e+00 : f32
    %449 = arith.mulf %361, %cst_171 : f32
    %450 = arith.addf %172, %449 : f32
    %cst_172 = arith.constant 2.000000e+00 : f32
    %451 = arith.mulf %cst_172, %22 : f32
    %452 = arith.subf %450, %451 : f32
    %453 = arith.mulf %356, %176 : f32
    %454 = arith.addf %452, %453 : f32
    %cst_173 = arith.constant 1.000000e+00 : f32
    %455 = arith.mulf %361, %cst_173 : f32
    %cst_174 = arith.constant 0.000000e+00 : f32
    %456 = arith.addf %cst_174, %455 : f32
    %cst_175 = arith.constant 2.000000e+00 : f32
    %457 = arith.mulf %cst_175, %23 : f32
    %458 = arith.subf %456, %457 : f32
    %459 = arith.mulf %356, %180 : f32
    %460 = arith.addf %458, %459 : f32
    %461 = arith.mulf %436, %460 : f32
    %462 = arith.mulf %442, %454 : f32
    %463 = arith.subf %461, %462 : f32
    %464 = arith.mulf %412, %463 : f32
    %465 = arith.mulf %430, %460 : f32
    %466 = arith.mulf %442, %448 : f32
    %467 = arith.subf %465, %466 : f32
    %468 = arith.mulf %418, %467 : f32
    %469 = arith.subf %464, %468 : f32
    %470 = arith.mulf %430, %454 : f32
    %471 = arith.mulf %436, %448 : f32
    %472 = arith.subf %470, %471 : f32
    %473 = arith.mulf %424, %472 : f32
    %474 = arith.addf %469, %473 : f32
    %cst_176 = arith.constant 1.000000e+00 : f32
    %475 = arith.divf %cst_176, %474 : f32
    %476 = arith.mulf %436, %460 : f32
    %477 = arith.mulf %442, %454 : f32
    %478 = arith.subf %476, %477 : f32
    %479 = arith.mulf %478, %475 : f32
    %480 = arith.mulf %424, %454 : f32
    %481 = arith.mulf %418, %460 : f32
    %482 = arith.subf %480, %481 : f32
    %483 = arith.mulf %482, %475 : f32
    %484 = arith.mulf %418, %442 : f32
    %485 = arith.mulf %424, %436 : f32
    %486 = arith.subf %484, %485 : f32
    %487 = arith.mulf %486, %475 : f32
    %488 = arith.mulf %442, %448 : f32
    %489 = arith.mulf %430, %460 : f32
    %490 = arith.subf %488, %489 : f32
    %491 = arith.mulf %490, %475 : f32
    %492 = arith.mulf %412, %460 : f32
    %493 = arith.mulf %424, %448 : f32
    %494 = arith.subf %492, %493 : f32
    %495 = arith.mulf %494, %475 : f32
    %496 = arith.mulf %424, %430 : f32
    %497 = arith.mulf %412, %442 : f32
    %498 = arith.subf %496, %497 : f32
    %499 = arith.mulf %498, %475 : f32
    %500 = arith.mulf %430, %454 : f32
    %501 = arith.mulf %436, %448 : f32
    %502 = arith.subf %500, %501 : f32
    %503 = arith.mulf %502, %475 : f32
    %504 = arith.mulf %418, %448 : f32
    %505 = arith.mulf %412, %454 : f32
    %506 = arith.subf %504, %505 : f32
    %507 = arith.mulf %506, %475 : f32
    %508 = arith.mulf %412, %436 : f32
    %509 = arith.mulf %418, %430 : f32
    %510 = arith.subf %508, %509 : f32
    %511 = arith.mulf %510, %475 : f32
    %512 = arith.mulf %479, %393 : f32
    %cst_177 = arith.constant 0.000000e+00 : f32
    %513 = arith.addf %cst_177, %512 : f32
    %514 = arith.mulf %483, %398 : f32
    %515 = arith.addf %513, %514 : f32
    %516 = arith.mulf %487, %403 : f32
    %517 = arith.addf %515, %516 : f32
    %518 = arith.mulf %491, %393 : f32
    %cst_178 = arith.constant 0.000000e+00 : f32
    %519 = arith.addf %cst_178, %518 : f32
    %520 = arith.mulf %495, %398 : f32
    %521 = arith.addf %519, %520 : f32
    %522 = arith.mulf %499, %403 : f32
    %523 = arith.addf %521, %522 : f32
    %524 = arith.mulf %503, %393 : f32
    %cst_179 = arith.constant 0.000000e+00 : f32
    %525 = arith.addf %cst_179, %524 : f32
    %526 = arith.mulf %507, %398 : f32
    %527 = arith.addf %525, %526 : f32
    %528 = arith.mulf %511, %403 : f32
    %529 = arith.addf %527, %528 : f32
    %530 = arith.subf %354, %517 : f32
    %531 = arith.subf %355, %523 : f32
    %532 = arith.subf %356, %529 : f32
    %533 = arith.mulf %172, %530 : f32
    %534 = arith.mulf %176, %531 : f32
    %535 = arith.addf %533, %534 : f32
    %536 = arith.mulf %180, %532 : f32
    %537 = arith.addf %535, %536 : f32
    %538 = arith.mulf %176, %532 : f32
    %539 = arith.mulf %180, %531 : f32
    %540 = arith.subf %538, %539 : f32
    %541 = arith.mulf %180, %530 : f32
    %542 = arith.mulf %172, %532 : f32
    %543 = arith.subf %541, %542 : f32
    %544 = arith.mulf %172, %531 : f32
    %545 = arith.mulf %176, %530 : f32
    %546 = arith.subf %544, %545 : f32
    %547 = arith.mulf %15, %530 : f32
    %cst_180 = arith.constant 0.000000e+00 : f32
    %548 = arith.addf %cst_180, %547 : f32
    %549 = arith.mulf %16, %531 : f32
    %550 = arith.addf %548, %549 : f32
    %551 = arith.mulf %17, %532 : f32
    %552 = arith.addf %550, %551 : f32
    %553 = arith.mulf %18, %530 : f32
    %cst_181 = arith.constant 0.000000e+00 : f32
    %554 = arith.addf %cst_181, %553 : f32
    %555 = arith.mulf %19, %531 : f32
    %556 = arith.addf %554, %555 : f32
    %557 = arith.mulf %20, %532 : f32
    %558 = arith.addf %556, %557 : f32
    %559 = arith.mulf %21, %530 : f32
    %cst_182 = arith.constant 0.000000e+00 : f32
    %560 = arith.addf %cst_182, %559 : f32
    %561 = arith.mulf %22, %531 : f32
    %562 = arith.addf %560, %561 : f32
    %563 = arith.mulf %23, %532 : f32
    %564 = arith.addf %562, %563 : f32
    %565 = arith.addf %172, %540 : f32
    %566 = arith.mulf %530, %537 : f32
    %567 = arith.addf %565, %566 : f32
    %cst_183 = arith.constant 2.000000e+00 : f32
    %568 = arith.mulf %cst_183, %552 : f32
    %569 = arith.subf %567, %568 : f32
    %570 = arith.addf %176, %543 : f32
    %571 = arith.mulf %531, %537 : f32
    %572 = arith.addf %570, %571 : f32
    %cst_184 = arith.constant 2.000000e+00 : f32
    %573 = arith.mulf %cst_184, %558 : f32
    %574 = arith.subf %572, %573 : f32
    %575 = arith.addf %180, %546 : f32
    %576 = arith.mulf %532, %537 : f32
    %577 = arith.addf %575, %576 : f32
    %cst_185 = arith.constant 2.000000e+00 : f32
    %578 = arith.mulf %cst_185, %564 : f32
    %579 = arith.subf %577, %578 : f32
    %cst_186 = arith.constant 0.000000e+00 : f32
    %580 = arith.subf %cst_186, %180 : f32
    %cst_187 = arith.constant 0.000000e+00 : f32
    %581 = arith.subf %cst_187, %172 : f32
    %cst_188 = arith.constant 0.000000e+00 : f32
    %582 = arith.subf %cst_188, %176 : f32
    %cst_189 = arith.constant 1.000000e+00 : f32
    %583 = arith.mulf %537, %cst_189 : f32
    %cst_190 = arith.constant 0.000000e+00 : f32
    %584 = arith.addf %cst_190, %583 : f32
    %cst_191 = arith.constant 2.000000e+00 : f32
    %585 = arith.mulf %cst_191, %15 : f32
    %586 = arith.subf %584, %585 : f32
    %587 = arith.mulf %530, %172 : f32
    %588 = arith.addf %586, %587 : f32
    %cst_192 = arith.constant 0.000000e+00 : f32
    %589 = arith.mulf %537, %cst_192 : f32
    %590 = arith.addf %580, %589 : f32
    %cst_193 = arith.constant 2.000000e+00 : f32
    %591 = arith.mulf %cst_193, %16 : f32
    %592 = arith.subf %590, %591 : f32
    %593 = arith.mulf %530, %176 : f32
    %594 = arith.addf %592, %593 : f32
    %cst_194 = arith.constant 0.000000e+00 : f32
    %595 = arith.mulf %537, %cst_194 : f32
    %596 = arith.addf %176, %595 : f32
    %cst_195 = arith.constant 2.000000e+00 : f32
    %597 = arith.mulf %cst_195, %17 : f32
    %598 = arith.subf %596, %597 : f32
    %599 = arith.mulf %530, %180 : f32
    %600 = arith.addf %598, %599 : f32
    %cst_196 = arith.constant 0.000000e+00 : f32
    %601 = arith.mulf %537, %cst_196 : f32
    %602 = arith.addf %180, %601 : f32
    %cst_197 = arith.constant 2.000000e+00 : f32
    %603 = arith.mulf %cst_197, %18 : f32
    %604 = arith.subf %602, %603 : f32
    %605 = arith.mulf %531, %172 : f32
    %606 = arith.addf %604, %605 : f32
    %cst_198 = arith.constant 1.000000e+00 : f32
    %607 = arith.mulf %537, %cst_198 : f32
    %cst_199 = arith.constant 0.000000e+00 : f32
    %608 = arith.addf %cst_199, %607 : f32
    %cst_200 = arith.constant 2.000000e+00 : f32
    %609 = arith.mulf %cst_200, %19 : f32
    %610 = arith.subf %608, %609 : f32
    %611 = arith.mulf %531, %176 : f32
    %612 = arith.addf %610, %611 : f32
    %cst_201 = arith.constant 0.000000e+00 : f32
    %613 = arith.mulf %537, %cst_201 : f32
    %614 = arith.addf %581, %613 : f32
    %cst_202 = arith.constant 2.000000e+00 : f32
    %615 = arith.mulf %cst_202, %20 : f32
    %616 = arith.subf %614, %615 : f32
    %617 = arith.mulf %531, %180 : f32
    %618 = arith.addf %616, %617 : f32
    %cst_203 = arith.constant 0.000000e+00 : f32
    %619 = arith.mulf %537, %cst_203 : f32
    %620 = arith.addf %582, %619 : f32
    %cst_204 = arith.constant 2.000000e+00 : f32
    %621 = arith.mulf %cst_204, %21 : f32
    %622 = arith.subf %620, %621 : f32
    %623 = arith.mulf %532, %172 : f32
    %624 = arith.addf %622, %623 : f32
    %cst_205 = arith.constant 0.000000e+00 : f32
    %625 = arith.mulf %537, %cst_205 : f32
    %626 = arith.addf %172, %625 : f32
    %cst_206 = arith.constant 2.000000e+00 : f32
    %627 = arith.mulf %cst_206, %22 : f32
    %628 = arith.subf %626, %627 : f32
    %629 = arith.mulf %532, %176 : f32
    %630 = arith.addf %628, %629 : f32
    %cst_207 = arith.constant 1.000000e+00 : f32
    %631 = arith.mulf %537, %cst_207 : f32
    %cst_208 = arith.constant 0.000000e+00 : f32
    %632 = arith.addf %cst_208, %631 : f32
    %cst_209 = arith.constant 2.000000e+00 : f32
    %633 = arith.mulf %cst_209, %23 : f32
    %634 = arith.subf %632, %633 : f32
    %635 = arith.mulf %532, %180 : f32
    %636 = arith.addf %634, %635 : f32
    %637 = arith.mulf %612, %636 : f32
    %638 = arith.mulf %618, %630 : f32
    %639 = arith.subf %637, %638 : f32
    %640 = arith.mulf %588, %639 : f32
    %641 = arith.mulf %606, %636 : f32
    %642 = arith.mulf %618, %624 : f32
    %643 = arith.subf %641, %642 : f32
    %644 = arith.mulf %594, %643 : f32
    %645 = arith.subf %640, %644 : f32
    %646 = arith.mulf %606, %630 : f32
    %647 = arith.mulf %612, %624 : f32
    %648 = arith.subf %646, %647 : f32
    %649 = arith.mulf %600, %648 : f32
    %650 = arith.addf %645, %649 : f32
    %cst_210 = arith.constant 1.000000e+00 : f32
    %651 = arith.divf %cst_210, %650 : f32
    %652 = arith.mulf %612, %636 : f32
    %653 = arith.mulf %618, %630 : f32
    %654 = arith.subf %652, %653 : f32
    %655 = arith.mulf %654, %651 : f32
    %656 = arith.mulf %600, %630 : f32
    %657 = arith.mulf %594, %636 : f32
    %658 = arith.subf %656, %657 : f32
    %659 = arith.mulf %658, %651 : f32
    %660 = arith.mulf %594, %618 : f32
    %661 = arith.mulf %600, %612 : f32
    %662 = arith.subf %660, %661 : f32
    %663 = arith.mulf %662, %651 : f32
    %664 = arith.mulf %618, %624 : f32
    %665 = arith.mulf %606, %636 : f32
    %666 = arith.subf %664, %665 : f32
    %667 = arith.mulf %666, %651 : f32
    %668 = arith.mulf %588, %636 : f32
    %669 = arith.mulf %600, %624 : f32
    %670 = arith.subf %668, %669 : f32
    %671 = arith.mulf %670, %651 : f32
    %672 = arith.mulf %600, %606 : f32
    %673 = arith.mulf %588, %618 : f32
    %674 = arith.subf %672, %673 : f32
    %675 = arith.mulf %674, %651 : f32
    %676 = arith.mulf %606, %630 : f32
    %677 = arith.mulf %612, %624 : f32
    %678 = arith.subf %676, %677 : f32
    %679 = arith.mulf %678, %651 : f32
    %680 = arith.mulf %594, %624 : f32
    %681 = arith.mulf %588, %630 : f32
    %682 = arith.subf %680, %681 : f32
    %683 = arith.mulf %682, %651 : f32
    %684 = arith.mulf %588, %612 : f32
    %685 = arith.mulf %594, %606 : f32
    %686 = arith.subf %684, %685 : f32
    %687 = arith.mulf %686, %651 : f32
    %688 = arith.mulf %655, %569 : f32
    %cst_211 = arith.constant 0.000000e+00 : f32
    %689 = arith.addf %cst_211, %688 : f32
    %690 = arith.mulf %659, %574 : f32
    %691 = arith.addf %689, %690 : f32
    %692 = arith.mulf %663, %579 : f32
    %693 = arith.addf %691, %692 : f32
    %694 = arith.mulf %667, %569 : f32
    %cst_212 = arith.constant 0.000000e+00 : f32
    %695 = arith.addf %cst_212, %694 : f32
    %696 = arith.mulf %671, %574 : f32
    %697 = arith.addf %695, %696 : f32
    %698 = arith.mulf %675, %579 : f32
    %699 = arith.addf %697, %698 : f32
    %700 = arith.mulf %679, %569 : f32
    %cst_213 = arith.constant 0.000000e+00 : f32
    %701 = arith.addf %cst_213, %700 : f32
    %702 = arith.mulf %683, %574 : f32
    %703 = arith.addf %701, %702 : f32
    %704 = arith.mulf %687, %579 : f32
    %705 = arith.addf %703, %704 : f32
    %706 = arith.subf %530, %693 : f32
    %707 = arith.subf %531, %699 : f32
    %708 = arith.subf %532, %705 : f32
    %709 = arith.mulf %172, %706 : f32
    %710 = arith.mulf %176, %707 : f32
    %711 = arith.addf %709, %710 : f32
    %712 = arith.mulf %180, %708 : f32
    %713 = arith.addf %711, %712 : f32
    %714 = arith.mulf %176, %708 : f32
    %715 = arith.mulf %180, %707 : f32
    %716 = arith.subf %714, %715 : f32
    %717 = arith.mulf %180, %706 : f32
    %718 = arith.mulf %172, %708 : f32
    %719 = arith.subf %717, %718 : f32
    %720 = arith.mulf %172, %707 : f32
    %721 = arith.mulf %176, %706 : f32
    %722 = arith.subf %720, %721 : f32
    %723 = arith.mulf %15, %706 : f32
    %cst_214 = arith.constant 0.000000e+00 : f32
    %724 = arith.addf %cst_214, %723 : f32
    %725 = arith.mulf %16, %707 : f32
    %726 = arith.addf %724, %725 : f32
    %727 = arith.mulf %17, %708 : f32
    %728 = arith.addf %726, %727 : f32
    %729 = arith.mulf %18, %706 : f32
    %cst_215 = arith.constant 0.000000e+00 : f32
    %730 = arith.addf %cst_215, %729 : f32
    %731 = arith.mulf %19, %707 : f32
    %732 = arith.addf %730, %731 : f32
    %733 = arith.mulf %20, %708 : f32
    %734 = arith.addf %732, %733 : f32
    %735 = arith.mulf %21, %706 : f32
    %cst_216 = arith.constant 0.000000e+00 : f32
    %736 = arith.addf %cst_216, %735 : f32
    %737 = arith.mulf %22, %707 : f32
    %738 = arith.addf %736, %737 : f32
    %739 = arith.mulf %23, %708 : f32
    %740 = arith.addf %738, %739 : f32
    %741 = arith.addf %172, %716 : f32
    %742 = arith.mulf %706, %713 : f32
    %743 = arith.addf %741, %742 : f32
    %cst_217 = arith.constant 2.000000e+00 : f32
    %744 = arith.mulf %cst_217, %728 : f32
    %745 = arith.subf %743, %744 : f32
    %746 = arith.addf %176, %719 : f32
    %747 = arith.mulf %707, %713 : f32
    %748 = arith.addf %746, %747 : f32
    %cst_218 = arith.constant 2.000000e+00 : f32
    %749 = arith.mulf %cst_218, %734 : f32
    %750 = arith.subf %748, %749 : f32
    %751 = arith.addf %180, %722 : f32
    %752 = arith.mulf %708, %713 : f32
    %753 = arith.addf %751, %752 : f32
    %cst_219 = arith.constant 2.000000e+00 : f32
    %754 = arith.mulf %cst_219, %740 : f32
    %755 = arith.subf %753, %754 : f32
    %cst_220 = arith.constant 0.000000e+00 : f32
    %756 = arith.subf %cst_220, %180 : f32
    %cst_221 = arith.constant 0.000000e+00 : f32
    %757 = arith.subf %cst_221, %172 : f32
    %cst_222 = arith.constant 0.000000e+00 : f32
    %758 = arith.subf %cst_222, %176 : f32
    %cst_223 = arith.constant 1.000000e+00 : f32
    %759 = arith.mulf %713, %cst_223 : f32
    %cst_224 = arith.constant 0.000000e+00 : f32
    %760 = arith.addf %cst_224, %759 : f32
    %cst_225 = arith.constant 2.000000e+00 : f32
    %761 = arith.mulf %cst_225, %15 : f32
    %762 = arith.subf %760, %761 : f32
    %763 = arith.mulf %706, %172 : f32
    %764 = arith.addf %762, %763 : f32
    %cst_226 = arith.constant 0.000000e+00 : f32
    %765 = arith.mulf %713, %cst_226 : f32
    %766 = arith.addf %756, %765 : f32
    %cst_227 = arith.constant 2.000000e+00 : f32
    %767 = arith.mulf %cst_227, %16 : f32
    %768 = arith.subf %766, %767 : f32
    %769 = arith.mulf %706, %176 : f32
    %770 = arith.addf %768, %769 : f32
    %cst_228 = arith.constant 0.000000e+00 : f32
    %771 = arith.mulf %713, %cst_228 : f32
    %772 = arith.addf %176, %771 : f32
    %cst_229 = arith.constant 2.000000e+00 : f32
    %773 = arith.mulf %cst_229, %17 : f32
    %774 = arith.subf %772, %773 : f32
    %775 = arith.mulf %706, %180 : f32
    %776 = arith.addf %774, %775 : f32
    %cst_230 = arith.constant 0.000000e+00 : f32
    %777 = arith.mulf %713, %cst_230 : f32
    %778 = arith.addf %180, %777 : f32
    %cst_231 = arith.constant 2.000000e+00 : f32
    %779 = arith.mulf %cst_231, %18 : f32
    %780 = arith.subf %778, %779 : f32
    %781 = arith.mulf %707, %172 : f32
    %782 = arith.addf %780, %781 : f32
    %cst_232 = arith.constant 1.000000e+00 : f32
    %783 = arith.mulf %713, %cst_232 : f32
    %cst_233 = arith.constant 0.000000e+00 : f32
    %784 = arith.addf %cst_233, %783 : f32
    %cst_234 = arith.constant 2.000000e+00 : f32
    %785 = arith.mulf %cst_234, %19 : f32
    %786 = arith.subf %784, %785 : f32
    %787 = arith.mulf %707, %176 : f32
    %788 = arith.addf %786, %787 : f32
    %cst_235 = arith.constant 0.000000e+00 : f32
    %789 = arith.mulf %713, %cst_235 : f32
    %790 = arith.addf %757, %789 : f32
    %cst_236 = arith.constant 2.000000e+00 : f32
    %791 = arith.mulf %cst_236, %20 : f32
    %792 = arith.subf %790, %791 : f32
    %793 = arith.mulf %707, %180 : f32
    %794 = arith.addf %792, %793 : f32
    %cst_237 = arith.constant 0.000000e+00 : f32
    %795 = arith.mulf %713, %cst_237 : f32
    %796 = arith.addf %758, %795 : f32
    %cst_238 = arith.constant 2.000000e+00 : f32
    %797 = arith.mulf %cst_238, %21 : f32
    %798 = arith.subf %796, %797 : f32
    %799 = arith.mulf %708, %172 : f32
    %800 = arith.addf %798, %799 : f32
    %cst_239 = arith.constant 0.000000e+00 : f32
    %801 = arith.mulf %713, %cst_239 : f32
    %802 = arith.addf %172, %801 : f32
    %cst_240 = arith.constant 2.000000e+00 : f32
    %803 = arith.mulf %cst_240, %22 : f32
    %804 = arith.subf %802, %803 : f32
    %805 = arith.mulf %708, %176 : f32
    %806 = arith.addf %804, %805 : f32
    %cst_241 = arith.constant 1.000000e+00 : f32
    %807 = arith.mulf %713, %cst_241 : f32
    %cst_242 = arith.constant 0.000000e+00 : f32
    %808 = arith.addf %cst_242, %807 : f32
    %cst_243 = arith.constant 2.000000e+00 : f32
    %809 = arith.mulf %cst_243, %23 : f32
    %810 = arith.subf %808, %809 : f32
    %811 = arith.mulf %708, %180 : f32
    %812 = arith.addf %810, %811 : f32
    %813 = arith.mulf %788, %812 : f32
    %814 = arith.mulf %794, %806 : f32
    %815 = arith.subf %813, %814 : f32
    %816 = arith.mulf %764, %815 : f32
    %817 = arith.mulf %782, %812 : f32
    %818 = arith.mulf %794, %800 : f32
    %819 = arith.subf %817, %818 : f32
    %820 = arith.mulf %770, %819 : f32
    %821 = arith.subf %816, %820 : f32
    %822 = arith.mulf %782, %806 : f32
    %823 = arith.mulf %788, %800 : f32
    %824 = arith.subf %822, %823 : f32
    %825 = arith.mulf %776, %824 : f32
    %826 = arith.addf %821, %825 : f32
    %cst_244 = arith.constant 1.000000e+00 : f32
    %827 = arith.divf %cst_244, %826 : f32
    %828 = arith.mulf %788, %812 : f32
    %829 = arith.mulf %794, %806 : f32
    %830 = arith.subf %828, %829 : f32
    %831 = arith.mulf %830, %827 : f32
    %832 = arith.mulf %776, %806 : f32
    %833 = arith.mulf %770, %812 : f32
    %834 = arith.subf %832, %833 : f32
    %835 = arith.mulf %834, %827 : f32
    %836 = arith.mulf %770, %794 : f32
    %837 = arith.mulf %776, %788 : f32
    %838 = arith.subf %836, %837 : f32
    %839 = arith.mulf %838, %827 : f32
    %840 = arith.mulf %794, %800 : f32
    %841 = arith.mulf %782, %812 : f32
    %842 = arith.subf %840, %841 : f32
    %843 = arith.mulf %842, %827 : f32
    %844 = arith.mulf %764, %812 : f32
    %845 = arith.mulf %776, %800 : f32
    %846 = arith.subf %844, %845 : f32
    %847 = arith.mulf %846, %827 : f32
    %848 = arith.mulf %776, %782 : f32
    %849 = arith.mulf %764, %794 : f32
    %850 = arith.subf %848, %849 : f32
    %851 = arith.mulf %850, %827 : f32
    %852 = arith.mulf %782, %806 : f32
    %853 = arith.mulf %788, %800 : f32
    %854 = arith.subf %852, %853 : f32
    %855 = arith.mulf %854, %827 : f32
    %856 = arith.mulf %770, %800 : f32
    %857 = arith.mulf %764, %806 : f32
    %858 = arith.subf %856, %857 : f32
    %859 = arith.mulf %858, %827 : f32
    %860 = arith.mulf %764, %788 : f32
    %861 = arith.mulf %770, %782 : f32
    %862 = arith.subf %860, %861 : f32
    %863 = arith.mulf %862, %827 : f32
    %864 = arith.mulf %831, %745 : f32
    %cst_245 = arith.constant 0.000000e+00 : f32
    %865 = arith.addf %cst_245, %864 : f32
    %866 = arith.mulf %835, %750 : f32
    %867 = arith.addf %865, %866 : f32
    %868 = arith.mulf %839, %755 : f32
    %869 = arith.addf %867, %868 : f32
    %870 = arith.mulf %843, %745 : f32
    %cst_246 = arith.constant 0.000000e+00 : f32
    %871 = arith.addf %cst_246, %870 : f32
    %872 = arith.mulf %847, %750 : f32
    %873 = arith.addf %871, %872 : f32
    %874 = arith.mulf %851, %755 : f32
    %875 = arith.addf %873, %874 : f32
    %876 = arith.mulf %855, %745 : f32
    %cst_247 = arith.constant 0.000000e+00 : f32
    %877 = arith.addf %cst_247, %876 : f32
    %878 = arith.mulf %859, %750 : f32
    %879 = arith.addf %877, %878 : f32
    %880 = arith.mulf %863, %755 : f32
    %881 = arith.addf %879, %880 : f32
    %882 = arith.subf %706, %869 : f32
    %883 = arith.subf %707, %875 : f32
    %884 = arith.subf %708, %881 : f32
    %885 = arith.mulf %172, %882 : f32
    %886 = arith.mulf %176, %883 : f32
    %887 = arith.addf %885, %886 : f32
    %888 = arith.mulf %180, %884 : f32
    %889 = arith.addf %887, %888 : f32
    %890 = arith.mulf %176, %884 : f32
    %891 = arith.mulf %180, %883 : f32
    %892 = arith.subf %890, %891 : f32
    %893 = arith.mulf %180, %882 : f32
    %894 = arith.mulf %172, %884 : f32
    %895 = arith.subf %893, %894 : f32
    %896 = arith.mulf %172, %883 : f32
    %897 = arith.mulf %176, %882 : f32
    %898 = arith.subf %896, %897 : f32
    %899 = arith.mulf %15, %882 : f32
    %cst_248 = arith.constant 0.000000e+00 : f32
    %900 = arith.addf %cst_248, %899 : f32
    %901 = arith.mulf %16, %883 : f32
    %902 = arith.addf %900, %901 : f32
    %903 = arith.mulf %17, %884 : f32
    %904 = arith.addf %902, %903 : f32
    %905 = arith.mulf %18, %882 : f32
    %cst_249 = arith.constant 0.000000e+00 : f32
    %906 = arith.addf %cst_249, %905 : f32
    %907 = arith.mulf %19, %883 : f32
    %908 = arith.addf %906, %907 : f32
    %909 = arith.mulf %20, %884 : f32
    %910 = arith.addf %908, %909 : f32
    %911 = arith.mulf %21, %882 : f32
    %cst_250 = arith.constant 0.000000e+00 : f32
    %912 = arith.addf %cst_250, %911 : f32
    %913 = arith.mulf %22, %883 : f32
    %914 = arith.addf %912, %913 : f32
    %915 = arith.mulf %23, %884 : f32
    %916 = arith.addf %914, %915 : f32
    %917 = arith.addf %172, %892 : f32
    %918 = arith.mulf %882, %889 : f32
    %919 = arith.addf %917, %918 : f32
    %cst_251 = arith.constant 2.000000e+00 : f32
    %920 = arith.mulf %cst_251, %904 : f32
    %921 = arith.subf %919, %920 : f32
    %922 = arith.addf %176, %895 : f32
    %923 = arith.mulf %883, %889 : f32
    %924 = arith.addf %922, %923 : f32
    %cst_252 = arith.constant 2.000000e+00 : f32
    %925 = arith.mulf %cst_252, %910 : f32
    %926 = arith.subf %924, %925 : f32
    %927 = arith.addf %180, %898 : f32
    %928 = arith.mulf %884, %889 : f32
    %929 = arith.addf %927, %928 : f32
    %cst_253 = arith.constant 2.000000e+00 : f32
    %930 = arith.mulf %cst_253, %916 : f32
    %931 = arith.subf %929, %930 : f32
    %cst_254 = arith.constant 0.000000e+00 : f32
    %932 = arith.subf %cst_254, %180 : f32
    %cst_255 = arith.constant 0.000000e+00 : f32
    %933 = arith.subf %cst_255, %172 : f32
    %cst_256 = arith.constant 0.000000e+00 : f32
    %934 = arith.subf %cst_256, %176 : f32
    %cst_257 = arith.constant 1.000000e+00 : f32
    %935 = arith.mulf %889, %cst_257 : f32
    %cst_258 = arith.constant 0.000000e+00 : f32
    %936 = arith.addf %cst_258, %935 : f32
    %cst_259 = arith.constant 2.000000e+00 : f32
    %937 = arith.mulf %cst_259, %15 : f32
    %938 = arith.subf %936, %937 : f32
    %939 = arith.mulf %882, %172 : f32
    %940 = arith.addf %938, %939 : f32
    %cst_260 = arith.constant 0.000000e+00 : f32
    %941 = arith.mulf %889, %cst_260 : f32
    %942 = arith.addf %932, %941 : f32
    %cst_261 = arith.constant 2.000000e+00 : f32
    %943 = arith.mulf %cst_261, %16 : f32
    %944 = arith.subf %942, %943 : f32
    %945 = arith.mulf %882, %176 : f32
    %946 = arith.addf %944, %945 : f32
    %cst_262 = arith.constant 0.000000e+00 : f32
    %947 = arith.mulf %889, %cst_262 : f32
    %948 = arith.addf %176, %947 : f32
    %cst_263 = arith.constant 2.000000e+00 : f32
    %949 = arith.mulf %cst_263, %17 : f32
    %950 = arith.subf %948, %949 : f32
    %951 = arith.mulf %882, %180 : f32
    %952 = arith.addf %950, %951 : f32
    %cst_264 = arith.constant 0.000000e+00 : f32
    %953 = arith.mulf %889, %cst_264 : f32
    %954 = arith.addf %180, %953 : f32
    %cst_265 = arith.constant 2.000000e+00 : f32
    %955 = arith.mulf %cst_265, %18 : f32
    %956 = arith.subf %954, %955 : f32
    %957 = arith.mulf %883, %172 : f32
    %958 = arith.addf %956, %957 : f32
    %cst_266 = arith.constant 1.000000e+00 : f32
    %959 = arith.mulf %889, %cst_266 : f32
    %cst_267 = arith.constant 0.000000e+00 : f32
    %960 = arith.addf %cst_267, %959 : f32
    %cst_268 = arith.constant 2.000000e+00 : f32
    %961 = arith.mulf %cst_268, %19 : f32
    %962 = arith.subf %960, %961 : f32
    %963 = arith.mulf %883, %176 : f32
    %964 = arith.addf %962, %963 : f32
    %cst_269 = arith.constant 0.000000e+00 : f32
    %965 = arith.mulf %889, %cst_269 : f32
    %966 = arith.addf %933, %965 : f32
    %cst_270 = arith.constant 2.000000e+00 : f32
    %967 = arith.mulf %cst_270, %20 : f32
    %968 = arith.subf %966, %967 : f32
    %969 = arith.mulf %883, %180 : f32
    %970 = arith.addf %968, %969 : f32
    %cst_271 = arith.constant 0.000000e+00 : f32
    %971 = arith.mulf %889, %cst_271 : f32
    %972 = arith.addf %934, %971 : f32
    %cst_272 = arith.constant 2.000000e+00 : f32
    %973 = arith.mulf %cst_272, %21 : f32
    %974 = arith.subf %972, %973 : f32
    %975 = arith.mulf %884, %172 : f32
    %976 = arith.addf %974, %975 : f32
    %cst_273 = arith.constant 0.000000e+00 : f32
    %977 = arith.mulf %889, %cst_273 : f32
    %978 = arith.addf %172, %977 : f32
    %cst_274 = arith.constant 2.000000e+00 : f32
    %979 = arith.mulf %cst_274, %22 : f32
    %980 = arith.subf %978, %979 : f32
    %981 = arith.mulf %884, %176 : f32
    %982 = arith.addf %980, %981 : f32
    %cst_275 = arith.constant 1.000000e+00 : f32
    %983 = arith.mulf %889, %cst_275 : f32
    %cst_276 = arith.constant 0.000000e+00 : f32
    %984 = arith.addf %cst_276, %983 : f32
    %cst_277 = arith.constant 2.000000e+00 : f32
    %985 = arith.mulf %cst_277, %23 : f32
    %986 = arith.subf %984, %985 : f32
    %987 = arith.mulf %884, %180 : f32
    %988 = arith.addf %986, %987 : f32
    %989 = arith.mulf %964, %988 : f32
    %990 = arith.mulf %970, %982 : f32
    %991 = arith.subf %989, %990 : f32
    %992 = arith.mulf %940, %991 : f32
    %993 = arith.mulf %958, %988 : f32
    %994 = arith.mulf %970, %976 : f32
    %995 = arith.subf %993, %994 : f32
    %996 = arith.mulf %946, %995 : f32
    %997 = arith.subf %992, %996 : f32
    %998 = arith.mulf %958, %982 : f32
    %999 = arith.mulf %964, %976 : f32
    %1000 = arith.subf %998, %999 : f32
    %1001 = arith.mulf %952, %1000 : f32
    %1002 = arith.addf %997, %1001 : f32
    %cst_278 = arith.constant 1.000000e+00 : f32
    %1003 = arith.divf %cst_278, %1002 : f32
    %1004 = arith.mulf %964, %988 : f32
    %1005 = arith.mulf %970, %982 : f32
    %1006 = arith.subf %1004, %1005 : f32
    %1007 = arith.mulf %1006, %1003 : f32
    %1008 = arith.mulf %952, %982 : f32
    %1009 = arith.mulf %946, %988 : f32
    %1010 = arith.subf %1008, %1009 : f32
    %1011 = arith.mulf %1010, %1003 : f32
    %1012 = arith.mulf %946, %970 : f32
    %1013 = arith.mulf %952, %964 : f32
    %1014 = arith.subf %1012, %1013 : f32
    %1015 = arith.mulf %1014, %1003 : f32
    %1016 = arith.mulf %970, %976 : f32
    %1017 = arith.mulf %958, %988 : f32
    %1018 = arith.subf %1016, %1017 : f32
    %1019 = arith.mulf %1018, %1003 : f32
    %1020 = arith.mulf %940, %988 : f32
    %1021 = arith.mulf %952, %976 : f32
    %1022 = arith.subf %1020, %1021 : f32
    %1023 = arith.mulf %1022, %1003 : f32
    %1024 = arith.mulf %952, %958 : f32
    %1025 = arith.mulf %940, %970 : f32
    %1026 = arith.subf %1024, %1025 : f32
    %1027 = arith.mulf %1026, %1003 : f32
    %1028 = arith.mulf %958, %982 : f32
    %1029 = arith.mulf %964, %976 : f32
    %1030 = arith.subf %1028, %1029 : f32
    %1031 = arith.mulf %1030, %1003 : f32
    %1032 = arith.mulf %946, %976 : f32
    %1033 = arith.mulf %940, %982 : f32
    %1034 = arith.subf %1032, %1033 : f32
    %1035 = arith.mulf %1034, %1003 : f32
    %1036 = arith.mulf %940, %964 : f32
    %1037 = arith.mulf %946, %958 : f32
    %1038 = arith.subf %1036, %1037 : f32
    %1039 = arith.mulf %1038, %1003 : f32
    %1040 = arith.mulf %1007, %921 : f32
    %cst_279 = arith.constant 0.000000e+00 : f32
    %1041 = arith.addf %cst_279, %1040 : f32
    %1042 = arith.mulf %1011, %926 : f32
    %1043 = arith.addf %1041, %1042 : f32
    %1044 = arith.mulf %1015, %931 : f32
    %1045 = arith.addf %1043, %1044 : f32
    %1046 = arith.mulf %1019, %921 : f32
    %cst_280 = arith.constant 0.000000e+00 : f32
    %1047 = arith.addf %cst_280, %1046 : f32
    %1048 = arith.mulf %1023, %926 : f32
    %1049 = arith.addf %1047, %1048 : f32
    %1050 = arith.mulf %1027, %931 : f32
    %1051 = arith.addf %1049, %1050 : f32
    %1052 = arith.mulf %1031, %921 : f32
    %cst_281 = arith.constant 0.000000e+00 : f32
    %1053 = arith.addf %cst_281, %1052 : f32
    %1054 = arith.mulf %1035, %926 : f32
    %1055 = arith.addf %1053, %1054 : f32
    %1056 = arith.mulf %1039, %931 : f32
    %1057 = arith.addf %1055, %1056 : f32
    %1058 = arith.subf %882, %1045 : f32
    %1059 = arith.subf %883, %1051 : f32
    %1060 = arith.subf %884, %1057 : f32
    %cst_282 = arith.constant 0.000000e+00 : f32
    %1061 = arith.subf %cst_282, %1060 : f32
    %cst_283 = arith.constant 0.000000e+00 : f32
    %1062 = arith.subf %cst_283, %1058 : f32
    %cst_284 = arith.constant 0.000000e+00 : f32
    %1063 = arith.subf %cst_284, %1059 : f32
    %cst_285 = arith.constant 0.000000e+00 : f32
    %1064 = arith.addf %cst_285, %1061 : f32
    %cst_286 = arith.constant 0.000000e+00 : f32
    %1065 = arith.addf %cst_286, %1059 : f32
    %cst_287 = arith.constant 0.000000e+00 : f32
    %1066 = arith.addf %cst_287, %1060 : f32
    %cst_288 = arith.constant 0.000000e+00 : f32
    %1067 = arith.addf %cst_288, %1062 : f32
    %cst_289 = arith.constant 0.000000e+00 : f32
    %1068 = arith.addf %cst_289, %1063 : f32
    %cst_290 = arith.constant 0.000000e+00 : f32
    %1069 = arith.addf %cst_290, %1058 : f32
    %cst_291 = arith.constant 0.000000e+00 : f32
    %1070 = arith.subf %cst_291, %1061 : f32
    %cst_292 = arith.constant 0.000000e+00 : f32
    %1071 = arith.subf %cst_292, %1059 : f32
    %cst_293 = arith.constant 0.000000e+00 : f32
    %1072 = arith.subf %cst_293, %1060 : f32
    %cst_294 = arith.constant 0.000000e+00 : f32
    %1073 = arith.subf %cst_294, %1062 : f32
    %cst_295 = arith.constant 0.000000e+00 : f32
    %1074 = arith.subf %cst_295, %1063 : f32
    %cst_296 = arith.constant 0.000000e+00 : f32
    %1075 = arith.subf %cst_296, %1058 : f32
    %1076 = arith.mulf %1073, %1075 : f32
    %cst_297 = arith.constant 1.000000e+00 : f32
    %1077 = arith.subf %cst_297, %1076 : f32
    %cst_298 = arith.constant 1.000000e+00 : f32
    %1078 = arith.mulf %cst_298, %1077 : f32
    %cst_299 = arith.constant 1.000000e+00 : f32
    %1079 = arith.mulf %1072, %cst_299 : f32
    %1080 = arith.mulf %1073, %1074 : f32
    %1081 = arith.subf %1079, %1080 : f32
    %1082 = arith.mulf %1070, %1081 : f32
    %1083 = arith.subf %1078, %1082 : f32
    %1084 = arith.mulf %1072, %1075 : f32
    %cst_300 = arith.constant 1.000000e+00 : f32
    %1085 = arith.mulf %cst_300, %1074 : f32
    %1086 = arith.subf %1084, %1085 : f32
    %1087 = arith.mulf %1071, %1086 : f32
    %1088 = arith.addf %1083, %1087 : f32
    %cst_301 = arith.constant 1.000000e+00 : f32
    %1089 = arith.divf %cst_301, %1088 : f32
    %1090 = arith.mulf %1073, %1075 : f32
    %cst_302 = arith.constant 1.000000e+00 : f32
    %1091 = arith.subf %cst_302, %1090 : f32
    %1092 = arith.mulf %1091, %1089 : f32
    %1093 = arith.mulf %1071, %1075 : f32
    %cst_303 = arith.constant 1.000000e+00 : f32
    %1094 = arith.mulf %1070, %cst_303 : f32
    %1095 = arith.subf %1093, %1094 : f32
    %1096 = arith.mulf %1095, %1089 : f32
    %1097 = arith.mulf %1070, %1073 : f32
    %cst_304 = arith.constant 1.000000e+00 : f32
    %1098 = arith.mulf %1071, %cst_304 : f32
    %1099 = arith.subf %1097, %1098 : f32
    %1100 = arith.mulf %1099, %1089 : f32
    %1101 = arith.mulf %1073, %1074 : f32
    %cst_305 = arith.constant 1.000000e+00 : f32
    %1102 = arith.mulf %1072, %cst_305 : f32
    %1103 = arith.subf %1101, %1102 : f32
    %1104 = arith.mulf %1103, %1089 : f32
    %1105 = arith.mulf %1071, %1074 : f32
    %cst_306 = arith.constant 1.000000e+00 : f32
    %1106 = arith.subf %cst_306, %1105 : f32
    %1107 = arith.mulf %1106, %1089 : f32
    %1108 = arith.mulf %1071, %1072 : f32
    %cst_307 = arith.constant 1.000000e+00 : f32
    %1109 = arith.mulf %cst_307, %1073 : f32
    %1110 = arith.subf %1108, %1109 : f32
    %1111 = arith.mulf %1110, %1089 : f32
    %1112 = arith.mulf %1072, %1075 : f32
    %cst_308 = arith.constant 1.000000e+00 : f32
    %1113 = arith.mulf %cst_308, %1074 : f32
    %1114 = arith.subf %1112, %1113 : f32
    %1115 = arith.mulf %1114, %1089 : f32
    %1116 = arith.mulf %1070, %1074 : f32
    %cst_309 = arith.constant 1.000000e+00 : f32
    %1117 = arith.mulf %cst_309, %1075 : f32
    %1118 = arith.subf %1116, %1117 : f32
    %1119 = arith.mulf %1118, %1089 : f32
    %1120 = arith.mulf %1070, %1072 : f32
    %cst_310 = arith.constant 1.000000e+00 : f32
    %1121 = arith.subf %cst_310, %1120 : f32
    %1122 = arith.mulf %1121, %1089 : f32
    %cst_311 = arith.constant 1.000000e+00 : f32
    %1123 = arith.mulf %cst_311, %1092 : f32
    %cst_312 = arith.constant 0.000000e+00 : f32
    %1124 = arith.addf %cst_312, %1123 : f32
    %1125 = arith.mulf %1064, %1104 : f32
    %1126 = arith.addf %1124, %1125 : f32
    %1127 = arith.mulf %1065, %1115 : f32
    %1128 = arith.addf %1126, %1127 : f32
    %cst_313 = arith.constant 1.000000e+00 : f32
    %1129 = arith.mulf %cst_313, %1096 : f32
    %cst_314 = arith.constant 0.000000e+00 : f32
    %1130 = arith.addf %cst_314, %1129 : f32
    %1131 = arith.mulf %1064, %1107 : f32
    %1132 = arith.addf %1130, %1131 : f32
    %1133 = arith.mulf %1065, %1119 : f32
    %1134 = arith.addf %1132, %1133 : f32
    %cst_315 = arith.constant 1.000000e+00 : f32
    %1135 = arith.mulf %cst_315, %1100 : f32
    %cst_316 = arith.constant 0.000000e+00 : f32
    %1136 = arith.addf %cst_316, %1135 : f32
    %1137 = arith.mulf %1064, %1111 : f32
    %1138 = arith.addf %1136, %1137 : f32
    %1139 = arith.mulf %1065, %1122 : f32
    %1140 = arith.addf %1138, %1139 : f32
    %1141 = arith.mulf %1066, %1092 : f32
    %cst_317 = arith.constant 0.000000e+00 : f32
    %1142 = arith.addf %cst_317, %1141 : f32
    %cst_318 = arith.constant 1.000000e+00 : f32
    %1143 = arith.mulf %cst_318, %1104 : f32
    %1144 = arith.addf %1142, %1143 : f32
    %1145 = arith.mulf %1067, %1115 : f32
    %1146 = arith.addf %1144, %1145 : f32
    %1147 = arith.mulf %1066, %1096 : f32
    %cst_319 = arith.constant 0.000000e+00 : f32
    %1148 = arith.addf %cst_319, %1147 : f32
    %cst_320 = arith.constant 1.000000e+00 : f32
    %1149 = arith.mulf %cst_320, %1107 : f32
    %1150 = arith.addf %1148, %1149 : f32
    %1151 = arith.mulf %1067, %1119 : f32
    %1152 = arith.addf %1150, %1151 : f32
    %1153 = arith.mulf %1066, %1100 : f32
    %cst_321 = arith.constant 0.000000e+00 : f32
    %1154 = arith.addf %cst_321, %1153 : f32
    %cst_322 = arith.constant 1.000000e+00 : f32
    %1155 = arith.mulf %cst_322, %1111 : f32
    %1156 = arith.addf %1154, %1155 : f32
    %1157 = arith.mulf %1067, %1122 : f32
    %1158 = arith.addf %1156, %1157 : f32
    %1159 = arith.mulf %1068, %1092 : f32
    %cst_323 = arith.constant 0.000000e+00 : f32
    %1160 = arith.addf %cst_323, %1159 : f32
    %1161 = arith.mulf %1069, %1104 : f32
    %1162 = arith.addf %1160, %1161 : f32
    %cst_324 = arith.constant 1.000000e+00 : f32
    %1163 = arith.mulf %cst_324, %1115 : f32
    %1164 = arith.addf %1162, %1163 : f32
    %1165 = arith.mulf %1068, %1096 : f32
    %cst_325 = arith.constant 0.000000e+00 : f32
    %1166 = arith.addf %cst_325, %1165 : f32
    %1167 = arith.mulf %1069, %1107 : f32
    %1168 = arith.addf %1166, %1167 : f32
    %cst_326 = arith.constant 1.000000e+00 : f32
    %1169 = arith.mulf %cst_326, %1119 : f32
    %1170 = arith.addf %1168, %1169 : f32
    %1171 = arith.mulf %1068, %1100 : f32
    %cst_327 = arith.constant 0.000000e+00 : f32
    %1172 = arith.addf %cst_327, %1171 : f32
    %1173 = arith.mulf %1069, %1111 : f32
    %1174 = arith.addf %1172, %1173 : f32
    %cst_328 = arith.constant 1.000000e+00 : f32
    %1175 = arith.mulf %cst_328, %1122 : f32
    %1176 = arith.addf %1174, %1175 : f32
    %1177 = arith.mulf %6, %1128 : f32
    %cst_329 = arith.constant 0.000000e+00 : f32
    %1178 = arith.addf %cst_329, %1177 : f32
    %1179 = arith.mulf %7, %1146 : f32
    %1180 = arith.addf %1178, %1179 : f32
    %1181 = arith.mulf %8, %1164 : f32
    %1182 = arith.addf %1180, %1181 : f32
    %1183 = arith.mulf %6, %1134 : f32
    %cst_330 = arith.constant 0.000000e+00 : f32
    %1184 = arith.addf %cst_330, %1183 : f32
    %1185 = arith.mulf %7, %1152 : f32
    %1186 = arith.addf %1184, %1185 : f32
    %1187 = arith.mulf %8, %1170 : f32
    %1188 = arith.addf %1186, %1187 : f32
    %1189 = arith.mulf %6, %1140 : f32
    %cst_331 = arith.constant 0.000000e+00 : f32
    %1190 = arith.addf %cst_331, %1189 : f32
    %1191 = arith.mulf %7, %1158 : f32
    %1192 = arith.addf %1190, %1191 : f32
    %1193 = arith.mulf %8, %1176 : f32
    %1194 = arith.addf %1192, %1193 : f32
    %1195 = arith.mulf %9, %1128 : f32
    %cst_332 = arith.constant 0.000000e+00 : f32
    %1196 = arith.addf %cst_332, %1195 : f32
    %1197 = arith.mulf %10, %1146 : f32
    %1198 = arith.addf %1196, %1197 : f32
    %1199 = arith.mulf %11, %1164 : f32
    %1200 = arith.addf %1198, %1199 : f32
    %1201 = arith.mulf %9, %1134 : f32
    %cst_333 = arith.constant 0.000000e+00 : f32
    %1202 = arith.addf %cst_333, %1201 : f32
    %1203 = arith.mulf %10, %1152 : f32
    %1204 = arith.addf %1202, %1203 : f32
    %1205 = arith.mulf %11, %1170 : f32
    %1206 = arith.addf %1204, %1205 : f32
    %1207 = arith.mulf %9, %1140 : f32
    %cst_334 = arith.constant 0.000000e+00 : f32
    %1208 = arith.addf %cst_334, %1207 : f32
    %1209 = arith.mulf %10, %1158 : f32
    %1210 = arith.addf %1208, %1209 : f32
    %1211 = arith.mulf %11, %1176 : f32
    %1212 = arith.addf %1210, %1211 : f32
    %1213 = arith.mulf %12, %1128 : f32
    %cst_335 = arith.constant 0.000000e+00 : f32
    %1214 = arith.addf %cst_335, %1213 : f32
    %1215 = arith.mulf %13, %1146 : f32
    %1216 = arith.addf %1214, %1215 : f32
    %1217 = arith.mulf %14, %1164 : f32
    %1218 = arith.addf %1216, %1217 : f32
    %1219 = arith.mulf %12, %1134 : f32
    %cst_336 = arith.constant 0.000000e+00 : f32
    %1220 = arith.addf %cst_336, %1219 : f32
    %1221 = arith.mulf %13, %1152 : f32
    %1222 = arith.addf %1220, %1221 : f32
    %1223 = arith.mulf %14, %1170 : f32
    %1224 = arith.addf %1222, %1223 : f32
    %1225 = arith.mulf %12, %1140 : f32
    %cst_337 = arith.constant 0.000000e+00 : f32
    %1226 = arith.addf %cst_337, %1225 : f32
    %1227 = arith.mulf %13, %1158 : f32
    %1228 = arith.addf %1226, %1227 : f32
    %1229 = arith.mulf %14, %1176 : f32
    %1230 = arith.addf %1228, %1229 : f32
    %c0_i32 = arith.constant 0 : i32
    %1231 = vector.broadcast %c0_i32 : i32 to vector<1x9xi32>
    %1232 = arith.cmpi eq, %0, %1231 : vector<1x9xi32>
    %cst_338 = arith.constant 0.000000e+00 : f32
    %1233 = vector.broadcast %1182 : f32 to vector<1x9xf32>
    %1234 = vector.broadcast %cst_338 : f32 to vector<1x9xf32>
    %1235 = arith.select %1232, %1233, %1234 : vector<1x9xi1>, vector<1x9xf32>
    %c1_i32 = arith.constant 1 : i32
    %1236 = vector.broadcast %c1_i32 : i32 to vector<1x9xi32>
    %1237 = arith.cmpi eq, %0, %1236 : vector<1x9xi32>
    %cst_339 = arith.constant 0.000000e+00 : f32
    %1238 = vector.broadcast %1188 : f32 to vector<1x9xf32>
    %1239 = vector.broadcast %cst_339 : f32 to vector<1x9xf32>
    %1240 = arith.select %1237, %1238, %1239 : vector<1x9xi1>, vector<1x9xf32>
    %c2_i32 = arith.constant 2 : i32
    %1241 = vector.broadcast %c2_i32 : i32 to vector<1x9xi32>
    %1242 = arith.cmpi eq, %0, %1241 : vector<1x9xi32>
    %cst_340 = arith.constant 0.000000e+00 : f32
    %1243 = vector.broadcast %1194 : f32 to vector<1x9xf32>
    %1244 = vector.broadcast %cst_340 : f32 to vector<1x9xf32>
    %1245 = arith.select %1242, %1243, %1244 : vector<1x9xi1>, vector<1x9xf32>
    %c3_i32 = arith.constant 3 : i32
    %1246 = vector.broadcast %c3_i32 : i32 to vector<1x9xi32>
    %1247 = arith.cmpi eq, %0, %1246 : vector<1x9xi32>
    %cst_341 = arith.constant 0.000000e+00 : f32
    %1248 = vector.broadcast %1200 : f32 to vector<1x9xf32>
    %1249 = vector.broadcast %cst_341 : f32 to vector<1x9xf32>
    %1250 = arith.select %1247, %1248, %1249 : vector<1x9xi1>, vector<1x9xf32>
    %c4_i32 = arith.constant 4 : i32
    %1251 = vector.broadcast %c4_i32 : i32 to vector<1x9xi32>
    %1252 = arith.cmpi eq, %0, %1251 : vector<1x9xi32>
    %cst_342 = arith.constant 0.000000e+00 : f32
    %1253 = vector.broadcast %1206 : f32 to vector<1x9xf32>
    %1254 = vector.broadcast %cst_342 : f32 to vector<1x9xf32>
    %1255 = arith.select %1252, %1253, %1254 : vector<1x9xi1>, vector<1x9xf32>
    %c5_i32 = arith.constant 5 : i32
    %1256 = vector.broadcast %c5_i32 : i32 to vector<1x9xi32>
    %1257 = arith.cmpi eq, %0, %1256 : vector<1x9xi32>
    %cst_343 = arith.constant 0.000000e+00 : f32
    %1258 = vector.broadcast %1212 : f32 to vector<1x9xf32>
    %1259 = vector.broadcast %cst_343 : f32 to vector<1x9xf32>
    %1260 = arith.select %1257, %1258, %1259 : vector<1x9xi1>, vector<1x9xf32>
    %c6_i32 = arith.constant 6 : i32
    %1261 = vector.broadcast %c6_i32 : i32 to vector<1x9xi32>
    %1262 = arith.cmpi eq, %0, %1261 : vector<1x9xi32>
    %cst_344 = arith.constant 0.000000e+00 : f32
    %1263 = vector.broadcast %1218 : f32 to vector<1x9xf32>
    %1264 = vector.broadcast %cst_344 : f32 to vector<1x9xf32>
    %1265 = arith.select %1262, %1263, %1264 : vector<1x9xi1>, vector<1x9xf32>
    %c7_i32 = arith.constant 7 : i32
    %1266 = vector.broadcast %c7_i32 : i32 to vector<1x9xi32>
    %1267 = arith.cmpi eq, %0, %1266 : vector<1x9xi32>
    %cst_345 = arith.constant 0.000000e+00 : f32
    %1268 = vector.broadcast %1224 : f32 to vector<1x9xf32>
    %1269 = vector.broadcast %cst_345 : f32 to vector<1x9xf32>
    %1270 = arith.select %1267, %1268, %1269 : vector<1x9xi1>, vector<1x9xf32>
    %c8_i32 = arith.constant 8 : i32
    %1271 = vector.broadcast %c8_i32 : i32 to vector<1x9xi32>
    %1272 = arith.cmpi eq, %0, %1271 : vector<1x9xi32>
    %cst_346 = arith.constant 0.000000e+00 : f32
    %1273 = vector.broadcast %1230 : f32 to vector<1x9xf32>
    %1274 = vector.broadcast %cst_346 : f32 to vector<1x9xf32>
    %1275 = arith.select %1272, %1273, %1274 : vector<1x9xi1>, vector<1x9xf32>
    %1276 = arith.addf %1235, %1240 : vector<1x9xf32>
    %1277 = arith.addf %1245, %1250 : vector<1x9xf32>
    %1278 = arith.addf %1255, %1260 : vector<1x9xf32>
    %1279 = arith.addf %1265, %1270 : vector<1x9xf32>
    %1280 = arith.addf %1276, %1277 : vector<1x9xf32>
    %1281 = arith.addf %1278, %1279 : vector<1x9xf32>
    %1282 = arith.addf %1280, %1281 : vector<1x9xf32>
    %1283 = arith.addf %1282, %1275 : vector<1x9xf32>
    %cst_347 = arith.constant dense<0.000000e+00> : vector<1x50xf32>
    %1284 = tpu.matmul %1283, %1, %cst_347 {dimension_numbers = #tpu.dot_dimension_numbers<[1], [1], [0], [0], [0, 0, 1, 0], [], []>} : vector<1x9xf32>, vector<50x9xf32>, vector<1x50xf32> -> vector<1x50xf32>
    %1285 = arith.addf %1284, %4 : vector<1x50xf32>
    %cst_348 = arith.constant 0.000000e+00 : f32
    %1286 = vector.broadcast %cst_348 : f32 to vector<1x50xf32>
    %1287 = arith.cmpf ogt, %1285, %1286 : vector<1x50xf32>
    %1288 = arith.extui %1287 : vector<1x50xi1> to vector<1x50xi32>
    %1289 = arith.sitofp %1288 : vector<1x50xi32> to vector<1x50xf32>
    %1290 = arith.mulf %1285, %1289 : vector<1x50xf32>
    %cst_349 = arith.constant dense<0.000000e+00> : vector<1x50xf32>
    %1291 = tpu.matmul %1290, %2, %cst_349 {dimension_numbers = #tpu.dot_dimension_numbers<[1], [1], [0], [0], [0, 0, 1, 0], [], []>} : vector<1x50xf32>, vector<50x50xf32>, vector<1x50xf32> -> vector<1x50xf32>
    %1292 = arith.addf %1291, %5 : vector<1x50xf32>
    %cst_350 = arith.constant 0.000000e+00 : f32
    %1293 = vector.broadcast %cst_350 : f32 to vector<1x50xf32>
    %1294 = arith.cmpf ogt, %1292, %1293 : vector<1x50xf32>
    %1295 = arith.extui %1294 : vector<1x50xi1> to vector<1x50xi32>
    %1296 = arith.sitofp %1295 : vector<1x50xi32> to vector<1x50xf32>
    %1297 = arith.mulf %3, %1296 : vector<1x50xf32>
    %cst_351 = arith.constant dense<0.000000e+00> : vector<1x50xf32>
    %1298 = tpu.matmul %1297, %2, %cst_351 {dimension_numbers = #tpu.dot_dimension_numbers<[1], [0], [0], [1], [0, 0, 1, 1], [], []>} : vector<1x50xf32>, vector<50x50xf32>, vector<1x50xf32> -> vector<1x50xf32>
    %1299 = arith.mulf %1298, %1289 : vector<1x50xf32>
    %cst_352 = arith.constant dense<0.000000e+00> : vector<1x9xf32>
    %1300 = tpu.matmul %1299, %1, %cst_352 {dimension_numbers = #tpu.dot_dimension_numbers<[1], [0], [0], [1], [0, 0, 1, 1], [], []>} : vector<1x50xf32>, vector<50x9xf32>, vector<1x9xf32> -> vector<1x9xf32>
    %c0_353 = arith.constant 0 : index
    %c0_354 = arith.constant 0 : index
    %1301 = vector.load %arg7[%c0_353, %c0_354] : memref<1x9xf32, #tpu.memory_space<vmem>>, vector<1x9xf32>
    tpu.vector_store %arg7[%c0_353, %c0_354], %1300 {strides = array<i32>} : memref<1x9xf32, #tpu.memory_space<vmem>>, vector<1x9xf32>,
    %c0_355 = arith.constant 0 : index
    %c0_356 = arith.constant 0 : index
    %1302 = vector.load %arg7[%c0_355, %c0_356] : memref<1x9xf32, #tpu.memory_space<vmem>>, vector<1x1xf32>
    %1303 = vector.extract %1302[0, 0] : f32 from vector<1x1xf32>
    %c0_357 = arith.constant 0 : index
    %c1_358 = arith.constant 1 : index
    %1304 = vector.load %arg7[%c0_357, %c1_358] : memref<1x9xf32, #tpu.memory_space<vmem>>, vector<1x1xf32>
    %1305 = vector.extract %1304[0, 0] : f32 from vector<1x1xf32>
    %c0_359 = arith.constant 0 : index
    %c2_360 = arith.constant 2 : index
    %1306 = vector.load %arg7[%c0_359, %c2_360] : memref<1x9xf32, #tpu.memory_space<vmem>>, vector<1x1xf32>
    %1307 = vector.extract %1306[0, 0] : f32 from vector<1x1xf32>
    %c0_361 = arith.constant 0 : index
    %c3_362 = arith.constant 3 : index
    %1308 = vector.load %arg7[%c0_361, %c3_362] : memref<1x9xf32, #tpu.memory_space<vmem>>, vector<1x1xf32>
    %1309 = vector.extract %1308[0, 0] : f32 from vector<1x1xf32>
    %c0_363 = arith.constant 0 : index
    %c4_364 = arith.constant 4 : index
    %1310 = vector.load %arg7[%c0_363, %c4_364] : memref<1x9xf32, #tpu.memory_space<vmem>>, vector<1x1xf32>
    %1311 = vector.extract %1310[0, 0] : f32 from vector<1x1xf32>
    %c0_365 = arith.constant 0 : index
    %c5_366 = arith.constant 5 : index
    %1312 = vector.load %arg7[%c0_365, %c5_366] : memref<1x9xf32, #tpu.memory_space<vmem>>, vector<1x1xf32>
    %1313 = vector.extract %1312[0, 0] : f32 from vector<1x1xf32>
    %c0_367 = arith.constant 0 : index
    %c6_368 = arith.constant 6 : index
    %1314 = vector.load %arg7[%c0_367, %c6_368] : memref<1x9xf32, #tpu.memory_space<vmem>>, vector<1x1xf32>
    %1315 = vector.extract %1314[0, 0] : f32 from vector<1x1xf32>
    %c0_369 = arith.constant 0 : index
    %c7_370 = arith.constant 7 : index
    %1316 = vector.load %arg7[%c0_369, %c7_370] : memref<1x9xf32, #tpu.memory_space<vmem>>, vector<1x1xf32>
    %1317 = vector.extract %1316[0, 0] : f32 from vector<1x1xf32>
    %c0_371 = arith.constant 0 : index
    %c8_372 = arith.constant 8 : index
    %1318 = vector.load %arg7[%c0_371, %c8_372] : memref<1x9xf32, #tpu.memory_space<vmem>>, vector<1x1xf32>
    %1319 = vector.extract %1318[0, 0] : f32 from vector<1x1xf32>
    %1320 = arith.mulf %1307, %1188 : f32
    %cst_373 = arith.constant 0.000000e+00 : f32
    %1321 = arith.addf %cst_373, %1320 : f32
    %1322 = arith.mulf %1194, %1305 : f32
    %1323 = arith.subf %1321, %1322 : f32
    %1324 = arith.mulf %1313, %1206 : f32
    %1325 = arith.addf %1323, %1324 : f32
    %1326 = arith.mulf %1212, %1311 : f32
    %1327 = arith.subf %1325, %1326 : f32
    %1328 = arith.mulf %1319, %1224 : f32
    %1329 = arith.addf %1327, %1328 : f32
    %1330 = arith.mulf %1230, %1317 : f32
    %1331 = arith.subf %1329, %1330 : f32
    %1332 = arith.mulf %1303, %1194 : f32
    %cst_374 = arith.constant 0.000000e+00 : f32
    %1333 = arith.addf %cst_374, %1332 : f32
    %1334 = arith.mulf %1182, %1307 : f32
    %1335 = arith.subf %1333, %1334 : f32
    %1336 = arith.mulf %1309, %1212 : f32
    %1337 = arith.addf %1335, %1336 : f32
    %1338 = arith.mulf %1200, %1313 : f32
    %1339 = arith.subf %1337, %1338 : f32
    %1340 = arith.mulf %1315, %1230 : f32
    %1341 = arith.addf %1339, %1340 : f32
    %1342 = arith.mulf %1218, %1319 : f32
    %1343 = arith.subf %1341, %1342 : f32
    %1344 = arith.mulf %1305, %1182 : f32
    %cst_375 = arith.constant 0.000000e+00 : f32
    %1345 = arith.addf %cst_375, %1344 : f32
    %1346 = arith.mulf %1188, %1303 : f32
    %1347 = arith.subf %1345, %1346 : f32
    %1348 = arith.mulf %1311, %1200 : f32
    %1349 = arith.addf %1347, %1348 : f32
    %1350 = arith.mulf %1206, %1309 : f32
    %1351 = arith.subf %1349, %1350 : f32
    %1352 = arith.mulf %1317, %1218 : f32
    %1353 = arith.addf %1351, %1352 : f32
    %1354 = arith.mulf %1224, %1315 : f32
    %1355 = arith.subf %1353, %1354 : f32
    %1356 = arith.mulf %1128, %83 : f32
    %cst_376 = arith.constant 0.000000e+00 : f32
    %1357 = arith.addf %cst_376, %1356 : f32
    %1358 = arith.mulf %1146, %89 : f32
    %1359 = arith.addf %1357, %1358 : f32
    %1360 = arith.mulf %1164, %95 : f32
    %1361 = arith.addf %1359, %1360 : f32
    %1362 = arith.mulf %1134, %83 : f32
    %cst_377 = arith.constant 0.000000e+00 : f32
    %1363 = arith.addf %cst_377, %1362 : f32
    %1364 = arith.mulf %1152, %89 : f32
    %1365 = arith.addf %1363, %1364 : f32
    %1366 = arith.mulf %1170, %95 : f32
    %1367 = arith.addf %1365, %1366 : f32
    %1368 = arith.mulf %1140, %83 : f32
    %cst_378 = arith.constant 0.000000e+00 : f32
    %1369 = arith.addf %cst_378, %1368 : f32
    %1370 = arith.mulf %1158, %89 : f32
    %1371 = arith.addf %1369, %1370 : f32
    %1372 = arith.mulf %1176, %95 : f32
    %1373 = arith.addf %1371, %1372 : f32
    %1374 = arith.mulf %1128, %144 : f32
    %cst_379 = arith.constant 0.000000e+00 : f32
    %1375 = arith.addf %cst_379, %1374 : f32
    %1376 = arith.mulf %1146, %156 : f32
    %1377 = arith.addf %1375, %1376 : f32
    %1378 = arith.mulf %1164, %168 : f32
    %1379 = arith.addf %1377, %1378 : f32
    %1380 = arith.mulf %1134, %144 : f32
    %cst_380 = arith.constant 0.000000e+00 : f32
    %1381 = arith.addf %cst_380, %1380 : f32
    %1382 = arith.mulf %1152, %156 : f32
    %1383 = arith.addf %1381, %1382 : f32
    %1384 = arith.mulf %1170, %168 : f32
    %1385 = arith.addf %1383, %1384 : f32
    %1386 = arith.mulf %1140, %144 : f32
    %cst_381 = arith.constant 0.000000e+00 : f32
    %1387 = arith.addf %cst_381, %1386 : f32
    %1388 = arith.mulf %1158, %156 : f32
    %1389 = arith.addf %1387, %1388 : f32
    %1390 = arith.mulf %1176, %168 : f32
    %1391 = arith.addf %1389, %1390 : f32
    %cst_382 = arith.constant 5.000000e-04 : f32
    %1392 = arith.mulf %cst_382, %1379 : f32
    %1393 = arith.addf %1361, %1392 : f32
    %cst_383 = arith.constant 5.000000e-04 : f32
    %1394 = arith.mulf %cst_383, %1331 : f32
    %1395 = arith.addf %1393, %1394 : f32
    %cst_384 = arith.constant 5.000000e-04 : f32
    %1396 = arith.mulf %cst_384, %1385 : f32
    %1397 = arith.addf %1367, %1396 : f32
    %cst_385 = arith.constant 5.000000e-04 : f32
    %1398 = arith.mulf %cst_385, %1343 : f32
    %1399 = arith.addf %1397, %1398 : f32
    %cst_386 = arith.constant 5.000000e-04 : f32
    %1400 = arith.mulf %cst_386, %1391 : f32
    %1401 = arith.addf %1373, %1400 : f32
    %cst_387 = arith.constant 5.000000e-04 : f32
    %1402 = arith.mulf %cst_387, %1355 : f32
    %1403 = arith.addf %1401, %1402 : f32
    %1404 = arith.mulf %45, %1395 : f32
    %cst_388 = arith.constant 0.000000e+00 : f32
    %1405 = arith.addf %cst_388, %1404 : f32
    %1406 = arith.mulf %49, %1399 : f32
    %1407 = arith.addf %1405, %1406 : f32
    %1408 = arith.mulf %53, %1403 : f32
    %1409 = arith.addf %1407, %1408 : f32
    %1410 = arith.mulf %57, %1395 : f32
    %cst_389 = arith.constant 0.000000e+00 : f32
    %1411 = arith.addf %cst_389, %1410 : f32
    %1412 = arith.mulf %61, %1399 : f32
    %1413 = arith.addf %1411, %1412 : f32
    %1414 = arith.mulf %65, %1403 : f32
    %1415 = arith.addf %1413, %1414 : f32
    %1416 = arith.mulf %69, %1395 : f32
    %cst_390 = arith.constant 0.000000e+00 : f32
    %1417 = arith.addf %cst_390, %1416 : f32
    %1418 = arith.mulf %73, %1399 : f32
    %1419 = arith.addf %1417, %1418 : f32
    %1420 = arith.mulf %77, %1403 : f32
    %1421 = arith.addf %1419, %1420 : f32
    %c0_391 = arith.constant 0 : index
    %1422 = memref.load %arg6[%c0_391] : memref<3xf32, #tpu.memory_space<smem>>
    memref.store %1409, %arg6[%c0_391] : memref<3xf32, #tpu.memory_space<smem>>
    %c0_392 = arith.constant 0 : index
    %c0_393 = arith.constant 0 : index
    %1423 = memref.load %arg5[%c0_392, %c0_393] : memref<3x3xf32, #tpu.memory_space<smem>>
    memref.store %1182, %arg5[%c0_392, %c0_393] : memref<3x3xf32, #tpu.memory_space<smem>>
    %c0_394 = arith.constant 0 : index
    %c1_395 = arith.constant 1 : index
    %1424 = memref.load %arg5[%c0_394, %c1_395] : memref<3x3xf32, #tpu.memory_space<smem>>
    memref.store %1188, %arg5[%c0_394, %c1_395] : memref<3x3xf32, #tpu.memory_space<smem>>
    %c0_396 = arith.constant 0 : index
    %c2_397 = arith.constant 2 : index
    %1425 = memref.load %arg5[%c0_396, %c2_397] : memref<3x3xf32, #tpu.memory_space<smem>>
    memref.store %1194, %arg5[%c0_396, %c2_397] : memref<3x3xf32, #tpu.memory_space<smem>>
    %c1_398 = arith.constant 1 : index
    %1426 = memref.load %arg6[%c1_398] : memref<3xf32, #tpu.memory_space<smem>>
    memref.store %1415, %arg6[%c1_398] : memref<3xf32, #tpu.memory_space<smem>>
    %c1_399 = arith.constant 1 : index
    %c0_400 = arith.constant 0 : index
    %1427 = memref.load %arg5[%c1_399, %c0_400] : memref<3x3xf32, #tpu.memory_space<smem>>
    memref.store %1200, %arg5[%c1_399, %c0_400] : memref<3x3xf32, #tpu.memory_space<smem>>
    %c1_401 = arith.constant 1 : index
    %c1_402 = arith.constant 1 : index
    %1428 = memref.load %arg5[%c1_401, %c1_402] : memref<3x3xf32, #tpu.memory_space<smem>>
    memref.store %1206, %arg5[%c1_401, %c1_402] : memref<3x3xf32, #tpu.memory_space<smem>>
    %c1_403 = arith.constant 1 : index
    %c2_404 = arith.constant 2 : index
    %1429 = memref.load %arg5[%c1_403, %c2_404] : memref<3x3xf32, #tpu.memory_space<smem>>
    memref.store %1212, %arg5[%c1_403, %c2_404] : memref<3x3xf32, #tpu.memory_space<smem>>
    %c2_405 = arith.constant 2 : index
    %1430 = memref.load %arg6[%c2_405] : memref<3xf32, #tpu.memory_space<smem>>
    memref.store %1421, %arg6[%c2_405] : memref<3xf32, #tpu.memory_space<smem>>
    %c2_406 = arith.constant 2 : index
    %c0_407 = arith.constant 0 : index
    %1431 = memref.load %arg5[%c2_406, %c0_407] : memref<3x3xf32, #tpu.memory_space<smem>>
    memref.store %1218, %arg5[%c2_406, %c0_407] : memref<3x3xf32, #tpu.memory_space<smem>>
    %c2_408 = arith.constant 2 : index
    %c1_409 = arith.constant 1 : index
    %1432 = memref.load %arg5[%c2_408, %c1_409] : memref<3x3xf32, #tpu.memory_space<smem>>
    memref.store %1224, %arg5[%c2_408, %c1_409] : memref<3x3xf32, #tpu.memory_space<smem>>
    %c2_410 = arith.constant 2 : index
    %c2_411 = arith.constant 2 : index
    %1433 = memref.load %arg5[%c2_410, %c2_411] : memref<3x3xf32, #tpu.memory_space<smem>>
    memref.store %1230, %arg5[%c2_410, %c2_411] : memref<3x3xf32, #tpu.memory_space<smem>>
    return
  }
}

</mosaic_0001>

<bundles_post_ra>
// kernel: rbnn_forward.1
= control target key start
LH: loop header
LB: loop body
LE: loop exit
PB: predicated region body
PF: predicated region fallthrough
CT: control target
= control target key end

     0   :  { %s3706_s0 = inlined_call_operand.vmem [shape: f32[3,3], index: 0, kind: input, shape index: {}]   ;;  %s3707_s1 = inlined_call_operand.hbm [shape: f32[3,3], index: 1, kind: input, shape index: {}]   ;;  %s3708_s2 = inlined_call_operand.vmem [shape: f32[3], index: 2, kind: input, shape index: {}]   ;;  %s3709_s3 = inlined_call_operand.vmem [shape: f32[1,9], index: 3, kind: input, shape index: {}]   ;;  %s3710_s4 = inlined_call_operand.hbm [shape: f32[136,128], index: 4, kind: input, shape index: {}]   ;;  %s3711_s5 = inlined_call_operand.hbm [shape: f32[3,3], index: 5, kind: output, shape index: {0}]   ;;  %s3712_s6 = inlined_call_operand.hbm [shape: f32[3], index: 6, kind: output, shape index: {1}]  }
   0x1   :  { %3899 = sst [smem:[#allocation75_spill]] %s3711_s5 }
   0x2   :  { %3900 = sst [smem:[#allocation76_spill]] %s3712_s6 }
   0x3   :  { %12 = vsyncpa [#allocation7], 0 }
   0x4   :  { %13 = vsyncpa [#allocation5], 0 }
   0x5   :  { %14 = vsyncpa [#allocation10], 0 }
   0x6   :  { %15 = vsyncpa [#allocation4], 0 }
   0x7   :  { %16 = vsyncpa [#allocation6], 0 }
   0x8   :  { %17 = vsyncpa [#allocation14], 0  ;;  %s23_s23 = sshll.u32 %s3706_s0, 4  ;;  %s32_s26 = sshll.u32 %s3707_s1, 4  ;;  %s24_s23 = int_to_ptr.vmem [resolvable:$true] %s23_s23  ;;  %s33_s26 = int_to_ptr.hbm [resolvable:$true] %s32_s26 }
   0x9   :  { %s1924_s27 = smov [#allocation3]   ;;  %s1925_s28 = smov [#allocation8]  }
   0xa   :  { %26 = dma.vmem_to_smem %s24_s23, 64, %s1924_s27, [#allocation7]  }
   0xb   :  { %35 = dma.hbm_to_smem %s33_s26, 64, %s1925_s28, [#allocation5]  }
   0xc   :  { %s41_s7 = sshll.u32 %s3708_s2, 4  ;;  %s51_s10 = sshll.u32 %s3710_s4, 4  ;;  %s42_s7 = int_to_ptr.vmem [resolvable:$true] %s41_s7  ;;  %s52_s10 = int_to_ptr.hbm [resolvable:$true] %s51_s10 }
   0xd   :  { %s1926_s0 = smov [#allocation9]   ;;  %s1927_s11 = smov [#allocation11]  }
   0xe   :  { %44 = dma.vmem_to_smem %s42_s7, 16, %s1926_s0, [#allocation10]  }
   0xf   :  { %s53_s12 = sshll.u32 %s1927_s11, 4  ;;  %s1928_s1 = smov 128   ;;  %s54_s12 = int_to_ptr.vmem [resolvable:$true] %s53_s12 }
  0x10   :  { %s1929_s13 = smov 8  }
  0x11   :  { %59 = dma.hbm_to_vmem [thread:$0]  %s52_s10, 2176, %s54_s12, [#allocation4], %s1928_s1, %s1928_s1, %s1929_s13  }
  0x12   :  { %1912 = dma.done.wait [#allocation7], 64  }
  0x13   :  { %1913 = vsyncadd [#allocation7], 4294967232 }
  0x14   :  { %1914 = dma.done.wait [#allocation5], 64  }
  0x15   :  { %1915 = vsyncadd [#allocation5], 4294967232 }
  0x16   :  { %1916 = dma.done.wait [#allocation10], 16  }
  0x17   :  { %1917 = vsyncadd [#allocation10], 4294967280 }
  0x18   :  { %1918 = dma.done.wait [#allocation4], 2176  }
  0x19   :  { %1919 = vsyncadd [#allocation4], 4294965120 }
  0x1a   :  { %76 = sfence }
  0x1b   :  { %v85_v0 = vld [vmem:[#allocation11 + $0x30] sm:$0x3]  ;;  %vm194_vm0 = vcmask 72704   ;;  %vm243_vm1 = vcmask 408576   ;;  %v84_v1 = vld [vmem:[#allocation11 + $0x28] sm:$0xff]  ;;  %v91_v3 = vld [vmem:[#allocation11 + $0x60] sm:$0xff] }
  0x1c   :  { %1700 = vmatpush.xpose.msk.msra.mxu0 %vm194_vm0, %v85_v0  ;;  %v92_v2 = vld [vmem:[#allocation11 + $0x68] sm:$0x3]  ;;  %v83_v4 = vld [vmem:[#allocation11 + $0x20] sm:$0xff]  ;;  %v90_v5 = vld [vmem:[#allocation11 + $0x58] sm:$0xff]  ;;  %vm295_vm2 = vcmask 1041408   ;;  %v1930_v18 = vmov 0.0  }
  0x1d   :  { %1709 = vmatpush.xpose.msk.msra.mxu1 %vm243_vm1, %v92_v2  ;;  %v82_v6 = vld [vmem:[#allocation11 + $0x18] sm:$0xff]  ;;  %v89_v7 = vld [vmem:[#allocation11 + $0x50] sm:$0xff]  ;;  %v88_v9 = vld [vmem:[#allocation11 + $0x48] sm:$0xff]  ;;  %1718 = vmatpush.msk.msra.mxu2 %vm295_vm2, %v92_v2  ;;  %s2027_s14 = sld [smem:[#allocation8 + $0x82]]  ;;  %vm344_vm9 = vcmask 65536   ;;  %s3716_s11 = smov 123  }
  0x1e   :  { %v81_v8 = vld [vmem:[#allocation11 + $0x10] sm:$0xff]  ;;  %v80_v10 = vld [vmem:[#allocation11 + $0x8] sm:$0xff]  ;;  %v79_v11 = vld [vmem:[#allocation11] sm:$0xff]  ;;  %1720 = vmatpush.msk.msra.mxu3 %vm295_vm2, %v85_v0  ;;  %s2029_s15 = sld [smem:[#allocation8 + $0x100]]  ;;  %s3720_s12 = smov 125  }
  0x1f   :  { %v193_v12 = vld [vmem:[%s3709_s3] sm:$0x1]  ;;  %v87_v13 = vld [vmem:[#allocation11 + $0x40] sm:$0xff]  ;;  %308 = vmatpush.msra.mxu2 %v91_v3  ;;  %v94_v15 = vld [vmem:[#allocation11 + $0x78] sm:$0x1]  ;;  %s2025_s3 = sld [smem:[#allocation8 + $0x81]] }
  0x20   :  { %1701 = vmatpush.xpose.msk.msra.mxu0 %vm194_vm0, %v84_v1  ;;  %v86_v14 = vld [vmem:[#allocation11 + $0x38] sm:$0xff]  ;;  %334 = vmatpush.msra.mxu3 %v84_v1  ;;  %v95_v21 = vld [vmem:[#allocation11 + $0x80] sm:$0x1]  ;;  %v93_v24 = vld [vmem:[#allocation11 + $0x70] sm:$0x1]  ;;  %s2031_s16 = sld [smem:[#allocation8 + $0x101]] }
  0x21   :  { %1710 = vmatpush.xpose.msk.msra.mxu1 %vm243_vm1, %v91_v3  ;;  %309 = vmatpush.msra.mxu2 %v90_v5  ;;  %s2033_s17 = sld [smem:[#allocation8 + $0x102]]  ;;  %s3718_s1 = smov 127  }
  0x22   :  { %335 = vmatpush.msra.mxu3 %v83_v4  ;;  %s2035_s18 = sld [smem:[#allocation8 + $0x80]]  ;;  %s3717_s13 = smov 122  }
  0x23   :  { %310 = vmatpush.msra.mxu2 %v89_v7  ;;  %3902 = sst [smem:[#allocation22_spill]] %s2027_s14  ;;  %s3715_s2 = smov 124  }
  0x24   :  { %1702 = vmatpush.xpose.msk.msra.mxu0 %vm194_vm0, %v83_v4  ;;  %336 = vmatpush.msra.mxu3 %v82_v6  ;;  %3903 = sst [smem:[#allocation23_spill]] %s2029_s15  ;;  %s2039_s19 = smul.f32 %s2029_s15, %s2027_s14 }
  0x25   :  { %1711 = vmatpush.xpose.msk.msra.mxu1 %vm243_vm1, %v90_v5  ;;  %311 = vmatpush.msra.mxu2 %v88_v9  ;;  %3901 = sst [smem:[#allocation21_spill]] %s2025_s3  ;;  %s127_s27 = smul.f32 %s2029_s15, %s2025_s3 }
  0x26   :  { %337 = vmatpush.msra.mxu3 %v81_v8  ;;  %3904 = sst [smem:[#allocation24_spill]] %s2031_s16  ;;  %s118_s20 = smul.f32 %s2031_s16, %s2027_s14 }
  0x27   :  { %312 = vmatpush.msra.mxu2 %v87_v13  ;;  %3905 = sst [smem:[#allocation25_spill]] %s2033_s17  ;;  %s117_s22 = smul.f32 %s2033_s17, %s2025_s3 }
  0x28   :  { %1703 = vmatpush.xpose.msk.msra.mxu0 %vm194_vm0, %v82_v6  ;;  %338 = vmatpush.msra.mxu3 %v80_v10  ;;  %3906 = sst [smem:[#allocation26_spill]] %s2035_s18  ;;  %s2051_s24 = smul.f32 %s2033_s17, %s2035_s18 }
  0x29   :  { %1712 = vmatpush.xpose.msk.msra.mxu1 %vm243_vm1, %v89_v7  ;;  %313 = vmatpush.msra.mxu2 %v86_v14  ;;  %3907 = sst [smem:[#allocation27_spill]] %s2039_s19  ;;  %s126_s29 = smul.f32 %s2031_s16, %s2035_s18 }
  0x2a   :  { %339 = vmatpush.msra.mxu3 %v79_v11  ;;  %s2043_s21 = sld [smem:[#allocation8]]  ;;  %s3719_s4 = smov 126  }
  0x2b   :  { %1722 = vmatpush.xpose.msk.msrb.mxu2 %vm194_vm0, %v85_v0  ;;  %s2047_s23 = sld [smem:[#allocation8 + $0x1]] }
  0x2c   :  { %1704 = vmatpush.xpose.msk.msra.mxu0 %vm194_vm0, %v81_v8  ;;  %1731 = vmatpush.xpose.msk.msrb.mxu3 %vm243_vm1, %v92_v2  ;;  %3910 = sst [smem:[#allocation30_spill]] %s2051_s24 }
  0x2d   :  { %1713 = vmatpush.xpose.msk.msra.mxu1 %vm243_vm1, %v88_v9  ;;  %s2053_s25 = sld [smem:[#allocation8 + $0x2]] }
  0x2e   :  { %s2055_s26 = ssub.f32 %s117_s22, %s118_s20  ;;  %s3714_s20 = smov 120  }
  0x2f   :  { %1723 = vmatpush.xpose.msk.msrb.mxu2 %vm194_vm0, %v84_v1  ;;  %s123_s28 = ssub.f32 %s2051_s24, %s2039_s19  ;;  %s3713_s22 = smov 121  }
  0x30   :  { %1705 = vmatpush.xpose.msk.msra.mxu0 %vm194_vm0, %v80_v10  ;;  %1732 = vmatpush.xpose.msk.msrb.mxu3 %vm243_vm1, %v91_v3  ;;  %3908 = sst [smem:[#allocation28_spill]] %s2043_s21  ;;  %s120_s30 = smul.f32 %s2055_s26, %s2043_s21 }
  0x31   :  { %1714 = vmatpush.xpose.msk.msra.mxu1 %vm243_vm1, %v87_v13  ;;  %3909 = sst [smem:[#allocation29_spill]] %s2047_s23  ;;  %s124_s7 = smul.f32 %s2047_s23, %s123_s28 }
  0x32   :  { %3912 = sst [smem:[#allocation32_spill]] %s2055_s26 }
  0x33   :  { %1724 = vmatpush.xpose.msk.msrb.mxu2 %vm194_vm0, %v83_v4  ;;  %3911 = sst [smem:[#allocation31_spill]] %s2053_s25 }
  0x34   :  { %1706 = vmatpush.xpose.msk.msra.mxu0 %vm194_vm0, %v79_v11  ;;  %1733 = vmatpush.xpose.msk.msrb.mxu3 %vm243_vm1, %v90_v5  ;;  %s2066_s8 = ssub.f32 %s126_s29, %s127_s27 }
  0x35   :  { %1715 = vmatpush.xpose.msk.msra.mxu1 %vm243_vm1, %v86_v14  ;;  %s125_s9 = ssub.f32 %s120_s30, %s124_s7 }
  0x36   :  { %3913 = sst [smem:[#allocation33_spill]] %s2066_s8  ;;  %s129_s10 = smul.f32 %s2053_s25, %s2066_s8 }
  0x37   :  { %1707 = vmatmul.msk.f32.vlgmr.msra.gmra.mxu0 %vm194_vm0, %v193_v12  ;;  %1725 = vmatpush.xpose.msk.msrb.mxu2 %vm194_vm0, %v82_v6  ;;  %s114_s27 = sld [smem:[#allocation9]] }
  0x38   :  { %1740 = vmatpush.msk.msrb.mxu0 %vm295_vm2, %v92_v2  ;;  %1734 = vmatpush.xpose.msk.msrb.mxu3 %vm243_vm1, %v89_v7  ;;  %s130_s0 = sadd.f32 %s129_s10, %s125_s9 }
  0x39   :  { %1742 = vmatpush.msk.msrb.mxu1 %vm295_vm2, %v85_v0  ;;  %s1698_s28 = sld [smem:[#allocation9 + $0x1]] }
  0x3a   :  { %1453 = vmatpush.msrb.mxu0 %v91_v3  ;;  %v131_v29 = vstv %s130_s0  ;;  %s2079_s29 = sld [smem:[#allocation9 + $0x2]] }
  0x3b   :  { %1477 = vmatpush.msrb.mxu1 %v84_v1  ;;  %1726 = vmatpush.xpose.msk.msrb.mxu2 %vm194_vm0, %v81_v8  ;;  %1811 = vrcp.f32 %v131_v29  ;;  %vm137_vm5 = vweird.f32 %v131_v29  ;;  %v141_v33 = vand.u32 2147483647, %v131_v29  ;;  %v143_v34 = vand.u32 2147483648, %v131_v29  ;;  %s2081_s30 = sld [smem:[#allocation3 + $0x1]] }
  0x3c   :  { %1454 = vmatpush.msrb.mxu0 %v90_v5  ;;  %1735 = vmatpush.xpose.msk.msrb.mxu3 %vm243_vm1, %v88_v9  ;;  %s2084_s9 = sld [smem:[#allocation3 + $0x2]] }
  0x3d   :  { %1478 = vmatpush.msrb.mxu1 %v83_v4  ;;  %v144_v36 = vor.u32 1.1754944e-38, %v143_v34  ;;  %vm142_vm8 = vcmp.eq.f32.partialorder %v141_v33, 8.507059e+37  ;;  %s187_s7 = smul.f32 %s2029_s15, %s114_s27  ;;  %s2087_s0 = sld [smem:[#allocation3]] }
  0x3e   :  { %1455 = vmatpush.msrb.mxu0 %v89_v7  ;;  %s2100_s6 = sld [smem:[#allocation3 + $0x80]] }
  0x3f   :  { %1479 = vmatpush.msrb.mxu1 %v82_v6  ;;  %1727 = vmatpush.xpose.msk.msrb.mxu2 %vm194_vm0, %v80_v10  ;;  %s189_s10 = smul.f32 %s1698_s28, %s2031_s16  ;;  %s2103_s24 = sld [smem:[#allocation3 + $0x101]] }
  0x40   :  { %1456 = vmatpush.msrb.mxu0 %v88_v9  ;;  %1736 = vmatpush.xpose.msk.msrb.mxu3 %vm243_vm1, %v87_v13  ;;  %s183_s8 = smul.f32 %s1698_s28, %s2025_s3  ;;  %s2112_s15 = sld [smem:[#allocation3 + $0x102]] }
  0x41   :  { %1480 = vmatpush.msrb.mxu1 %v81_v8  ;;  %v1812_v30 = vpop.eup %1811  ;;  %3914 = sst [smem:[#allocation34_spill]] %s2081_s30 }
  0x42   :  { %1457 = vmatpush.msrb.mxu0 %v87_v13  ;;  %v133_v31 = vmul.f32 %v1812_v30, %v131_v29  ;;  %vm138_vm6 = vweird.f32 %v1812_v30  ;;  %3915 = sst [smem:[#allocation35_spill]] %s2084_s9 }
  0x43   :  { %1481 = vmatpush.msrb.mxu1 %v80_v10  ;;  %1728 = vmatpush.xpose.msk.msrb.mxu2 %vm194_vm0, %v79_v11  ;;  %vm139_vm7 = vmor %vm137_vm5, %vm138_vm6  ;;  %3916 = sst [smem:[#allocation36_spill]] %s2087_s0 }
  0x44   :  { %1458 = vmatpush.msrb.mxu0 %v86_v14  ;;  %1737 = vmatpush.xpose.msk.msrb.mxu3 %vm243_vm1, %v86_v14  ;;  %v134_v32 = vsub.f32 1.0, %v133_v31  ;;  %3920 = sst [smem:[#allocation40_spill]] %s2100_s6 }
  0x45   :  { %1482 = vmatpush.msrb.mxu1 %v79_v11  ;;  %3921 = sst [smem:[#allocation41_spill]] %s2103_s24 }
  0x46   :  { %v135_v35 = vmul.f32 %v1812_v30, %v134_v32  ;;  %3923 = sst [smem:[#allocation43_spill]] %s2112_s15 }
  0x48   :  { %v136_v37 = vadd.f32 %v1812_v30, %v135_v35 }
  0x4a   :  { %v140_v38 = vsel %vm139_vm7, %v1812_v30, %v136_v37 }
  0x4b   :  { %v145_v39 = vsel %vm142_vm8, %v144_v36, %v140_v38 }
  0x4c   :  { %1744 = vpush %v145_v39 }
  0xb4   :  { %v236_v16 = vpop.f32.mrf.mxu0 }
  0xb5   :  { %v237_v17 = vadd.f32 %v236_v16, %v94_v15 }
  0xb7   :  { %vm239_vm3 = vcmp.gt.f32.partialorder %v237_v17, 0.0 }
  0xb8   :  { %v1708_v19 = vsel %vm239_vm3, 1.0, %v1930_v18 }
  0xb9   :  { %v242_v20 = vmul.f32 %v1708_v19, %v237_v17 }
  0xbb   :  { %1716 = vmatmul.msk.f32.vlgmr.msra.gmra.mxu1 %vm243_vm1, %v242_v20 }
 0x138   :  { %v285_v22 = vpop.f32.mrf.mxu1 }
 0x139   :  { %v286_v23 = vadd.f32 %v285_v22, %v95_v21 }
 0x13b   :  { %vm288_vm4 = vcmp.gt.f32.partialorder %v286_v23, 0.0 }
 0x13c   :  { %v1717_v25 = vsel %vm288_vm4, 1.0, %v1930_v18 }
 0x13d   :  { %v291_v26 = vmul.f32 %v1717_v25, %v93_v24 }
 0x13f   :  { %1719 = vmatmul.msk.f32.vlgmr.msra.gmra.mxu2 %vm243_vm1, %v291_v26 }
 0x1c2   :  { %v315_v27 = vpop.f32.mrf.mxu2 }
 0x1c3   :  { %v318_v28 = vmul.f32 %v1708_v19, %v315_v27 }
 0x1c5   :  { %1721 = vmatmul.msk.f32.vlgmr.msra.gmra.mxu3 %vm243_vm1, %v318_v28 }
 0x248   :  { %v341_v40 = vpop.f32.mrf.mxu3 }
 0x249   :  { %345 = vst.msk [vmem:[#allocation2] sm:$0x1] %vm344_vm9, %v341_v40 }
 0x250   :  { %v346_v41 = vld [vmem:[#allocation2] sm:$0x1] }
 0x251   :  { %365 = vrot.lane.b32.xlu2 %v346_v41, %s3716_s11  ;;  %357 = vrot.lane.b32.xlu1 %v346_v41, %s3720_s12  ;;  %1746 = vpush %v346_v41  ;;  %s175_s11 = smul.f32 %s114_s27, %s2043_s21 }
 0x252   :  { %349 = vrot.lane.b32.xlu0 %v346_v41, %s3718_s1  ;;  %s177_s1 = smul.f32 %s1698_s28, %s2047_s23  ;;  %s2115_s28 = sld [smem:[#allocation3 + $0x100]] }
 0x253   :  { %s181_s12 = smul.f32 %s2035_s18, %s114_s27 }
 0x254   :  { %s178_s5 = sadd.f32 %s177_s1, %s175_s11 }
 0x258   :  { %3924 = sst [smem:[#allocation44_spill]] %s2115_s28 }
 0x259   :  { %369 = vrot.lane.b32.xlu2 %v346_v41, %s3717_s13  ;;  %361 = vrot.lane.b32.xlu1 %v346_v41, %s3715_s2  ;;  %s2093_s2 = sld [smem:[#allocation3 + $0x81]] }
 0x25a   :  { %353 = vrot.lane.b32.xlu0 %v346_v41, %s3719_s4  ;;  %s190_s13 = sadd.f32 %s189_s10, %s187_s7  ;;  %s185_s7 = smul.f32 %s2079_s29, %s2027_s14 }
 0x25b   :  { %s2097_s4 = sld [smem:[#allocation3 + $0x82]] }
 0x25f   :  { %3918 = sst [smem:[#allocation38_spill]] %s2093_s2 }
 0x261   :  { %377 = vrot.lane.b32.xlu1 %v346_v41, %s3714_s20  ;;  %s191_s20 = smul.f32 %s2079_s29, %s2033_s17  ;;  %3919 = sst [smem:[#allocation39_spill]] %s2097_s4 }
 0x262   :  { %373 = vrot.lane.b32.xlu0 %v346_v41, %s3713_s22  ;;  %s2089_s22 = spop %1744  ;;  %s184_s17 = sadd.f32 %s183_s8, %s181_s12 }
 0x263   :  { %3917 = sst [smem:[#allocation37_spill]] %s2089_s22  ;;  %s179_s22 = smul.f32 %s2079_s29, %s2053_s25 }
 0x264   :  { %s2105_s26 = sadd.f32 %s191_s20, %s190_s13 }
 0x265   :  { %s2118_s23 = sadd.f32 %s179_s22, %s178_s5 }
 0x266   :  { %3922 = sst [smem:[#allocation42_spill]] %s2105_s26 }
 0x267   :  { %3925 = sst [smem:[#allocation45_spill]] %s2118_s23 }
 0x268   :  { %s2121_s20 = sadd.f32 %s185_s7, %s184_s17 }
 0x26a   :  { %3926 = sst [smem:[#allocation46_spill]] %s2121_s20 }
 0x282   :  { %s1747_s19 = spop %1746 }
 0x283   :  { %s393_s16 = smul.f32 %s1747_s19, %s2084_s9 }
 0x284   :  { %s407_s27 = smul.f32 %s1747_s19, %s2081_s30 }
 0x2ab   :  { %v366_v44 = vpop.permute.xlu2 %365 }
 0x2b3   :  { %v370_v47 = vpop.permute.xlu2 %369 }
 0x2c3   :  { %v358_v42 = vpop.permute.xlu1 %357 }
 0x2c4   :  { %v350_v43 = vpop.permute.xlu0 %349 }
 0x2c5   :  { %1748 = vpush %v350_v43 }
 0x2cb   :  { %v362_v45 = vpop.permute.xlu1 %361 }
 0x2cc   :  { %v354_v46 = vpop.permute.xlu0 %353 }
 0x2cd   :  { %1750 = vpush %v354_v46 }
 0x2ce   :  { %1752 = vpush %v358_v42 }
 0x2cf   :  { %1754 = vpush %v362_v45 }
 0x2d0   :  { %1756 = vpush %v366_v44 }
 0x2d1   :  { %1758 = vpush %v370_v47 }
 0x2d3   :  { %v378_v48 = vpop.permute.xlu1 %377 }
 0x2d4   :  { %v374_v49 = vpop.permute.xlu0 %373 }
 0x2d5   :  { %1760 = vpush %v374_v49 }
 0x2d6   :  { %1762 = vpush %v378_v48 }
 0x2f6   :  { %s1749_s10 = spop %1748 }
 0x2f7   :  { %s405_s18 = smul.f32 %s1749_s10, %s2087_s0 }
 0x2f8   :  { %s383_s11 = smul.f32 %s1749_s10, %s2084_s9 }
 0x2f9   :  { %s408_s29 = ssub.f32 %s405_s18, %s407_s27 }
 0x2fe   :  { %s1751_s1 = spop %1750 }
 0x2ff   :  { %s381_s8 = smul.f32 %s1751_s1, %s2081_s30  ;;  %s1753_s12 = spop %1752 }
 0x300   :  { %s395_s14 = smul.f32 %s1751_s1, %s2087_s0  ;;  %s1755_s25 = spop %1754 }
 0x301   :  { %s384_s19 = ssub.f32 %s381_s8, %s383_s11  ;;  %s397_s21 = smul.f32 %s1753_s12, %s2097_s4 }
 0x302   :  { %s396_s3 = ssub.f32 %s393_s16, %s395_s14  ;;  %s411_s5 = smul.f32 %s1753_s12, %s2093_s2 }
 0x303   :  { %s1757_s22 = spop %1756  ;;  %s409_s17 = smul.f32 %s1755_s25, %s2100_s6 }
 0x304   :  { %s398_s13 = sadd.f32 %s397_s21, %s396_s3  ;;  %s385_s7 = smul.f32 %s1757_s22, %s2093_s2 }
 0x305   :  { %s1759_s10 = spop %1758  ;;  %s410_s9 = sadd.f32 %s409_s17, %s408_s29 }
 0x306   :  { %s399_s30 = smul.f32 %s1757_s22, %s2100_s6  ;;  %s386_s27 = sadd.f32 %s385_s7, %s384_s19 }
 0x307   :  { %s387_s18 = smul.f32 %s1755_s25, %s2097_s4  ;;  %s1761_s14 = spop %1760 }
 0x308   :  { %s400_s11 = ssub.f32 %s398_s13, %s399_s30  ;;  %s401_s1 = smul.f32 %s1759_s10, %s2112_s15 }
 0x309   :  { %s412_s16 = ssub.f32 %s410_s9, %s411_s5  ;;  %s415_s12 = smul.f32 %s1759_s10, %s2103_s24 }
 0x30a   :  { %s402_s8 = sadd.f32 %s401_s1, %s400_s11  ;;  %s413_s0 = smul.f32 %s1761_s14, %s2115_s28 }
 0x30b   :  { %s1763_s3 = spop %1762  ;;  %s388_s21 = ssub.f32 %s386_s27, %s387_s18 }
 0x30c   :  { %s389_s2 = smul.f32 %s1763_s3, %s2103_s24  ;;  %s414_s17 = sadd.f32 %s413_s0, %s412_s16 }
 0x30d   :  { %s403_s29 = smul.f32 %s1763_s3, %s2115_s28  ;;  %s3930_s7 = sld [smem:[#allocation28_spill]] }
 0x30e   :  { %s391_s6 = smul.f32 %s1761_s14, %s2112_s15  ;;  %s390_s22 = sadd.f32 %s389_s2, %s388_s21 }
 0x30f   :  { %s2138_s4 = ssub.f32 %s414_s17, %s415_s12  ;;  %s417_s25 = smul.f32 0.001, %s2118_s23 }
 0x310   :  { %s2141_s30 = ssub.f32 %s390_s22, %s391_s6  ;;  %s421_s13 = smul.f32 0.001, %s2121_s20 }
 0x311   :  { %3927 = sst [smem:[#allocation47_spill]] %s2138_s4  ;;  %s426_s9 = smul.f32 1e-06, %s2138_s4 }
 0x312   :  { %3928 = sst [smem:[#allocation48_spill]] %s2141_s30  ;;  %s418_s5 = smul.f32 1e-06, %s2141_s30 }
 0x313   :  { %s2145_s19 = ssub.f32 %s402_s8, %s403_s29  ;;  %s427_s10 = smul.f32 0.5, %s426_s9 }
 0x314   :  { %s3931_s18 = sld [smem:[#allocation21_spill]]  ;;  %s419_s0 = smul.f32 0.5, %s418_s5 }
 0x315   :  { %3929 = sst [smem:[#allocation49_spill]] %s2145_s19  ;;  %s3932_s27 = smul.f32 0.001, %s2105_s26 }
 0x316   :  { %s422_s2 = smul.f32 1e-06, %s2145_s19  ;;  %s2153_s1 = sadd.f32 %s419_s0, %s417_s25 }
 0x317   :  { %s2150_s11 = sadd.f32 %s427_s10, %s3932_s27  ;;  %s2180_s9 = smul.f32 2.0, %s3930_s7 }
 0x318   :  { %3934 = sst [smem:[#allocation51_spill]] %s2153_s1  ;;  %s423_s6 = smul.f32 0.5, %s422_s2 }
 0x319   :  { %3933 = sst [smem:[#allocation50_spill]] %s2150_s11  ;;  %s2156_s14 = smul.f32 0.0, %s2153_s1 }
 0x31a   :  { %s3935_s16 = sld [smem:[#allocation29_spill]]  ;;  %s2164_s3 = smul.f32 0.0, %s2150_s11 }
 0x31b   :  { %s2159_s8 = ssub.f32 0.0, %s2150_s11  ;;  %s2183_s10 = smul.f32 2.0, %s3931_s18 }
 0x31c   :  { %s2161_s12 = sadd.f32 %s423_s6, %s421_s13 }
 0x31d   :  { %3936 = sst [smem:[#allocation52_spill]] %s2159_s8 }
 0x31e   :  { %3937 = sst [smem:[#allocation53_spill]] %s2161_s12  ;;  %s2170_s29 = smul.f32 0.0, %s2161_s12 }
 0x31f   :  { %s3938_s21 = sld [smem:[#allocation31_spill]] }
 0x320   :  { %s2167_s17 = ssub.f32 0.0, %s2153_s1  ;;  %s2198_s30 = smul.f32 2.0, %s3935_s16 }
 0x321   :  { %s2173_s22 = ssub.f32 0.0, %s2161_s12 }
 0x322   :  { %3939 = sst [smem:[#allocation54_spill]] %s2167_s17 }
 0x323   :  { %3940 = sst [smem:[#allocation55_spill]] %s2173_s22 }
 0x324   :  { %s431_s13 = sadd.f32 %s2170_s29, %s2156_s14 }
 0x325   :  { %3941 = sst [smem:[#allocation56_spill]] %s2180_s9  ;;  %s2206_s26 = smul.f32 2.0, %s3938_s21 }
 0x326   :  { %s3942_s5 = sld [smem:[#allocation26_spill]] }
 0x327   :  { %3943 = sst [smem:[#allocation57_spill]] %s2183_s10 }
 0x328   :  { %s2188_s27 = sadd.f32 %s2164_s3, %s431_s13 }
 0x329   :  { %s3944_s6 = sld [smem:[#allocation22_spill]] }
 0x32a   :  { %s2193_s25 = smul.f32 0.0, %s2188_s27  ;;  %s473_s4 = ssub.f32 %s2188_s27, %s2180_s9 }
 0x32b   :  { %s3945_s19 = sld [smem:[#allocation23_spill]] }
 0x32c   :  { %3946 = sst [smem:[#allocation58_spill]] %s2198_s30  ;;  %s2218_s9 = smul.f32 2.0, %s3942_s5 }
 0x32d   :  { %s488_s13 = ssub.f32 %s2188_s27, %s2183_s10 }
 0x32e   :  { %s2203_s0 = sadd.f32 %s473_s4, %s2156_s14 }
 0x32f   :  { %3947 = sst [smem:[#allocation59_spill]] %s2206_s26 }
 0x330   :  { %s475_s2 = sadd.f32 %s2159_s8, %s2193_s25 }
 0x331   :  { %s479_s20 = sadd.f32 %s2193_s25, %s2161_s12 }
 0x332   :  { %s3948_s23 = sld [smem:[#allocation24_spill]] }
 0x333   :  { %s477_s15 = ssub.f32 %s475_s2, %s2198_s30  ;;  %s2233_s2 = smul.f32 2.0, %s3945_s19 }
 0x334   :  { %s481_s24 = ssub.f32 %s479_s20, %s2206_s26  ;;  %s2229_s20 = smul.f32 2.0, %s3944_s6 }
 0x335   :  { %s2215_s28 = sadd.f32 %s477_s15, %s2170_s29 }
 0x336   :  { %3949 = sst [smem:[#allocation60_spill]] %s2218_s9 }
 0x337   :  { %s2221_s4 = sadd.f32 %s481_s24, %s2164_s3 }
 0x338   :  { %s483_s10 = sadd.f32 %s2193_s25, %s2150_s11  ;;  %s2246_s6 = smul.f32 2.0, %s3948_s23 }
 0x339   :  { %s3950_s21 = sld [smem:[#allocation25_spill]] }
 0x33a   :  { %s2226_s8 = sadd.f32 %s488_s13, %s2170_s29 }
 0x33b   :  { %3951 = sst [smem:[#allocation61_spill]] %s2229_s20 }
 0x33c   :  { %s485_s15 = ssub.f32 %s483_s10, %s2218_s9 }
 0x33d   :  { %3952 = sst [smem:[#allocation62_spill]] %s2233_s2 }
 0x33e   :  { %s490_s24 = sadd.f32 %s2167_s17, %s2193_s25 }
 0x33f   :  { %s2240_s30 = sadd.f32 %s485_s15, %s2156_s14  ;;  %s2259_s13 = smul.f32 2.0, %s3950_s21 }
 0x340   :  { %s492_s18 = ssub.f32 %s490_s24, %s2229_s20 }
 0x341   :  { %3953 = sst [smem:[#allocation63_spill]] %s2246_s6 }
 0x342   :  { %s494_s10 = sadd.f32 %s2173_s22, %s2193_s25 }
 0x343   :  { %s2253_s19 = sadd.f32 %s492_s18, %s2164_s3 }
 0x344   :  { %s496_s24 = ssub.f32 %s494_s10, %s2233_s2 }
 0x345   :  { %3954 = sst [smem:[#allocation64_spill]] %s2259_s13 }
 0x346   :  { %s498_s26 = sadd.f32 %s2193_s25, %s2153_s1 }
 0x347   :  { %s2266_s18 = sadd.f32 %s496_s24, %s2156_s14 }
 0x348   :  { %s500_s22 = ssub.f32 %s498_s26, %s2246_s6 }
 0x349   :  { %s503_s15 = ssub.f32 %s2188_s27, %s2259_s13  ;;  %s2275_s17 = smul.f32 %s2266_s18, %s2253_s19 }
 0x34a   :  { %s2278_s10 = sadd.f32 %s500_s22, %s2170_s29  ;;  %s515_s24 = smul.f32 %s2266_s18, %s2226_s8 }
 0x34b   :  { %3955 = sst [smem:[#allocation65_spill]] %s2275_s17 }
 0x34c   :  { %s2283_s20 = sadd.f32 %s503_s15, %s2164_s3  ;;  %s506_s27 = smul.f32 %s2278_s10, %s2253_s19 }
 0x34d   :  { %s3956_s9 = ssub.f32 %s2170_s29, %s2164_s3  ;;  %s514_s26 = smul.f32 %s2278_s10, %s2240_s30 }
 0x34e   :  { %s505_s6 = smul.f32 %s2283_s20, %s2226_s8  ;;  %s3961_s15 = ssub.f32 %s2164_s3, %s2156_s14 }
 0x34f   :  { %s2293_s22 = sadd.f32 %s3956_s9, %s2153_s1  ;;  %s2299_s13 = smul.f32 %s2283_s20, %s2240_s30 }
 0x350   :  { %s2303_s2 = ssub.f32 %s505_s6, %s506_s27  ;;  %s536_s1 = smul.f32 %s2278_s10, %s2221_s4 }
 0x351   :  { %3957 = sst [smem:[#allocation66_spill]] %s2293_s22 }
 0x352   :  { %3958 = sst [smem:[#allocation67_spill]] %s2299_s13  ;;  %s508_s21 = smul.f32 %s2303_s2, %s2203_s0 }
 0x353   :  { %3959 = sst [smem:[#allocation68_spill]] %s2303_s2 }
 0x354   :  { %s511_s9 = ssub.f32 %s2299_s13, %s2275_s17  ;;  %s555_s13 = smul.f32 %s2266_s18, %s2215_s28 }
 0x355   :  { %s2313_s23 = ssub.f32 %s514_s26, %s515_s24  ;;  %s537_s26 = smul.f32 %s2283_s20, %s2215_s28 }
 0x356   :  { %s512_s5 = smul.f32 %s511_s9, %s2215_s28  ;;  %s2324_s22 = sadd.f32 %s3961_s15, %s2161_s12 }
 0x357   :  { %3960 = sst [smem:[#allocation69_spill]] %s2313_s23  ;;  %s517_s27 = smul.f32 %s2313_s23, %s2221_s4 }
 0x358   :  { %3962 = sst [smem:[#allocation70_spill]] %s2324_s22  ;;  %s546_s9 = smul.f32 %s2283_s20, %s2203_s0 }
 0x359   :  { %s513_s24 = ssub.f32 %s508_s21, %s512_s5  ;;  %s556_s17 = smul.f32 %s2278_s10, %s2203_s0 }
 0x35a   :  { %s3963_s3 = ssub.f32 %s2156_s14, %s2170_s29  ;;  %s3965_s21 = smul.f32 %s2226_s8, %s2221_s4 }
 0x35b   :  { %s518_s6 = sadd.f32 %s517_s27, %s513_s24  ;;  %s3966_s5 = smul.f32 %s2253_s19, %s2215_s28 }
 0x35c   :  { %s2340_s23 = sadd.f32 %s3963_s3, %s2150_s11  ;;  %s3967_s22 = smul.f32 %s2266_s18, %s2221_s4 }
 0x35d   :  { %v519_v50 = vstv %s518_s6  ;;  %s2342_s15 = ssub.f32 %s536_s1, %s537_s26  ;;  %s3968_s20 = smul.f32 %s2253_s19, %s2203_s0 }
 0x35e   :  { %3964 = sst [smem:[#allocation71_spill]] %s2340_s23  ;;  %1813 = vrcp.f32 %v519_v50  ;;  %s3969_s27 = smul.f32 %s2240_s30, %s2221_s4  ;;  %v531_v54 = vand.u32 2147483648, %v519_v50  ;;  %v529_v56 = vand.u32 2147483647, %v519_v50  ;;  %vm525_vm11 = vweird.f32 %v519_v50 }
 0x35f   :  { %s2352_s2 = ssub.f32 %s3966_s5, %s3965_s21  ;;  %s3970_s29 = smul.f32 %s2240_s30, %s2215_s28 }
 0x360   :  { %s2357_s16 = ssub.f32 %s546_s9, %s3967_s22  ;;  %s3971_s1 = smul.f32 %s2226_s8, %s2203_s0  ;;  %v532_v58 = vor.u32 1.1754944e-38, %v531_v54  ;;  %vm530_vm13 = vcmp.eq.f32.partialorder %v529_v56, 8.507059e+37 }
 0x361   :  { %s2365_s24 = ssub.f32 %s3969_s27, %s3968_s20  ;;  %s437_s30 = smul.f32 0.0, %s3930_s7 }
 0x362   :  { %s2367_s14 = ssub.f32 %s555_s13, %s556_s17 }
 0x363   :  { %s3972_s10 = sld [smem:[#allocation29_spill]] }
 0x364   :  { %v1814_v51 = vpop.eup %1813  ;;  %s2375_s6 = ssub.f32 %s3971_s1, %s3970_s29 }
 0x365   :  { %v521_v52 = vmul.f32 %v1814_v51, %v519_v50  ;;  %s3973_s26 = sld [smem:[#allocation26_spill]]  ;;  %vm526_vm10 = vweird.f32 %v1814_v51 }
 0x366   :  { %s3974_s3 = sld [smem:[#allocation21_spill]]  ;;  %vm527_vm12 = vmor %vm525_vm11, %vm526_vm10 }
 0x367   :  { %v522_v53 = vsub.f32 1.0, %v521_v52  ;;  %s3975_s18 = sld [smem:[#allocation23_spill]] }
 0x368   :  { %s3976_s19 = sld [smem:[#allocation24_spill]] }
 0x369   :  { %v523_v55 = vmul.f32 %v1814_v51, %v522_v53  ;;  %s3977_s4 = sld [smem:[#allocation31_spill]]  ;;  %s439_s8 = smul.f32 0.0, %s3972_s10  ;;  %v77_v53 = vlaneseq }
 0x36a   :  { %s3978_s17 = sld [smem:[#allocation22_spill]] }
 0x36b   :  { %v524_v57 = vadd.f32 %v1814_v51, %v523_v55  ;;  %s3979_s28 = sld [smem:[#allocation25_spill]]  ;;  %s443_s0 = smul.f32 0.0, %s3973_s26  ;;  %v3481_v54 = vand.u32 127, %v77_v53 }
 0x36c   :  { %s445_s13 = smul.f32 0.0, %s3974_s3  ;;  %s3980_s22 = sld [smem:[#allocation68_spill]] }
 0x36d   :  { %v528_v59 = vsel %vm527_vm12, %v1814_v51, %v524_v57  ;;  %s449_s9 = smul.f32 0.0, %s3975_s18  ;;  %s440_s5 = sadd.f32 %s439_s8, %s437_s30 }
 0x36e   :  { %v533_v60 = vsel %vm530_vm13, %v532_v58, %v528_v59  ;;  %s451_s21 = smul.f32 0.0, %s3976_s19  ;;  %s3981_s20 = sld [smem:[#allocation65_spill]] }
 0x36f   :  { %1764 = vpush %v533_v60  ;;  %s3982_s27 = sld [smem:[#allocation67_spill]]  ;;  %s441_s29 = smul.f32 0.0, %s3977_s4 }
 0x370   :  { %s446_s1 = sadd.f32 %s445_s13, %s443_s0  ;;  %s447_s12 = smul.f32 0.0, %s3978_s17 }
 0x371   :  { %s3983_s11 = sld [smem:[#allocation69_spill]]  ;;  %s453_s10 = smul.f32 0.0, %s3979_s28 }
 0x372   :  { %s452_s23 = sadd.f32 %s451_s21, %s449_s9 }
 0x373   :  { %s3984_s7 = sld [smem:[#allocation66_spill]] }
 0x374   :  { %s442_s3 = sadd.f32 %s441_s29, %s440_s5 }
 0x375   :  { %s3985_s26 = sld [smem:[#allocation70_spill]] }
 0x376   :  { %s448_s18 = sadd.f32 %s447_s12, %s446_s1  ;;  %s458_s8 = smul.f32 2.0, %s442_s3 }
 0x377   :  { %s454_s19 = sadd.f32 %s453_s10, %s452_s23 }
 0x378   :  { %s3986_s30 = sld [smem:[#allocation71_spill]]  ;;  %s462_s4 = smul.f32 2.0, %s448_s18 }
 0x379   :  { %s466_s0 = smul.f32 2.0, %s454_s19  ;;  %s3987_s28 = ssub.f32 %s3981_s20, %s3982_s27 }
 0x37a   :  { %s3988_s10 = sadd.f32 %s2193_s25, %s3984_s7 }
 0x37b   :  { %s3989_s18 = sadd.f32 %s3985_s26, %s2193_s25 }
 0x37c   :  { %s459_s23 = ssub.f32 %s3988_s10, %s458_s8 }
 0x37d   :  { %s463_s19 = ssub.f32 %s3989_s18, %s462_s4 }
 0x37e   :  { %s3991_s20 = sld [smem:[#allocation51_spill]] }
 0x37f   :  { %s3993_s7 = sld [smem:[#allocation53_spill]] }
 0x3a0   :  { %s1765_s13 = spop %1764 }
 0x3a1   :  { %s535_s17 = smul.f32 %s1765_s13, %s3980_s22 }
 0x3a2   :  { %s539_s9 = smul.f32 %s1765_s13, %s2342_s15  ;;  %s3990_s15 = sadd.f32 %s3986_s30, %s2193_s25 }
 0x3a3   :  { %s543_s21 = smul.f32 %s1765_s13, %s2352_s2 }
 0x3a4   :  { %s545_s5 = smul.f32 %s1765_s13, %s3987_s28  ;;  %s467_s2 = ssub.f32 %s3990_s15, %s466_s0 }
 0x3a5   :  { %s549_s29 = smul.f32 %s1765_s13, %s2357_s16  ;;  %s3992_s16 = sld [smem:[#allocation50_spill]] }
 0x3a6   :  { %s553_s1 = smul.f32 %s1765_s13, %s2365_s24  ;;  %s3999_s15 = sld [smem:[#allocation56_spill]] }
 0x3a7   :  { %s554_s12 = smul.f32 %s1765_s13, %s3983_s11 }
 0x3a8   :  { %s558_s3 = smul.f32 %s1765_s13, %s2367_s14 }
 0x3a9   :  { %s562_s22 = smul.f32 %s1765_s13, %s2375_s6 }
 0x3aa   :  { %s563_s27 = smul.f32 %s535_s17, %s459_s23 }
 0x3ab   :  { %s565_s28 = smul.f32 %s539_s9, %s463_s19 }
 0x3ac   :  { %s567_s24 = smul.f32 %s543_s21, %s467_s2 }
 0x3ad   :  { %s566_s11 = sadd.f32 %s565_s28, %s563_s27  ;;  %s569_s8 = smul.f32 %s545_s5, %s459_s23 }
 0x3ae   :  { %s571_s10 = smul.f32 %s549_s29, %s463_s19 }
 0x3af   :  { %s568_s14 = sadd.f32 %s567_s24, %s566_s11  ;;  %s573_s26 = smul.f32 %s553_s1, %s467_s2 }
 0x3b0   :  { %s572_s4 = sadd.f32 %s571_s10, %s569_s8  ;;  %s575_s18 = smul.f32 %s554_s12, %s459_s23 }
 0x3b1   :  { %s577_s6 = smul.f32 %s558_s3, %s463_s19  ;;  %s2406_s25 = ssub.f32 0.0, %s568_s14 }
 0x3b2   :  { %s574_s17 = sadd.f32 %s573_s26, %s572_s4  ;;  %s579_s30 = smul.f32 %s562_s22, %s467_s2 }
 0x3b3   :  { %3994 = sst [smem:[#allocation68_spill]] %s2406_s25  ;;  %s584_s13 = smul.f32 %s2406_s25, %s3991_s20 }
 0x3b4   :  { %s578_s0 = sadd.f32 %s577_s6, %s575_s18  ;;  %s2414_s21 = smul.f32 %s2406_s25, %s3992_s16 }
 0x3b5   :  { %s2410_s9 = ssub.f32 0.0, %s574_s17  ;;  %s2418_s29 = smul.f32 %s2406_s25, %s3993_s7 }
 0x3b6   :  { %s580_s5 = sadd.f32 %s579_s30, %s578_s0 }
 0x3b7   :  { %3995 = sst [smem:[#allocation65_spill]] %s2410_s9  ;;  %s2422_s1 = smul.f32 %s2410_s9, %s3993_s7 }
 0x3b8   :  { %s2424_s12 = ssub.f32 0.0, %s580_s5  ;;  %s2428_s23 = smul.f32 %s2410_s9, %s3992_s16 }
 0x3b9   :  { %s586_s3 = sadd.f32 %s2422_s1, %s584_s13  ;;  %s2433_s19 = smul.f32 %s2410_s9, %s3991_s20 }
 0x3ba   :  { %3996 = sst [smem:[#allocation67_spill]] %s2424_s12  ;;  %s2437_s22 = smul.f32 %s2424_s12, %s3992_s16 }
 0x3bb   :  { %3997 = sst [smem:[#allocation69_spill]] %s2428_s23  ;;  %s2441_s2 = smul.f32 %s2424_s12, %s3993_s7 }
 0x3bc   :  { %3998 = sst [smem:[#allocation66_spill]] %s2437_s22  ;;  %s2450_s11 = smul.f32 %s2424_s12, %s3991_s20 }
 0x3bd   :  { %4000 = sst [smem:[#allocation70_spill]] %s2441_s2 }
 0x3be   :  { %s597_s27 = ssub.f32 %s2433_s19, %s2418_s29 }
 0x3bf   :  { %s2446_s28 = sadd.f32 %s2437_s22, %s586_s3 }
 0x3c0   :  { %s4001_s24 = sld [smem:[#allocation52_spill]] }
 0x3c1   :  { %4002 = sst [smem:[#allocation71_spill]] %s2450_s11  ;;  %s617_s4 = smul.f32 %s2446_s28, %s2406_s25 }
 0x3c2   :  { %s591_s8 = ssub.f32 %s2441_s2, %s2428_s23  ;;  %s622_s6 = smul.f32 %s2446_s28, %s2410_s9 }
 0x3c3   :  { %s4003_s10 = sld [smem:[#allocation58_spill]]  ;;  %s627_s3 = smul.f32 %s2446_s28, %s2424_s12 }
 0x3c4   :  { %s594_s14 = ssub.f32 %s2414_s21, %s2450_s11  ;;  %s2470_s23 = smul.f32 0.0, %s2446_s28 }
 0x3c5   :  { %s4004_s26 = sld [smem:[#allocation59_spill]] }
 0x3c6   :  { %s616_s18 = sadd.f32 %s591_s8, %s3991_s20 }
 0x3c7   :  { %s621_s17 = sadd.f32 %s594_s14, %s3993_s7 }
 0x3c8   :  { %s4005_s30 = sld [smem:[#allocation57_spill]] }
 0x3c9   :  { %s2462_s0 = sadd.f32 %s617_s4, %s616_s18 }
 0x3ca   :  { %s4007_s5 = sld [smem:[#allocation60_spill]] }
 0x3cb   :  { %4006 = sst [smem:[#allocation72_spill]] %s2462_s0 }
 0x3cc   :  { %s2466_s22 = sadd.f32 %s622_s6, %s621_s17 }
 0x3cd   :  { %s626_s2 = sadd.f32 %s597_s27, %s3992_s16 }
 0x3ce   :  { %4008 = sst [smem:[#allocation73_spill]] %s2466_s22 }
 0x3cf   :  { %s4009_s11 = sld [smem:[#allocation54_spill]] }
 0x3d0   :  { %s632_s8 = ssub.f32 %s2446_s28, %s3999_s15 }
 0x3d1   :  { %s4010_s14 = sld [smem:[#allocation55_spill]] }
 0x3d2   :  { %s2474_s9 = sadd.f32 %s627_s3, %s626_s2 }
 0x3d3   :  { %s2476_s4 = sadd.f32 %s632_s8, %s584_s13 }
 0x3d4   :  { %4011 = sst [smem:[#allocation74_spill]] %s2474_s9 }
 0x3d5   :  { %s4012_s18 = sld [smem:[#allocation61_spill]] }
 0x3d6   :  { %s635_s0 = sadd.f32 %s2470_s23, %s4001_s24 }
 0x3d7   :  { %s638_s6 = sadd.f32 %s2470_s23, %s3993_s7 }
 0x3d8   :  { %s4013_s17 = sld [smem:[#allocation62_spill]] }
 0x3d9   :  { %s636_s27 = ssub.f32 %s635_s0, %s4003_s10 }
 0x3da   :  { %s639_s22 = ssub.f32 %s638_s6, %s4004_s26 }
 0x3db   :  { %s4014_s12 = sld [smem:[#allocation69_spill]] }
 0x3dc   :  { %s2485_s25 = sadd.f32 %s636_s27, %s2418_s29 }
 0x3dd   :  { %s4015_s20 = sld [smem:[#allocation71_spill]] }
 0x3de   :  { %s2488_s15 = sadd.f32 %s639_s22, %s2414_s21 }
 0x3df   :  { %s4016_s2 = sld [smem:[#allocation51_spill]] }
 0x3e0   :  { %s641_s13 = sadd.f32 %s2470_s23, %s3992_s16 }
 0x3e1   :  { %s644_s3 = ssub.f32 %s2446_s28, %s4005_s30 }
 0x3e2   :  { %s4017_s8 = sld [smem:[#allocation64_spill]] }
 0x3e3   :  { %s642_s24 = ssub.f32 %s641_s13, %s4007_s5 }
 0x3e4   :  { %s2496_s7 = sadd.f32 %s644_s3, %s2422_s1 }
 0x3e5   :  { %s4018_s29 = sld [smem:[#allocation63_spill]] }
 0x3e6   :  { %s2499_s0 = sadd.f32 %s642_s24, %s2433_s19  ;;  %s4021_s16 = smul.f32 %s2496_s7, %s2488_s15 }
 0x3e7   :  { %s646_s21 = sadd.f32 %s2470_s23, %s4009_s11 }
 0x3e8   :  { %s4019_s22 = sld [smem:[#allocation66_spill]] }
 0x3e9   :  { %s649_s27 = sadd.f32 %s2470_s23, %s4010_s14 }
 0x3ea   :  { %s4020_s26 = sld [smem:[#allocation70_spill]] }
 0x3eb   :  { %s647_s10 = ssub.f32 %s646_s21, %s4012_s18 }
 0x3ec   :  { %s650_s13 = ssub.f32 %s649_s27, %s4013_s17 }
 0x3ed   :  { %s2516_s5 = sadd.f32 %s647_s10, %s4014_s12 }
 0x3ee   :  { %s2519_s19 = sadd.f32 %s650_s13, %s4015_s20 }
 0x3ef   :  { %s652_s24 = sadd.f32 %s2470_s23, %s4016_s2  ;;  %s703_s13 = smul.f32 %s2516_s5, %s2476_s4 }
 0x3f0   :  { %s655_s30 = ssub.f32 %s2446_s28, %s4017_s8  ;;  %s2529_s27 = smul.f32 %s2519_s19, %s2516_s5 }
 0x3f1   :  { %s653_s12 = ssub.f32 %s652_s24, %s4018_s29  ;;  %s667_s10 = smul.f32 %s2519_s19, %s2496_s7 }
 0x3f2   :  { %s656_s1 = sadd.f32 %s655_s30, %s4019_s22  ;;  %s699_s3 = smul.f32 %s2519_s19, %s2488_s15 }
 0x3f3   :  { %s654_s20 = sadd.f32 %s653_s12, %s4020_s26  ;;  %s707_s11 = smul.f32 %s2519_s19, %s2485_s25 }
 0x3f4   :  { %s657_s6 = smul.f32 %s656_s1, %s2496_s7 }
 0x3f5   :  { %s658_s23 = smul.f32 %s654_s20, %s2516_s5 }
 0x3f6   :  { %s2543_s28 = smul.f32 %s656_s1, %s2499_s0 }
 0x3f7   :  { %s2545_s21 = ssub.f32 %s657_s6, %s658_s23  ;;  %s666_s24 = smul.f32 %s654_s20, %s2499_s0 }
 0x3f8   :  { %s663_s30 = ssub.f32 %s2543_s28, %s2529_s27  ;;  %s688_s6 = smul.f32 %s654_s20, %s2488_s15 }
 0x3f9   :  { %s660_s26 = smul.f32 %s2545_s21, %s2476_s4  ;;  %s2552_s22 = ssub.f32 %s666_s24, %s667_s10 }
 0x3fa   :  { %s664_s12 = smul.f32 %s663_s30, %s2485_s25 }
 0x3fb   :  { %s669_s8 = smul.f32 %s2552_s22, %s2488_s15 }
 0x3fc   :  { %s665_s17 = ssub.f32 %s660_s26, %s664_s12  ;;  %s689_s18 = smul.f32 %s656_s1, %s2485_s25 }
 0x3fd   :  { %s698_s14 = smul.f32 %s656_s1, %s2476_s4 }
 0x3fe   :  { %s670_s23 = sadd.f32 %s669_s8, %s665_s17  ;;  %s708_s24 = smul.f32 %s654_s20, %s2476_s4 }
 0x3ff   :  { %s2564_s10 = ssub.f32 %s688_s6, %s689_s18  ;;  %s4022_s2 = smul.f32 %s2516_s5, %s2485_s25 }
 0x400   :  { %v671_v61 = vstv %s670_s23  ;;  %s2575_s29 = ssub.f32 %s698_s14, %s699_s3  ;;  %s4023_s26 = smul.f32 %s2499_s0, %s2488_s15 }
 0x401   :  { %1815 = vrcp.f32 %v671_v61  ;;  %s2573_s30 = ssub.f32 %s4022_s2, %s4021_s16  ;;  %s4027_s1 = smul.f32 %s2499_s0, %s2485_s25  ;;  %v683_v1 = vand.u32 2147483648, %v671_v61  ;;  %v681_v3 = vand.u32 2147483647, %v671_v61  ;;  %vm677_vm15 = vweird.f32 %v671_v61 }
 0x402   :  { %s2580_s12 = ssub.f32 %s4023_s26, %s703_s13  ;;  %s4028_s19 = smul.f32 %s2496_s7, %s2476_s4 }
 0x403   :  { %s2582_s9 = ssub.f32 %s707_s11, %s708_s24  ;;  %v684_v5 = vor.u32 1.1754944e-38, %v683_v1  ;;  %vm682_vm3 = vcmp.eq.f32.partialorder %v681_v3, 8.507059e+37 }
 0x404   :  { %s4025_s17 = sld [smem:[#allocation28_spill]] }
 0x405   :  { %4024 = sst [smem:[#allocation69_spill]] %s2582_s9 }
 0x406   :  { %s4026_s8 = sld [smem:[#allocation68_spill]] }
 0x407   :  { %v1816_v62 = vpop.eup %1815  ;;  %s4029_s18 = sld [smem:[#allocation65_spill]] }
 0x408   :  { %v673_v63 = vmul.f32 %v1816_v62, %v671_v61  ;;  %s4030_s6 = sld [smem:[#allocation29_spill]]  ;;  %vm678_vm14 = vweird.f32 %v1816_v62 }
 0x409   :  { %s2590_s20 = ssub.f32 %s4028_s19, %s4027_s1  ;;  %vm679_vm2 = vmor %vm677_vm15, %vm678_vm14 }
 0x40a   :  { %s4032_s16 = sld [smem:[#allocation26_spill]]  ;;  %v674_v0 = vsub.f32 1.0, %v673_v63 }
 0x40b   :  { %4031 = sst [smem:[#allocation71_spill]] %s2590_s20 }
 0x40c   :  { %s4033_s5 = sld [smem:[#allocation21_spill]]  ;;  %v675_v2 = vmul.f32 %v1816_v62, %v674_v0  ;;  %s598_s2 = smul.f32 %s4026_s8, %s4025_s17 }
 0x40d   :  { %s4034_s15 = sld [smem:[#allocation23_spill]] }
 0x40e   :  { %s4035_s11 = sld [smem:[#allocation24_spill]]  ;;  %v676_v4 = vadd.f32 %v1816_v62, %v675_v2  ;;  %s600_s0 = smul.f32 %s4030_s6, %s4029_s18 }
 0x40f   :  { %s4036_s25 = sld [smem:[#allocation67_spill]] }
 0x410   :  { %s4037_s7 = sld [smem:[#allocation31_spill]]  ;;  %v680_v6 = vsel %vm679_vm2, %v1816_v62, %v676_v4  ;;  %s604_s3 = smul.f32 %s4032_s16, %s4026_s8 }
 0x411   :  { %s4038_s14 = sld [smem:[#allocation22_spill]]  ;;  %v685_v7 = vsel %vm682_vm3, %v684_v5, %v680_v6 }
 0x412   :  { %s4039_s4 = sld [smem:[#allocation25_spill]]  ;;  %1766 = vpush %v685_v7  ;;  %s606_s13 = smul.f32 %s4033_s5, %s4029_s18 }
 0x413   :  { %s610_s23 = smul.f32 %s4034_s15, %s4026_s8  ;;  %s601_s26 = sadd.f32 %s600_s0, %s598_s2 }
 0x414   :  { %s612_s24 = smul.f32 %s4035_s11, %s4029_s18  ;;  %s607_s1 = sadd.f32 %s606_s13, %s604_s3 }
 0x415   :  { %s4040_s17 = sld [smem:[#allocation72_spill]] }
 0x416   :  { %s602_s19 = smul.f32 %s4037_s7, %s4036_s25  ;;  %s613_s20 = sadd.f32 %s612_s24, %s610_s23 }
 0x417   :  { %s608_s9 = smul.f32 %s4038_s14, %s4036_s25  ;;  %s4041_s16 = sld [smem:[#allocation69_spill]] }
 0x418   :  { %s603_s6 = sadd.f32 %s602_s19, %s601_s26  ;;  %s614_s5 = smul.f32 %s4039_s4, %s4036_s25 }
 0x419   :  { %s4042_s8 = sld [smem:[#allocation73_spill]] }
 0x41a   :  { %s609_s15 = sadd.f32 %s608_s9, %s607_s1  ;;  %s619_s2 = smul.f32 2.0, %s603_s6 }
 0x41b   :  { %s4043_s11 = sld [smem:[#allocation71_spill]] }
 0x41c   :  { %s615_s18 = sadd.f32 %s614_s5, %s613_s20  ;;  %s624_s3 = smul.f32 2.0, %s609_s15 }
 0x41d   :  { %s4044_s0 = sld [smem:[#allocation74_spill]] }
 0x41e   :  { %s629_s13 = smul.f32 2.0, %s615_s18  ;;  %s4045_s19 = ssub.f32 %s2529_s27, %s2543_s28 }
 0x41f   :  { %s620_s9 = ssub.f32 %s4040_s17, %s619_s2 }
 0x420   :  { %s4046_s5 = sld [smem:[#allocation68_spill]] }
 0x421   :  { %s625_s6 = ssub.f32 %s4042_s8, %s624_s3 }
 0x422   :  { %s4049_s28 = sld [smem:[#allocation50_spill]] }
 0x423   :  { %s630_s18 = ssub.f32 %s4044_s0, %s629_s13 }
 0x424   :  { %s4051_s17 = sld [smem:[#allocation67_spill]] }
 0x443   :  { %s1767_s7 = spop %1766 }
 0x444   :  { %s687_s23 = smul.f32 %s1767_s7, %s2545_s21  ;;  %s4047_s21 = sld [smem:[#allocation51_spill]] }
 0x445   :  { %s691_s24 = smul.f32 %s1767_s7, %s2564_s10 }
 0x446   :  { %s695_s14 = smul.f32 %s1767_s7, %s2573_s30  ;;  %s4048_s30 = sld [smem:[#allocation65_spill]] }
 0x447   :  { %s697_s26 = smul.f32 %s1767_s7, %s4045_s19 }
 0x448   :  { %s701_s4 = smul.f32 %s1767_s7, %s2575_s29 }
 0x449   :  { %s705_s25 = smul.f32 %s1767_s7, %s2580_s12  ;;  %s4050_s12 = sld [smem:[#allocation53_spill]] }
 0x44a   :  { %s706_s1 = smul.f32 %s1767_s7, %s2552_s22 }
 0x44b   :  { %s710_s20 = smul.f32 %s1767_s7, %s4041_s16 }
 0x44c   :  { %s714_s15 = smul.f32 %s1767_s7, %s4043_s11 }
 0x44d   :  { %s715_s10 = smul.f32 %s687_s23, %s620_s9 }
 0x44e   :  { %s717_s27 = smul.f32 %s691_s24, %s625_s6 }
 0x44f   :  { %s719_s19 = smul.f32 %s695_s14, %s630_s18 }
 0x450   :  { %s718_s29 = sadd.f32 %s717_s27, %s715_s10  ;;  %s721_s22 = smul.f32 %s697_s26, %s620_s9 }
 0x451   :  { %s723_s2 = smul.f32 %s701_s4, %s625_s6  ;;  %s4057_s10 = sld [smem:[#allocation56_spill]] }
 0x452   :  { %s720_s16 = sadd.f32 %s719_s19, %s718_s29  ;;  %s725_s3 = smul.f32 %s705_s25, %s630_s18 }
 0x453   :  { %s724_s8 = sadd.f32 %s723_s2, %s721_s22  ;;  %s727_s7 = smul.f32 %s706_s1, %s620_s9 }
 0x454   :  { %s729_s11 = smul.f32 %s710_s20, %s625_s6  ;;  %s2625_s0 = ssub.f32 %s4046_s5, %s720_s16 }
 0x455   :  { %s726_s14 = sadd.f32 %s725_s3, %s724_s8  ;;  %s731_s13 = smul.f32 %s714_s15, %s630_s18 }
 0x456   :  { %4052 = sst [smem:[#allocation66_spill]] %s2625_s0  ;;  %s736_s4 = smul.f32 %s2625_s0, %s4047_s21 }
 0x457   :  { %s730_s23 = sadd.f32 %s729_s11, %s727_s7  ;;  %s2634_s25 = smul.f32 %s2625_s0, %s4049_s28 }
 0x458   :  { %s2630_s24 = ssub.f32 %s4048_s30, %s726_s14  ;;  %s2638_s1 = smul.f32 %s2625_s0, %s4050_s12 }
 0x459   :  { %s732_s26 = sadd.f32 %s731_s13, %s730_s23 }
 0x45a   :  { %4053 = sst [smem:[#allocation70_spill]] %s2630_s24  ;;  %s2642_s9 = smul.f32 %s2630_s24, %s4050_s12 }
 0x45b   :  { %s2645_s5 = ssub.f32 %s4051_s17, %s732_s26  ;;  %s2649_s20 = smul.f32 %s2630_s24, %s4049_s28 }
 0x45c   :  { %s738_s6 = sadd.f32 %s2642_s9, %s736_s4  ;;  %s2654_s15 = smul.f32 %s2630_s24, %s4047_s21 }
 0x45d   :  { %4054 = sst [smem:[#allocation72_spill]] %s2645_s5  ;;  %s2658_s18 = smul.f32 %s2645_s5, %s4049_s28 }
 0x45e   :  { %4055 = sst [smem:[#allocation69_spill]] %s2649_s20  ;;  %s2662_s30 = smul.f32 %s2645_s5, %s4050_s12 }
 0x45f   :  { %4056 = sst [smem:[#allocation73_spill]] %s2658_s18  ;;  %s2671_s22 = smul.f32 %s2645_s5, %s4047_s21 }
 0x460   :  { %4058 = sst [smem:[#allocation71_spill]] %s2662_s30 }
 0x461   :  { %s749_s27 = ssub.f32 %s2654_s15, %s2638_s1 }
 0x462   :  { %s2667_s19 = sadd.f32 %s2658_s18, %s738_s6 }
 0x463   :  { %s4059_s29 = sld [smem:[#allocation52_spill]] }
 0x464   :  { %4060 = sst [smem:[#allocation74_spill]] %s2671_s22  ;;  %s769_s8 = smul.f32 %s2667_s19, %s2625_s0 }
 0x465   :  { %s743_s2 = ssub.f32 %s2662_s30, %s2649_s20  ;;  %s774_s11 = smul.f32 %s2667_s19, %s2630_s24 }
 0x466   :  { %s4061_s17 = sld [smem:[#allocation58_spill]]  ;;  %s779_s6 = smul.f32 %s2667_s19, %s2645_s5 }
 0x467   :  { %s746_s16 = ssub.f32 %s2634_s25, %s2671_s22  ;;  %s2691_s20 = smul.f32 0.0, %s2667_s19 }
 0x468   :  { %s4062_s3 = sld [smem:[#allocation59_spill]] }
 0x469   :  { %s768_s7 = sadd.f32 %s743_s2, %s4047_s21 }
 0x46a   :  { %s773_s14 = sadd.f32 %s746_s16, %s4050_s12 }
 0x46b   :  { %s4063_s13 = sld [smem:[#allocation57_spill]] }
 0x46c   :  { %s2683_s23 = sadd.f32 %s769_s8, %s768_s7 }
 0x46d   :  { %s4065_s26 = sld [smem:[#allocation60_spill]] }
 0x46e   :  { %4064 = sst [smem:[#allocation68_spill]] %s2683_s23 }
 0x46f   :  { %s2687_s18 = sadd.f32 %s774_s11, %s773_s14 }
 0x470   :  { %s778_s30 = sadd.f32 %s749_s27, %s4049_s28 }
 0x471   :  { %4066 = sst [smem:[#allocation65_spill]] %s2687_s18 }
 0x472   :  { %s4067_s22 = sld [smem:[#allocation54_spill]] }
 0x473   :  { %s784_s2 = ssub.f32 %s2667_s19, %s4057_s10 }
 0x474   :  { %s4068_s16 = sld [smem:[#allocation55_spill]] }
 0x475   :  { %s2695_s24 = sadd.f32 %s779_s6, %s778_s30 }
 0x476   :  { %s2697_s8 = sadd.f32 %s784_s2, %s736_s4 }
 0x477   :  { %4069 = sst [smem:[#allocation67_spill]] %s2695_s24 }
 0x478   :  { %s4070_s7 = sld [smem:[#allocation61_spill]] }
 0x479   :  { %s787_s23 = sadd.f32 %s2691_s20, %s4059_s29 }
 0x47a   :  { %s790_s11 = sadd.f32 %s2691_s20, %s4050_s12 }
 0x47b   :  { %s4071_s14 = sld [smem:[#allocation62_spill]] }
 0x47c   :  { %s788_s27 = ssub.f32 %s787_s23, %s4061_s17 }
 0x47d   :  { %s791_s18 = ssub.f32 %s790_s11, %s4062_s3 }
 0x47e   :  { %s4072_s5 = sld [smem:[#allocation69_spill]] }
 0x47f   :  { %s2706_s0 = sadd.f32 %s788_s27, %s2638_s1 }
 0x480   :  { %s4073_s21 = sld [smem:[#allocation74_spill]] }
 0x481   :  { %s2709_s10 = sadd.f32 %s791_s18, %s2634_s25 }
 0x482   :  { %s4074_s30 = sld [smem:[#allocation51_spill]] }
 0x483   :  { %s793_s4 = sadd.f32 %s2691_s20, %s4049_s28 }
 0x484   :  { %s796_s6 = ssub.f32 %s2667_s19, %s4063_s13 }
 0x485   :  { %s4075_s2 = sld [smem:[#allocation64_spill]] }
 0x486   :  { %s794_s29 = ssub.f32 %s793_s4, %s4065_s26 }
 0x487   :  { %s2717_s12 = sadd.f32 %s796_s6, %s2642_s9 }
 0x488   :  { %s4076_s1 = sld [smem:[#allocation63_spill]] }
 0x489   :  { %s2720_s23 = sadd.f32 %s794_s29, %s2654_s15  ;;  %s4079_s28 = smul.f32 %s2717_s12, %s2709_s10 }
 0x48a   :  { %s798_s25 = sadd.f32 %s2691_s20, %s4067_s22 }
 0x48b   :  { %s4077_s18 = sld [smem:[#allocation73_spill]] }
 0x48c   :  { %s801_s27 = sadd.f32 %s2691_s20, %s4068_s16 }
 0x48d   :  { %s4078_s3 = sld [smem:[#allocation71_spill]] }
 0x48e   :  { %s799_s17 = ssub.f32 %s798_s25, %s4070_s7 }
 0x48f   :  { %s802_s4 = ssub.f32 %s801_s27, %s4071_s14 }
 0x490   :  { %s2737_s26 = sadd.f32 %s799_s17, %s4072_s5 }
 0x491   :  { %s2740_s15 = sadd.f32 %s802_s4, %s4073_s21 }
 0x492   :  { %s804_s29 = sadd.f32 %s2691_s20, %s4074_s30  ;;  %s855_s4 = smul.f32 %s2737_s26, %s2697_s8 }
 0x493   :  { %s807_s13 = ssub.f32 %s2667_s19, %s4075_s2  ;;  %s2750_s27 = smul.f32 %s2740_s15, %s2737_s26 }
 0x494   :  { %s805_s5 = ssub.f32 %s804_s29, %s4076_s1  ;;  %s819_s17 = smul.f32 %s2740_s15, %s2717_s12 }
 0x495   :  { %s808_s9 = sadd.f32 %s807_s13, %s4077_s18  ;;  %s851_s6 = smul.f32 %s2740_s15, %s2709_s10 }
 0x496   :  { %s806_s21 = sadd.f32 %s805_s5, %s4078_s3  ;;  %s859_s22 = smul.f32 %s2740_s15, %s2706_s0 }
 0x497   :  { %s809_s11 = smul.f32 %s808_s9, %s2717_s12 }
 0x498   :  { %s810_s20 = smul.f32 %s806_s21, %s2737_s26 }
 0x499   :  { %s2764_s19 = smul.f32 %s808_s9, %s2720_s23 }
 0x49a   :  { %s2766_s25 = ssub.f32 %s809_s11, %s810_s20  ;;  %s818_s29 = smul.f32 %s806_s21, %s2720_s23 }
 0x49b   :  { %s815_s13 = ssub.f32 %s2764_s19, %s2750_s27  ;;  %s840_s11 = smul.f32 %s806_s21, %s2709_s10 }
 0x49c   :  { %s812_s3 = smul.f32 %s2766_s25, %s2697_s8  ;;  %s2773_s18 = ssub.f32 %s818_s29, %s819_s17 }
 0x49d   :  { %s816_s5 = smul.f32 %s815_s13, %s2706_s0 }
 0x49e   :  { %s821_s2 = smul.f32 %s2773_s18, %s2709_s10 }
 0x49f   :  { %s817_s14 = ssub.f32 %s812_s3, %s816_s5  ;;  %s841_s7 = smul.f32 %s808_s9, %s2706_s0 }
 0x4a0   :  { %s850_s16 = smul.f32 %s808_s9, %s2697_s8 }
 0x4a1   :  { %s822_s20 = sadd.f32 %s821_s2, %s817_s14  ;;  %s860_s29 = smul.f32 %s806_s21, %s2697_s8 }
 0x4a2   :  { %s2785_s17 = ssub.f32 %s840_s11, %s841_s7  ;;  %s4080_s30 = smul.f32 %s2737_s26, %s2706_s0 }
 0x4a3   :  { %v823_v8 = vstv %s822_s20  ;;  %s2796_s1 = ssub.f32 %s850_s16, %s851_s6  ;;  %s4081_s3 = smul.f32 %s2720_s23, %s2709_s10 }
 0x4a4   :  { %1817 = vrcp.f32 %v823_v8  ;;  %s2794_s13 = ssub.f32 %s4080_s30, %s4079_s28  ;;  %s4085_s9 = smul.f32 %s2720_s23, %s2706_s0  ;;  %v835_v12 = vand.u32 2147483648, %v823_v8  ;;  %v833_v14 = vand.u32 2147483647, %v823_v8  ;;  %vm829_vm5 = vweird.f32 %v823_v8 }
 0x4a5   :  { %s2801_s5 = ssub.f32 %s4081_s3, %s855_s4  ;;  %s4086_s15 = smul.f32 %s2717_s12, %s2697_s8 }
 0x4a6   :  { %s2803_s24 = ssub.f32 %s859_s22, %s860_s29  ;;  %v836_v16 = vor.u32 1.1754944e-38, %v835_v12  ;;  %vm834_vm7 = vcmp.eq.f32.partialorder %v833_v14, 8.507059e+37 }
 0x4a7   :  { %s4083_s14 = sld [smem:[#allocation28_spill]] }
 0x4a8   :  { %4082 = sst [smem:[#allocation69_spill]] %s2803_s24 }
 0x4a9   :  { %s4084_s2 = sld [smem:[#allocation66_spill]] }
 0x4aa   :  { %v1818_v9 = vpop.eup %1817  ;;  %s4087_s7 = sld [smem:[#allocation70_spill]] }
 0x4ab   :  { %v825_v10 = vmul.f32 %v1818_v9, %v823_v8  ;;  %s4088_s11 = sld [smem:[#allocation29_spill]]  ;;  %vm830_vm4 = vweird.f32 %v1818_v9 }
 0x4ac   :  { %s2811_s21 = ssub.f32 %s4086_s15, %s4085_s9  ;;  %vm831_vm6 = vmor %vm829_vm5, %vm830_vm4 }
 0x4ad   :  { %s4090_s28 = sld [smem:[#allocation26_spill]]  ;;  %v826_v11 = vsub.f32 1.0, %v825_v10 }
 0x4ae   :  { %4089 = sst [smem:[#allocation74_spill]] %s2811_s21 }
 0x4af   :  { %s4091_s26 = sld [smem:[#allocation21_spill]]  ;;  %v827_v13 = vmul.f32 %v1818_v9, %v826_v11  ;;  %s750_s30 = smul.f32 %s4084_s2, %s4083_s14 }
 0x4b0   :  { %s4092_s10 = sld [smem:[#allocation23_spill]] }
 0x4b1   :  { %s4093_s22 = sld [smem:[#allocation24_spill]]  ;;  %v828_v15 = vadd.f32 %v1818_v9, %v827_v13  ;;  %s752_s23 = smul.f32 %s4088_s11, %s4087_s7 }
 0x4b2   :  { %s4094_s0 = sld [smem:[#allocation72_spill]] }
 0x4b3   :  { %s4095_s12 = sld [smem:[#allocation31_spill]]  ;;  %v832_v17 = vsel %vm831_vm6, %v1818_v9, %v828_v15  ;;  %s756_s6 = smul.f32 %s4090_s28, %s4084_s2 }
 0x4b4   :  { %s4096_s16 = sld [smem:[#allocation22_spill]]  ;;  %v837_v19 = vsel %vm834_vm7, %v836_v16, %v832_v17  ;;  %vm1351_vm7 = vcmp.eq.s32.totalorder %v3481_v54, 0 }
 0x4b5   :  { %s4097_s8 = sld [smem:[#allocation25_spill]]  ;;  %1768 = vpush %v837_v19  ;;  %s758_s4 = smul.f32 %s4091_s26, %s4087_s7  ;;  %v1825_v19 = vld [vmem:[#allocation11 + $0x78] sm:$0x1] }
 0x4b6   :  { %s762_s20 = smul.f32 %s4092_s10, %s4084_s2  ;;  %s753_s3 = sadd.f32 %s752_s23, %s750_s30 }
 0x4b7   :  { %s764_s29 = smul.f32 %s4093_s22, %s4087_s7  ;;  %s759_s9 = sadd.f32 %s758_s4, %s756_s6 }
 0x4b8   :  { %s4098_s14 = sld [smem:[#allocation68_spill]] }
 0x4b9   :  { %s754_s15 = smul.f32 %s4095_s12, %s4094_s0  ;;  %s765_s21 = sadd.f32 %s764_s29, %s762_s20 }
 0x4ba   :  { %s760_s24 = smul.f32 %s4096_s16, %s4094_s0  ;;  %s4099_s28 = sld [smem:[#allocation69_spill]] }
 0x4bb   :  { %s755_s11 = sadd.f32 %s754_s15, %s753_s3  ;;  %s766_s26 = smul.f32 %s4097_s8, %s4094_s0 }
 0x4bc   :  { %s4100_s2 = sld [smem:[#allocation65_spill]] }
 0x4bd   :  { %s761_s10 = sadd.f32 %s760_s24, %s759_s9  ;;  %s771_s30 = smul.f32 2.0, %s755_s11 }
 0x4be   :  { %s4101_s7 = sld [smem:[#allocation74_spill]] }
 0x4bf   :  { %s767_s22 = sadd.f32 %s766_s26, %s765_s21  ;;  %s776_s4 = smul.f32 2.0, %s761_s10 }
 0x4c0   :  { %s4102_s23 = sld [smem:[#allocation67_spill]] }
 0x4c1   :  { %s781_s6 = smul.f32 2.0, %s767_s22  ;;  %s4103_s3 = ssub.f32 %s2750_s27, %s2764_s19 }
 0x4c2   :  { %s772_s24 = ssub.f32 %s4098_s14, %s771_s30 }
 0x4c3   :  { %s4104_s21 = sld [smem:[#allocation66_spill]] }
 0x4c4   :  { %s777_s11 = ssub.f32 %s4100_s2, %s776_s4 }
 0x4c5   :  { %s4107_s27 = sld [smem:[#allocation50_spill]] }
 0x4c6   :  { %s782_s22 = ssub.f32 %s4102_s23, %s781_s6 }
 0x4c7   :  { %s4109_s30 = sld [smem:[#allocation72_spill]] }
 0x4e6   :  { %s1769_s12 = spop %1768 }
 0x4e7   :  { %s839_s20 = smul.f32 %s1769_s12, %s2766_s25  ;;  %s4105_s25 = sld [smem:[#allocation51_spill]] }
 0x4e8   :  { %s843_s29 = smul.f32 %s1769_s12, %s2785_s17 }
 0x4e9   :  { %s847_s16 = smul.f32 %s1769_s12, %s2794_s13  ;;  %s4106_s13 = sld [smem:[#allocation70_spill]] }
 0x4ea   :  { %s849_s15 = smul.f32 %s1769_s12, %s4103_s3 }
 0x4eb   :  { %s853_s0 = smul.f32 %s1769_s12, %s2796_s1 }
 0x4ec   :  { %s857_s8 = smul.f32 %s1769_s12, %s2801_s5  ;;  %s4108_s5 = sld [smem:[#allocation53_spill]] }
 0x4ed   :  { %s858_s9 = smul.f32 %s1769_s12, %s2773_s18 }
 0x4ee   :  { %s862_s26 = smul.f32 %s1769_s12, %s4099_s28 }
 0x4ef   :  { %s866_s10 = smul.f32 %s1769_s12, %s4101_s7 }
 0x4f0   :  { %s867_s17 = smul.f32 %s839_s20, %s772_s24 }
 0x4f1   :  { %s869_s19 = smul.f32 %s843_s29, %s777_s11 }
 0x4f2   :  { %s871_s3 = smul.f32 %s847_s16, %s782_s22 }
 0x4f3   :  { %s870_s1 = sadd.f32 %s869_s19, %s867_s17  ;;  %s873_s18 = smul.f32 %s849_s15, %s772_s24 }
 0x4f4   :  { %s875_s14 = smul.f32 %s853_s0, %s777_s11  ;;  %s4115_s17 = sld [smem:[#allocation56_spill]] }
 0x4f5   :  { %s872_s28 = sadd.f32 %s871_s3, %s870_s1  ;;  %s877_s2 = smul.f32 %s857_s8, %s782_s22 }
 0x4f6   :  { %s876_s4 = sadd.f32 %s875_s14, %s873_s18  ;;  %s879_s7 = smul.f32 %s858_s9, %s772_s24 }
 0x4f7   :  { %s881_s12 = smul.f32 %s862_s26, %s777_s11  ;;  %s2846_s23 = ssub.f32 %s4104_s21, %s872_s28 }
 0x4f8   :  { %s878_s16 = sadd.f32 %s877_s2, %s876_s4  ;;  %s883_s6 = smul.f32 %s866_s10, %s782_s22 }
 0x4f9   :  { %4110 = sst [smem:[#allocation73_spill]] %s2846_s23  ;;  %s888_s0 = smul.f32 %s2846_s23, %s4105_s25 }
 0x4fa   :  { %s882_s20 = sadd.f32 %s881_s12, %s879_s7  ;;  %s2855_s8 = smul.f32 %s2846_s23, %s4107_s27 }
 0x4fb   :  { %s2851_s29 = ssub.f32 %s4106_s13, %s878_s16  ;;  %s2859_s9 = smul.f32 %s2846_s23, %s4108_s5 }
 0x4fc   :  { %s884_s15 = sadd.f32 %s883_s6, %s882_s20 }
 0x4fd   :  { %4111 = sst [smem:[#allocation71_spill]] %s2851_s29  ;;  %s2863_s24 = smul.f32 %s2851_s29, %s4108_s5 }
 0x4fe   :  { %s2866_s21 = ssub.f32 %s4109_s30, %s884_s15  ;;  %s2870_s26 = smul.f32 %s2851_s29, %s4107_s27 }
 0x4ff   :  { %s890_s11 = sadd.f32 %s2863_s24, %s888_s0  ;;  %s2875_s10 = smul.f32 %s2851_s29, %s4105_s25 }
 0x500   :  { %4112 = sst [smem:[#allocation68_spill]] %s2866_s21  ;;  %s2879_s22 = smul.f32 %s2866_s21, %s4107_s27 }
 0x501   :  { %4113 = sst [smem:[#allocation69_spill]] %s2870_s26  ;;  %s2883_s13 = smul.f32 %s2866_s21, %s4108_s5 }
 0x502   :  { %4114 = sst [smem:[#allocation65_spill]] %s2879_s22  ;;  %s2892_s18 = smul.f32 %s2866_s21, %s4105_s25 }
 0x503   :  { %4116 = sst [smem:[#allocation74_spill]] %s2883_s13 }
 0x504   :  { %s901_s19 = ssub.f32 %s2875_s10, %s2859_s9 }
 0x505   :  { %s2888_s3 = sadd.f32 %s2879_s22, %s890_s11 }
 0x506   :  { %s4117_s1 = sld [smem:[#allocation52_spill]] }
 0x507   :  { %4118 = sst [smem:[#allocation67_spill]] %s2892_s18  ;;  %s921_s4 = smul.f32 %s2888_s3, %s2846_s23 }
 0x508   :  { %s895_s14 = ssub.f32 %s2883_s13, %s2870_s26  ;;  %s926_s12 = smul.f32 %s2888_s3, %s2851_s29 }
 0x509   :  { %s4119_s30 = sld [smem:[#allocation58_spill]]  ;;  %s931_s11 = smul.f32 %s2888_s3, %s2866_s21 }
 0x50a   :  { %s898_s28 = ssub.f32 %s2855_s8, %s2892_s18  ;;  %s2912_s26 = smul.f32 0.0, %s2888_s3 }
 0x50b   :  { %s4120_s2 = sld [smem:[#allocation59_spill]] }
 0x50c   :  { %s920_s7 = sadd.f32 %s895_s14, %s4105_s25 }
 0x50d   :  { %s925_s16 = sadd.f32 %s898_s28, %s4108_s5 }
 0x50e   :  { %s4121_s6 = sld [smem:[#allocation57_spill]] }
 0x50f   :  { %s2904_s20 = sadd.f32 %s921_s4, %s920_s7 }
 0x510   :  { %s4123_s15 = sld [smem:[#allocation60_spill]] }
 0x511   :  { %4122 = sst [smem:[#allocation66_spill]] %s2904_s20 }
 0x512   :  { %s2908_s22 = sadd.f32 %s926_s12, %s925_s16 }
 0x513   :  { %s930_s13 = sadd.f32 %s901_s19, %s4107_s27 }
 0x514   :  { %4124 = sst [smem:[#allocation70_spill]] %s2908_s22 }
 0x515   :  { %s4125_s18 = sld [smem:[#allocation54_spill]] }
 0x516   :  { %s936_s14 = ssub.f32 %s2888_s3, %s4115_s17 }
 0x517   :  { %s4126_s28 = sld [smem:[#allocation55_spill]] }
 0x518   :  { %s2916_s29 = sadd.f32 %s931_s11, %s930_s13 }
 0x519   :  { %s2918_s4 = sadd.f32 %s936_s14, %s888_s0 }
 0x51a   :  { %4127 = sst [smem:[#allocation72_spill]] %s2916_s29 }
 0x51b   :  { %s4128_s7 = sld [smem:[#allocation61_spill]] }
 0x51c   :  { %s939_s20 = sadd.f32 %s2912_s26, %s4117_s1 }
 0x51d   :  { %s942_s12 = sadd.f32 %s2912_s26, %s4108_s5 }
 0x51e   :  { %s4129_s16 = sld [smem:[#allocation62_spill]] }
 0x51f   :  { %s940_s19 = ssub.f32 %s939_s20, %s4119_s30 }
 0x520   :  { %s943_s22 = ssub.f32 %s942_s12, %s4120_s2 }
 0x521   :  { %s4130_s21 = sld [smem:[#allocation69_spill]] }
 0x522   :  { %s2927_s23 = sadd.f32 %s940_s19, %s2859_s9 }
 0x523   :  { %s4131_s25 = sld [smem:[#allocation67_spill]] }
 0x524   :  { %s2930_s17 = sadd.f32 %s943_s22, %s2855_s8 }
 0x525   :  { %s4132_s13 = sld [smem:[#allocation51_spill]] }
 0x526   :  { %s945_s0 = sadd.f32 %s2912_s26, %s4107_s27 }
 0x527   :  { %s948_s11 = ssub.f32 %s2888_s3, %s4121_s6 }
 0x528   :  { %s4133_s14 = sld [smem:[#allocation64_spill]] }
 0x529   :  { %s946_s1 = ssub.f32 %s945_s0, %s4123_s15 }
 0x52a   :  { %s2938_s5 = sadd.f32 %s948_s11, %s2863_s24 }
 0x52b   :  { %s4134_s9 = sld [smem:[#allocation63_spill]] }
 0x52c   :  { %s2941_s20 = sadd.f32 %s946_s1, %s2875_s10  ;;  %s4137_s27 = smul.f32 %s2938_s5, %s2930_s17 }
 0x52d   :  { %s950_s8 = sadd.f32 %s2912_s26, %s4125_s18 }
 0x52e   :  { %s4135_s22 = sld [smem:[#allocation65_spill]] }
 0x52f   :  { %s953_s19 = sadd.f32 %s2912_s26, %s4126_s28 }
 0x530   :  { %s4136_s2 = sld [smem:[#allocation74_spill]] }
 0x531   :  { %s951_s30 = ssub.f32 %s950_s8, %s4128_s7 }
 0x532   :  { %s954_s0 = ssub.f32 %s953_s19, %s4129_s16 }
 0x533   :  { %s2958_s15 = sadd.f32 %s951_s30, %s4130_s21 }
 0x534   :  { %s2961_s10 = sadd.f32 %s954_s0, %s4131_s25 }
 0x535   :  { %s956_s1 = sadd.f32 %s2912_s26, %s4132_s13  ;;  %s1007_s0 = smul.f32 %s2958_s15, %s2918_s4 }
 0x536   :  { %s959_s6 = ssub.f32 %s2888_s3, %s4133_s14  ;;  %s2971_s19 = smul.f32 %s2961_s10, %s2958_s15 }
 0x537   :  { %s957_s21 = ssub.f32 %s956_s1, %s4134_s9  ;;  %s971_s30 = smul.f32 %s2961_s10, %s2938_s5 }
 0x538   :  { %s960_s24 = sadd.f32 %s959_s6, %s4135_s22  ;;  %s1003_s11 = smul.f32 %s2961_s10, %s2930_s17 }
 0x539   :  { %s958_s25 = sadd.f32 %s957_s21, %s4136_s2  ;;  %s1011_s18 = smul.f32 %s2961_s10, %s2927_s23 }
 0x53a   :  { %s961_s12 = smul.f32 %s960_s24, %s2938_s5 }
 0x53b   :  { %s962_s26 = smul.f32 %s958_s25, %s2958_s15 }
 0x53c   :  { %s2985_s3 = smul.f32 %s960_s24, %s2941_s20 }
 0x53d   :  { %s2987_s8 = ssub.f32 %s961_s12, %s962_s26  ;;  %s970_s1 = smul.f32 %s958_s25, %s2941_s20 }
 0x53e   :  { %s967_s6 = ssub.f32 %s2985_s3, %s2971_s19  ;;  %s992_s12 = smul.f32 %s958_s25, %s2930_s17 }
 0x53f   :  { %s964_s2 = smul.f32 %s2987_s8, %s2918_s4  ;;  %s2994_s22 = ssub.f32 %s970_s1, %s971_s30 }
 0x540   :  { %s968_s21 = smul.f32 %s967_s6, %s2927_s23 }
 0x541   :  { %s973_s14 = smul.f32 %s2994_s22, %s2930_s17 }
 0x542   :  { %s969_s16 = ssub.f32 %s964_s2, %s968_s21  ;;  %s993_s7 = smul.f32 %s960_s24, %s2927_s23 }
 0x543   :  { %s1002_s28 = smul.f32 %s960_s24, %s2918_s4 }
 0x544   :  { %s974_s26 = sadd.f32 %s973_s14, %s969_s16  ;;  %s1012_s1 = smul.f32 %s958_s25, %s2918_s4 }
 0x545   :  { %s3006_s30 = ssub.f32 %s992_s12, %s993_s7  ;;  %s4138_s13 = smul.f32 %s2958_s15, %s2927_s23 }
 0x546   :  { %v975_v20 = vstv %s974_s26  ;;  %s3017_s9 = ssub.f32 %s1002_s28, %s1003_s11  ;;  %s4139_s2 = smul.f32 %s2941_s20, %s2930_s17 }
 0x547   :  { %1819 = vrcp.f32 %v975_v20  ;;  %s3015_s6 = ssub.f32 %s4138_s13, %s4137_s27  ;;  %s4143_s24 = smul.f32 %s2941_s20, %s2927_s23  ;;  %v987_v24 = vand.u32 2147483648, %v975_v20  ;;  %v985_v26 = vand.u32 2147483647, %v975_v20  ;;  %vm981_vm10 = vweird.f32 %v975_v20 }
 0x548   :  { %s3022_s21 = ssub.f32 %s4139_s2, %s1007_s0  ;;  %s4144_s10 = smul.f32 %s2938_s5, %s2918_s4 }
 0x549   :  { %s3024_s29 = ssub.f32 %s1011_s18, %s1012_s1  ;;  %v988_v28 = vor.u32 1.1754944e-38, %v987_v24  ;;  %vm986_vm12 = vcmp.eq.f32.partialorder %v985_v26, 8.507059e+37  ;;  %v1826_v24 = vld [vmem:[#allocation11 + $0x80] sm:$0x1] }
 0x54a   :  { %s4141_s16 = sld [smem:[#allocation28_spill]] }
 0x54b   :  { %4140 = sst [smem:[#allocation69_spill]] %s3024_s29 }
 0x54c   :  { %s4142_s14 = sld [smem:[#allocation73_spill]] }
 0x54d   :  { %v1820_v21 = vpop.eup %1819  ;;  %s4145_s7 = sld [smem:[#allocation71_spill]] }
 0x54e   :  { %v977_v22 = vmul.f32 %v1820_v21, %v975_v20  ;;  %s4146_s12 = sld [smem:[#allocation29_spill]]  ;;  %vm982_vm8 = vweird.f32 %v1820_v21 }
 0x54f   :  { %s3032_s25 = ssub.f32 %s4144_s10, %s4143_s24  ;;  %vm983_vm11 = vmor %vm981_vm10, %vm982_vm8  ;;  %vm1354_vm8 = vcmp.eq.s32.totalorder %v3481_v54, 1  ;;  %vm1357_vm10 = vcmp.eq.s32.totalorder %v3481_v54, 2 }
 0x550   :  { %s4148_s27 = sld [smem:[#allocation26_spill]]  ;;  %v978_v23 = vsub.f32 1.0, %v977_v22 }
 0x551   :  { %4147 = sst [smem:[#allocation67_spill]] %s3032_s25 }
 0x552   :  { %s4149_s15 = sld [smem:[#allocation21_spill]]  ;;  %v979_v25 = vmul.f32 %v1820_v21, %v978_v23  ;;  %s902_s13 = smul.f32 %s4142_s14, %s4141_s16 }
 0x553   :  { %s4150_s17 = sld [smem:[#allocation23_spill]] }
 0x554   :  { %s4151_s18 = sld [smem:[#allocation24_spill]]  ;;  %v980_v27 = vadd.f32 %v1820_v21, %v979_v25  ;;  %s904_s20 = smul.f32 %s4146_s12, %s4145_s7 }
 0x555   :  { %s4152_s23 = sld [smem:[#allocation68_spill]] }
 0x556   :  { %s4153_s5 = sld [smem:[#allocation31_spill]]  ;;  %v984_v29 = vsel %vm983_vm11, %v1820_v21, %v980_v27  ;;  %s908_s11 = smul.f32 %s4148_s27, %s4142_s14  ;;  %vm1360_vm11 = vcmp.eq.s32.totalorder %v3481_v54, 3  ;;  %v1827_v27 = vld [vmem:[#allocation11 + $0x70] sm:$0x1] }
 0x557   :  { %s4154_s28 = sld [smem:[#allocation22_spill]]  ;;  %v989_v30 = vsel %vm986_vm12, %v988_v28, %v984_v29  ;;  %vm1363_vm12 = vcmp.eq.s32.totalorder %v3481_v54, 4 }
 0x558   :  { %s4155_s4 = sld [smem:[#allocation25_spill]]  ;;  %1770 = vpush %v989_v30  ;;  %s910_s0 = smul.f32 %s4149_s15, %s4145_s7 }
 0x559   :  { %s914_s26 = smul.f32 %s4150_s17, %s4142_s14  ;;  %s905_s2 = sadd.f32 %s904_s20, %s902_s13 }
 0x55a   :  { %s916_s1 = smul.f32 %s4151_s18, %s4145_s7  ;;  %s911_s24 = sadd.f32 %s910_s0, %s908_s11 }
 0x55b   :  { %s4156_s16 = sld [smem:[#allocation66_spill]] }
 0x55c   :  { %s906_s10 = smul.f32 %s4153_s5, %s4152_s23  ;;  %s917_s25 = sadd.f32 %s916_s1, %s914_s26 }
 0x55d   :  { %s912_s29 = smul.f32 %s4154_s28, %s4152_s23  ;;  %s4157_s27 = sld [smem:[#allocation69_spill]] }
 0x55e   :  { %s907_s12 = sadd.f32 %s906_s10, %s905_s2  ;;  %s918_s15 = smul.f32 %s4155_s4, %s4152_s23 }
 0x55f   :  { %s4158_s14 = sld [smem:[#allocation70_spill]] }
 0x560   :  { %s913_s17 = sadd.f32 %s912_s29, %s911_s24  ;;  %s923_s20 = smul.f32 2.0, %s907_s12 }
 0x561   :  { %s4159_s7 = sld [smem:[#allocation67_spill]] }
 0x562   :  { %s919_s18 = sadd.f32 %s918_s15, %s917_s25  ;;  %s928_s0 = smul.f32 2.0, %s913_s17 }
 0x563   :  { %s4160_s13 = sld [smem:[#allocation72_spill]] }
 0x564   :  { %s933_s11 = smul.f32 2.0, %s919_s18  ;;  %s4161_s2 = ssub.f32 %s2971_s19, %s2985_s3 }
 0x565   :  { %s924_s29 = ssub.f32 %s4156_s16, %s923_s20 }
 0x566   :  { %s4162_s15 = sld [smem:[#allocation73_spill]] }
 0x567   :  { %s929_s12 = ssub.f32 %s4158_s14, %s928_s0 }
 0x568   :  { %s4165_s19 = sld [smem:[#allocation50_spill]] }
 0x569   :  { %s934_s18 = ssub.f32 %s4160_s13, %s933_s11 }
 0x56a   :  { %s4167_s20 = sld [smem:[#allocation68_spill]] }
 0x589   :  { %s1771_s5 = spop %1770 }
 0x58a   :  { %s991_s1 = smul.f32 %s1771_s5, %s2987_s8  ;;  %s4163_s8 = sld [smem:[#allocation51_spill]] }
 0x58b   :  { %s995_s26 = smul.f32 %s1771_s5, %s3006_s30 }
 0x58c   :  { %s999_s28 = smul.f32 %s1771_s5, %s3015_s6  ;;  %s4164_s6 = sld [smem:[#allocation71_spill]] }
 0x58d   :  { %s1001_s10 = smul.f32 %s1771_s5, %s4161_s2 }
 0x58e   :  { %s1005_s4 = smul.f32 %s1771_s5, %s3017_s9 }
 0x58f   :  { %s1009_s23 = smul.f32 %s1771_s5, %s3022_s21  ;;  %s4166_s21 = sld [smem:[#allocation53_spill]] }
 0x590   :  { %s1010_s24 = smul.f32 %s1771_s5, %s2994_s22 }
 0x591   :  { %s1014_s25 = smul.f32 %s1771_s5, %s4157_s27 }
 0x592   :  { %s1018_s17 = smul.f32 %s1771_s5, %s4159_s7 }
 0x593   :  { %s1019_s30 = smul.f32 %s991_s1, %s924_s29 }
 0x594   :  { %s1021_s3 = smul.f32 %s995_s26, %s929_s12 }
 0x595   :  { %s1023_s2 = smul.f32 %s999_s28, %s934_s18 }
 0x596   :  { %s1022_s9 = sadd.f32 %s1021_s3, %s1019_s30  ;;  %s1025_s22 = smul.f32 %s1001_s10, %s924_s29 }
 0x597   :  { %s1027_s16 = smul.f32 %s1005_s4, %s929_s12  ;;  %s4173_s30 = sld [smem:[#allocation56_spill]] }
 0x598   :  { %s1024_s27 = sadd.f32 %s1023_s2, %s1022_s9  ;;  %s1029_s0 = smul.f32 %s1009_s23, %s934_s18 }
 0x599   :  { %s1028_s14 = sadd.f32 %s1027_s16, %s1025_s22  ;;  %s1031_s5 = smul.f32 %s1010_s24, %s924_s29 }
 0x59a   :  { %s1033_s7 = smul.f32 %s1014_s25, %s929_s12  ;;  %s3067_s13 = ssub.f32 %s4162_s15, %s1024_s27 }
 0x59b   :  { %s1030_s28 = sadd.f32 %s1029_s0, %s1028_s14  ;;  %s1035_s11 = smul.f32 %s1018_s17, %s934_s18 }
 0x59c   :  { %4168 = sst [smem:[#allocation65_spill]] %s3067_s13  ;;  %s1040_s4 = smul.f32 %s3067_s13, %s4163_s8 }
 0x59d   :  { %s1034_s1 = sadd.f32 %s1033_s7, %s1031_s5  ;;  %s3076_s23 = smul.f32 %s3067_s13, %s4165_s19 }
 0x59e   :  { %s3072_s26 = ssub.f32 %s4164_s6, %s1030_s28  ;;  %s3080_s24 = smul.f32 %s3067_s13, %s4166_s21 }
 0x59f   :  { %s1036_s10 = sadd.f32 %s1035_s11, %s1034_s1 }
 0x5a0   :  { %4169 = sst [smem:[#allocation74_spill]] %s3072_s26  ;;  %s3084_s29 = smul.f32 %s3072_s26, %s4166_s21 }
 0x5a1   :  { %s3087_s15 = ssub.f32 %s4167_s20, %s1036_s10  ;;  %s3091_s25 = smul.f32 %s3072_s26, %s4165_s19 }
 0x5a2   :  { %s1042_s12 = sadd.f32 %s3084_s29, %s1040_s4  ;;  %s3096_s17 = smul.f32 %s3072_s26, %s4163_s8 }
 0x5a3   :  { %4170 = sst [smem:[#allocation66_spill]] %s3087_s15  ;;  %s3100_s18 = smul.f32 %s3087_s15, %s4165_s19 }
 0x5a4   :  { %4171 = sst [smem:[#allocation69_spill]] %s3091_s25  ;;  %s3104_s6 = smul.f32 %s3087_s15, %s4166_s21 }
 0x5a5   :  { %4172 = sst [smem:[#allocation70_spill]] %s3100_s18  ;;  %s3113_s22 = smul.f32 %s3087_s15, %s4163_s8 }
 0x5a6   :  { %4174 = sst [smem:[#allocation67_spill]] %s3104_s6 }
 0x5a7   :  { %s1053_s3 = ssub.f32 %s3096_s17, %s3080_s24 }
 0x5a8   :  { %s3109_s2 = sadd.f32 %s3100_s18, %s1042_s12 }
 0x5a9   :  { %s4175_s9 = sld [smem:[#allocation52_spill]] }
 0x5aa   :  { %4176 = sst [smem:[#allocation72_spill]] %s3113_s22  ;;  %s1073_s14 = smul.f32 %s3109_s2, %s3067_s13 }
 0x5ab   :  { %s1047_s16 = ssub.f32 %s3104_s6, %s3091_s25  ;;  %s1078_s7 = smul.f32 %s3109_s2, %s3072_s26 }
 0x5ac   :  { %s4177_s20 = sld [smem:[#allocation58_spill]]  ;;  %s1083_s12 = smul.f32 %s3109_s2, %s3087_s15 }
 0x5ad   :  { %s1050_s27 = ssub.f32 %s3076_s23, %s3113_s22  ;;  %s3133_s25 = smul.f32 0.0, %s3109_s2 }
 0x5ae   :  { %s4178_s0 = sld [smem:[#allocation59_spill]] }
 0x5af   :  { %s1072_s5 = sadd.f32 %s1047_s16, %s4163_s8 }
 0x5b0   :  { %s1077_s28 = sadd.f32 %s1050_s27, %s4166_s21 }
 0x5b1   :  { %s4179_s11 = sld [smem:[#allocation57_spill]] }
 0x5b2   :  { %s3125_s1 = sadd.f32 %s1073_s14, %s1072_s5 }
 0x5b3   :  { %s4181_s10 = sld [smem:[#allocation60_spill]] }
 0x5b4   :  { %4180 = sst [smem:[#allocation73_spill]] %s3125_s1 }
 0x5b5   :  { %s3129_s18 = sadd.f32 %s1078_s7, %s1077_s28 }
 0x5b6   :  { %s1082_s6 = sadd.f32 %s1053_s3, %s4165_s19 }
 0x5b7   :  { %4182 = sst [smem:[#allocation71_spill]] %s3129_s18 }
 0x5b8   :  { %s4183_s22 = sld [smem:[#allocation54_spill]] }
 0x5b9   :  { %s1088_s16 = ssub.f32 %s3109_s2, %s4173_s30 }
 0x5ba   :  { %s4184_s27 = sld [smem:[#allocation55_spill]] }
 0x5bb   :  { %s3137_s26 = sadd.f32 %s1083_s12, %s1082_s6 }
 0x5bc   :  { %s3139_s14 = sadd.f32 %s1088_s16, %s1040_s4 }
 0x5bd   :  { %4185 = sst [smem:[#allocation50_spill]] %s3137_s26 }
 0x5be   :  { %s4186_s5 = sld [smem:[#allocation61_spill]] }
 0x5bf   :  { %s1091_s1 = sadd.f32 %s3133_s25, %s4175_s9 }
 0x5c0   :  { %s1094_s7 = sadd.f32 %s3133_s25, %s4166_s21 }
 0x5c1   :  { %s4187_s28 = sld [smem:[#allocation62_spill]] }
 0x5c2   :  { %s1092_s3 = ssub.f32 %s1091_s1, %s4177_s20 }
 0x5c3   :  { %s1095_s18 = ssub.f32 %s1094_s7, %s4178_s0 }
 0x5c4   :  { %s4188_s15 = sld [smem:[#allocation69_spill]] }
 0x5c5   :  { %s3148_s13 = sadd.f32 %s1092_s3, %s3080_s24 }
 0x5c6   :  { %s4189_s8 = sld [smem:[#allocation72_spill]] }
 0x5c7   :  { %s3151_s30 = sadd.f32 %s1095_s18, %s3076_s23 }
 0x5c8   :  { %s4190_s6 = sld [smem:[#allocation51_spill]] }
 0x5c9   :  { %s1097_s4 = sadd.f32 %s3133_s25, %s4165_s19 }
 0x5ca   :  { %s1100_s12 = ssub.f32 %s3109_s2, %s4179_s11 }
 0x5cb   :  { %s4191_s9 = sld [smem:[#allocation64_spill]] }
 0x5cc   :  { %s1098_s21 = ssub.f32 %s1097_s4, %s4181_s10 }
 0x5cd   :  { %s3159_s16 = sadd.f32 %s1100_s12, %s3084_s29 }
 0x5ce   :  { %s4192_s24 = sld [smem:[#allocation63_spill]] }
 0x5cf   :  { %s3162_s20 = sadd.f32 %s1098_s21, %s3096_s17  ;;  %s1149_s0 = smul.f32 %s3159_s16, %s3151_s30 }
 0x5d0   :  { %s1102_s23 = sadd.f32 %s3133_s25, %s4183_s22 }
 0x5d1   :  { %s4193_s18 = sld [smem:[#allocation70_spill]] }
 0x5d2   :  { %s1105_s19 = sadd.f32 %s3133_s25, %s4184_s27 }
 0x5d3   :  { %s4194_s1 = sld [smem:[#allocation67_spill]] }
 0x5d4   :  { %s1103_s7 = ssub.f32 %s1102_s23, %s4186_s5 }
 0x5d5   :  { %s1106_s10 = ssub.f32 %s1105_s19, %s4187_s28 }
 0x5d6   :  { %s3179_s4 = sadd.f32 %s1103_s7, %s4188_s15 }
 0x5d7   :  { %s3182_s17 = sadd.f32 %s1106_s10, %s4189_s8 }
 0x5d8   :  { %s1108_s22 = sadd.f32 %s3133_s25, %s4190_s6  ;;  %s1148_s27 = smul.f32 %s3179_s4, %s3148_s13 }
 0x5d9   :  { %s1111_s5 = ssub.f32 %s3109_s2, %s4191_s9  ;;  %s3192_s28 = smul.f32 %s3182_s17, %s3179_s4 }
 0x5da   :  { %s1109_s15 = ssub.f32 %s1108_s22, %s4192_s24  ;;  %s1123_s12 = smul.f32 %s3182_s17, %s3159_s16 }
 0x5db   :  { %s1112_s21 = sadd.f32 %s1111_s5, %s4193_s18  ;;  %s1155_s23 = smul.f32 %s3182_s17, %s3151_s30 }
 0x5dc   :  { %s1110_s8 = sadd.f32 %s1109_s15, %s4194_s1  ;;  %s1159_s19 = smul.f32 %s3179_s4, %s3139_s14 }
 0x5dd   :  { %s1113_s7 = smul.f32 %s1112_s21, %s3159_s16 }
 0x5de   :  { %s1114_s25 = smul.f32 %s1110_s8, %s3179_s4 }
 0x5df   :  { %s3206_s2 = smul.f32 %s1112_s21, %s3162_s20 }
 0x5e0   :  { %s3208_s6 = ssub.f32 %s1113_s7, %s1114_s25  ;;  %s1122_s9 = smul.f32 %s1110_s8, %s3162_s20 }
 0x5e1   :  { %s1119_s24 = ssub.f32 %s3206_s2, %s3192_s28  ;;  %s1144_s7 = smul.f32 %s1110_s8, %s3151_s30 }
 0x5e2   :  { %s1116_s18 = smul.f32 %s3208_s6, %s3139_s14  ;;  %s3215_s1 = ssub.f32 %s1122_s9, %s1123_s12 }
 0x5e3   :  { %s1120_s10 = smul.f32 %s1119_s24, %s3148_s13  ;;  %s3236_s24 = ssub.f32 %s1148_s27, %s1149_s0 }
 0x5e4   :  { %s1125_s5 = smul.f32 %s3215_s1, %s3151_s30  ;;  %s4204_s0 = sld [smem:[#allocation26_spill]] }
 0x5e5   :  { %s1121_s15 = ssub.f32 %s1116_s18, %s1120_s10  ;;  %s1145_s29 = smul.f32 %s1112_s21, %s3148_s13 }
 0x5e6   :  { %s1154_s3 = smul.f32 %s1112_s21, %s3139_s14  ;;  %s4198_s21 = sld [smem:[#allocation65_spill]] }
 0x5e7   :  { %s1126_s25 = sadd.f32 %s1125_s5, %s1121_s15  ;;  %s1163_s11 = smul.f32 %s3182_s17, %s3148_s13 }
 0x5e8   :  { %s3227_s12 = ssub.f32 %s1144_s7, %s1145_s29  ;;  %s1164_s9 = smul.f32 %s1110_s8, %s3139_s14 }
 0x5e9   :  { %v1127_v31 = vstv %s1126_s25  ;;  %s3238_s22 = ssub.f32 %s1154_s3, %s1155_s23  ;;  %s4195_s18 = smul.f32 %s3162_s20, %s3151_s30 }
 0x5ea   :  { %1821 = vrcp.f32 %v1127_v31  ;;  %s3245_s26 = ssub.f32 %s1163_s11, %s1164_s9  ;;  %s4199_s17 = smul.f32 %s3162_s20, %s3148_s13  ;;  %v1139_v35 = vand.u32 2147483648, %v1127_v31  ;;  %v1137_v37 = vand.u32 2147483647, %v1127_v31  ;;  %vm1133_vm14 = vweird.f32 %v1127_v31 }
 0x5eb   :  { %s3243_s10 = ssub.f32 %s4195_s18, %s1159_s19  ;;  %s4200_s15 = smul.f32 %s3159_s16, %s3139_s14 }
 0x5ec   :  { %4196 = sst [smem:[#allocation53_spill]] %s3245_s26  ;;  %v1140_v39 = vor.u32 1.1754944e-38, %v1139_v35  ;;  %vm1138_vm2 = vcmp.eq.f32.partialorder %v1137_v37, 8.507059e+37  ;;  %s1060_s23 = smul.f32 %s4204_s0, %s4198_s21 }
 0x5ed   :  { %s4197_s5 = sld [smem:[#allocation28_spill]] }
 0x5ee   :  { %s4201_s29 = sld [smem:[#allocation74_spill]] }
 0x5ef   :  { %s4202_s7 = sld [smem:[#allocation29_spill]] }
 0x5f0   :  { %v1822_v32 = vpop.eup %1821  ;;  %s3253_s8 = ssub.f32 %s4200_s15, %s4199_s17 }
 0x5f1   :  { %v1129_v33 = vmul.f32 %v1822_v32, %v1127_v31  ;;  %s4205_s3 = sld [smem:[#allocation21_spill]]  ;;  %vm1134_vm13 = vweird.f32 %v1822_v32 }
 0x5f2   :  { %4203 = sst [smem:[#allocation68_spill]] %s3253_s8  ;;  %vm1135_vm15 = vmor %vm1133_vm14, %vm1134_vm13  ;;  %vm1366_vm13 = vcmp.eq.s32.totalorder %v3481_v54, 5  ;;  %vm1369_vm14 = vcmp.eq.s32.totalorder %v3481_v54, 6 }
 0x5f3   :  { %v1130_v34 = vsub.f32 1.0, %v1129_v33  ;;  %s4206_s30 = sld [smem:[#allocation23_spill]]  ;;  %s1054_s4 = smul.f32 %s4198_s21, %s4197_s5 }
 0x5f4   :  { %s4207_s11 = sld [smem:[#allocation24_spill]] }
 0x5f5   :  { %v1131_v36 = vmul.f32 %v1822_v32, %v1130_v34  ;;  %s4208_s13 = sld [smem:[#allocation66_spill]]  ;;  %s1056_s27 = smul.f32 %s4202_s7, %s4201_s29 }
 0x5f6   :  { %s4209_s14 = sld [smem:[#allocation31_spill]] }
 0x5f7   :  { %v1132_v38 = vadd.f32 %v1822_v32, %v1131_v36  ;;  %s4210_s16 = sld [smem:[#allocation22_spill]]  ;;  %s1062_s19 = smul.f32 %s4205_s3, %s4201_s29 }
 0x5f8   :  { %s4211_s20 = sld [smem:[#allocation25_spill]] }
 0x5f9   :  { %v1136_v40 = vsel %vm1135_vm15, %v1822_v32, %v1132_v38  ;;  %s1066_s25 = smul.f32 %s4206_s30, %s4198_s21  ;;  %s1057_s18 = sadd.f32 %s1056_s27, %s1054_s4  ;;  %vm1372_vm15 = vcmp.eq.s32.totalorder %v3481_v54, 7 }
 0x5fa   :  { %v1141_v41 = vsel %vm1138_vm2, %v1140_v39, %v1136_v40  ;;  %s1068_s9 = smul.f32 %s4207_s11, %s4201_s29  ;;  %s1063_s17 = sadd.f32 %s1062_s19, %s1060_s23  ;;  %vm1375_vm2 = vcmp.eq.s32.totalorder %v3481_v54, 8 }
 0x5fb   :  { %1772 = vpush %v1141_v41  ;;  %s4212_s5 = sld [smem:[#allocation73_spill]] }
 0x5fc   :  { %s1058_s15 = smul.f32 %s4209_s14, %s4208_s13  ;;  %s1069_s8 = sadd.f32 %s1068_s9, %s1066_s25 }
 0x5fd   :  { %s1064_s26 = smul.f32 %s4210_s16, %s4208_s13  ;;  %s4213_s0 = sld [smem:[#allocation53_spill]] }
 0x5fe   :  { %s1059_s7 = sadd.f32 %s1058_s15, %s1057_s18  ;;  %s1070_s3 = smul.f32 %s4211_s20, %s4208_s13 }
 0x5ff   :  { %s4214_s21 = sld [smem:[#allocation71_spill]] }
 0x600   :  { %s1065_s30 = sadd.f32 %s1064_s26, %s1063_s17  ;;  %s1075_s27 = smul.f32 2.0, %s1059_s7 }
 0x601   :  { %s4215_s11 = sld [smem:[#allocation68_spill]] }
 0x602   :  { %s1071_s29 = sadd.f32 %s1070_s3, %s1069_s8  ;;  %s1080_s19 = smul.f32 2.0, %s1065_s30 }
 0x603   :  { %s4216_s4 = sld [smem:[#allocation50_spill]] }
 0x604   :  { %s1085_s23 = smul.f32 2.0, %s1071_s29  ;;  %s4217_s15 = ssub.f32 %s3192_s28, %s3206_s2 }
 0x605   :  { %s1076_s26 = ssub.f32 %s4212_s5, %s1075_s27 }
 0x606   :  { %s4218_s3 = sld [smem:[#allocation65_spill]] }
 0x607   :  { %s1081_s7 = ssub.f32 %s4214_s21, %s1080_s19 }
 0x608   :  { %s4220_s28 = sld [smem:[#allocation66_spill]] }
 0x609   :  { %s1086_s29 = ssub.f32 %s4216_s4, %s1085_s23 }
 0x62c   :  { %s1773_s14 = spop %1772 }
 0x62d   :  { %s1143_s9 = smul.f32 %s1773_s14, %s3208_s6  ;;  %s4219_s6 = sld [smem:[#allocation74_spill]] }
 0x62e   :  { %s1147_s25 = smul.f32 %s1773_s14, %s3227_s12 }
 0x62f   :  { %s1151_s16 = smul.f32 %s1773_s14, %s3236_s24 }
 0x630   :  { %s1153_s18 = smul.f32 %s1773_s14, %s4217_s15 }
 0x631   :  { %s1157_s13 = smul.f32 %s1773_s14, %s3238_s22 }
 0x632   :  { %s1161_s20 = smul.f32 %s1773_s14, %s3243_s10 }
 0x633   :  { %s1162_s17 = smul.f32 %s1773_s14, %s3215_s1 }
 0x634   :  { %s1166_s8 = smul.f32 %s1773_s14, %s4213_s0 }
 0x635   :  { %s1170_s30 = smul.f32 %s1773_s14, %s4215_s11 }
 0x636   :  { %s1171_s12 = smul.f32 %s1143_s9, %s1076_s26 }
 0x637   :  { %s1173_s24 = smul.f32 %s1147_s25, %s1081_s7 }
 0x638   :  { %s1175_s2 = smul.f32 %s1151_s16, %s1086_s29 }
 0x639   :  { %s1174_s15 = sadd.f32 %s1173_s24, %s1171_s12  ;;  %s1177_s22 = smul.f32 %s1153_s18, %s1076_s26 }
 0x63a   :  { %s1179_s10 = smul.f32 %s1157_s13, %s1081_s7 }
 0x63b   :  { %s1176_s1 = sadd.f32 %s1175_s2, %s1174_s15  ;;  %s1181_s5 = smul.f32 %s1161_s20, %s1086_s29 }
 0x63c   :  { %s1180_s27 = sadd.f32 %s1179_s10, %s1177_s22  ;;  %s1183_s0 = smul.f32 %s1162_s17, %s1076_s26 }
 0x63d   :  { %s1185_s19 = smul.f32 %s1166_s8, %s1081_s7  ;;  %s3288_s21 = ssub.f32 %s4218_s3, %s1176_s1 }
 0x63e   :  { %s1182_s11 = sadd.f32 %s1181_s5, %s1180_s27  ;;  %s1187_s14 = smul.f32 %s1170_s30, %s1086_s29 }
 0x63f   :  { %s1186_s4 = sadd.f32 %s1185_s19, %s1183_s0 }
 0x640   :  { %s3291_s23 = ssub.f32 %s4219_s6, %s1182_s11 }
 0x641   :  { %s1188_s9 = sadd.f32 %s1187_s14, %s1186_s4 }
 0x642   :  { %s3294_s16 = ssub.f32 0.0, %s3288_s21 }
 0x643   :  { %s3297_s13 = ssub.f32 %s4220_s28, %s1188_s9 }
 0x644   :  { %s3300_s20 = ssub.f32 0.0, %s3291_s23 }
 0x645   :  { %s3303_s25 = ssub.f32 0.0, %s3297_s13 }
 0x646   :  { %s3306_s18 = ssub.f32 0.0, %s3294_s16  ;;  %s1231_s10 = smul.f32 %s3300_s20, %s3294_s16 }
 0x647   :  { %s3309_s17 = ssub.f32 0.0, %s3303_s25  ;;  %s1210_s26 = smul.f32 %s3294_s16, %s3303_s25 }
 0x648   :  { %s3314_s3 = ssub.f32 0.0, %s3300_s20  ;;  %s1204_s8 = smul.f32 %s3306_s18, %s3294_s16 }
 0x649   :  { %s1234_s7 = smul.f32 %s3306_s18, %s3309_s17  ;;  %s1232_s5 = ssub.f32 %s1231_s10, %s3309_s17 }
 0x64a   :  { %s3322_s30 = smul.f32 %s3314_s3, %s3306_s18  ;;  %s3325_s29 = ssub.f32 %s1210_s26, %s3314_s3 }
 0x64b   :  { %s3329_s12 = ssub.f32 1.0, %s1204_s8  ;;  %s1246_s2 = smul.f32 %s3314_s3, %s3309_s17 }
 0x64c   :  { %s1207_s6 = ssub.f32 %s3303_s25, %s3322_s30  ;;  %s1212_s15 = smul.f32 %s3325_s29, %s3300_s20 }
 0x64d   :  { %s1239_s1 = smul.f32 %s3314_s3, %s3300_s20  ;;  %s1235_s14 = ssub.f32 %s1234_s7, %s3300_s20 }
 0x64e   :  { %s1208_s24 = smul.f32 %s1207_s6, %s3309_s17  ;;  %s1237_s4 = ssub.f32 %s3322_s30, %s3303_s25 }
 0x64f   :  { %s1242_s27 = smul.f32 %s3300_s20, %s3303_s25  ;;  %s1240_s8 = ssub.f32 1.0, %s1239_s1 }
 0x650   :  { %s1209_s28 = ssub.f32 %s3329_s12, %s1208_s24  ;;  %s1249_s19 = smul.f32 %s3309_s17, %s3303_s25 }
 0x651   :  { %s1247_s30 = ssub.f32 %s1246_s2, %s3294_s16 }
 0x652   :  { %s1213_s22 = sadd.f32 %s1212_s15, %s1209_s28 }
 0x653   :  { %s1250_s15 = ssub.f32 1.0, %s1249_s19 }
 0x654   :  { %v1214_v42 = vstv %s1213_s22 }
 0x655   :  { %1823 = vrcp.f32 %v1214_v42  ;;  %v1226_v46 = vand.u32 2147483648, %v1214_v42  ;;  %v1224_v48 = vand.u32 2147483647, %v1214_v42  ;;  %vm1220_vm4 = vweird.f32 %v1214_v42 }
 0x657   :  { %v1227_v50 = vor.u32 1.1754944e-38, %v1226_v46  ;;  %vm1225_vm6 = vcmp.eq.f32.partialorder %v1224_v48, 8.507059e+37 }
 0x65b   :  { %v1824_v43 = vpop.eup %1823 }
 0x65c   :  { %v1216_v44 = vmul.f32 %v1824_v43, %v1214_v42  ;;  %vm1221_vm3 = vweird.f32 %v1824_v43 }
 0x65d   :  { %vm1222_vm5 = vmor %vm1220_vm4, %vm1221_vm3 }
 0x65e   :  { %v1217_v45 = vsub.f32 1.0, %v1216_v44 }
 0x660   :  { %v1218_v47 = vmul.f32 %v1824_v43, %v1217_v45 }
 0x662   :  { %v1219_v49 = vadd.f32 %v1824_v43, %v1218_v47 }
 0x664   :  { %v1223_v51 = vsel %vm1222_vm5, %v1824_v43, %v1219_v49 }
 0x665   :  { %v1228_v52 = vsel %vm1225_vm6, %v1227_v50, %v1223_v51 }
 0x666   :  { %1774 = vpush %v1228_v52 }
 0x697   :  { %s1775_s0 = spop %1774 }
 0x698   :  { %s3347_s11 = smul.f32 %s1775_s0, %s3329_s12  ;;  %s1243_s12 = ssub.f32 %s1242_s27, %s3306_s18 }
 0x699   :  { %s3355_s9 = smul.f32 %s1775_s0, %s1232_s5 }
 0x69a   :  { %s3357_s26 = smul.f32 %s1775_s0, %s1235_s14 }
 0x69b   :  { %s3359_s6 = smul.f32 %s1775_s0, %s1237_s4 }
 0x69c   :  { %s3362_s24 = smul.f32 %s1775_s0, %s1240_s8 }
 0x69d   :  { %s3364_s7 = smul.f32 %s1775_s0, %s1243_s12 }
 0x69e   :  { %s3371_s28 = smul.f32 %s1775_s0, %s3325_s29 }
 0x69f   :  { %s3373_s18 = smul.f32 %s1775_s0, %s1247_s30 }
 0x6a0   :  { %s3375_s22 = smul.f32 %s1775_s0, %s1250_s15 }
 0x6a1   :  { %s1253_s17 = smul.f32 %s3359_s6, %s3303_s25 }
 0x6a2   :  { %s1255_s3 = smul.f32 %s3371_s28, %s3291_s23 }
 0x6a3   :  { %s1258_s29 = smul.f32 %s3362_s24, %s3303_s25  ;;  %s1254_s10 = sadd.f32 %s1253_s17, %s3347_s11 }
 0x6a4   :  { %s1260_s2 = smul.f32 %s3373_s18, %s3291_s23  ;;  %s4223_s17 = sld [smem:[#allocation36_spill]] }
 0x6a5   :  { %s1263_s1 = smul.f32 %s3364_s7, %s3303_s25  ;;  %s1259_s5 = sadd.f32 %s1258_s29, %s3355_s9 }
 0x6a6   :  { %s1265_s27 = smul.f32 %s3375_s22, %s3291_s23  ;;  %s3408_s29 = sadd.f32 %s1255_s3, %s1254_s10 }
 0x6a7   :  { %s1264_s0 = sadd.f32 %s1263_s1, %s3357_s26  ;;  %s1267_s19 = smul.f32 %s3347_s11, %s3297_s13 }
 0x6a8   :  { %s3394_s14 = sadd.f32 %s1260_s2, %s1259_s5  ;;  %s1270_s4 = smul.f32 %s3371_s28, %s3294_s16 }
 0x6a9   :  { %s3398_s8 = sadd.f32 %s1265_s27, %s1264_s0  ;;  %s1272_s12 = smul.f32 %s3355_s9, %s3297_s13 }
 0x6aa   :  { %4221 = sst [smem:[#allocation56_spill]] %s3394_s14  ;;  %s1275_s30 = smul.f32 %s3373_s18, %s3294_s16 }
 0x6ab   :  { %4222 = sst [smem:[#allocation52_spill]] %s3398_s8  ;;  %s1277_s15 = smul.f32 %s3357_s26, %s3297_s13 }
 0x6ac   :  { %s1269_s25 = sadd.f32 %s1267_s19, %s3359_s6  ;;  %s1280_s2 = smul.f32 %s3375_s22, %s3294_s16 }
 0x6ad   :  { %s1274_s23 = sadd.f32 %s1272_s12, %s3362_s24  ;;  %s1282_s27 = smul.f32 %s3347_s11, %s3300_s20 }
 0x6ae   :  { %s4224_s1 = sld [smem:[#allocation34_spill]]  ;;  %s1284_s14 = smul.f32 %s3359_s6, %s3288_s21 }
 0x6af   :  { %s3412_s5 = sadd.f32 %s1275_s30, %s1274_s23  ;;  %s1287_s13 = smul.f32 %s3355_s9, %s3300_s20 }
 0x6b0   :  { %s4225_s0 = sld [smem:[#allocation35_spill]]  ;;  %s1289_s10 = smul.f32 %s3362_s24, %s3288_s21 }
 0x6b1   :  { %s1279_s8 = sadd.f32 %s1277_s15, %s3364_s7  ;;  %s1292_s30 = smul.f32 %s3357_s26, %s3300_s20 }
 0x6b2   :  { %s4226_s19 = sld [smem:[#allocation56_spill]]  ;;  %s1294_s6 = smul.f32 %s3364_s7, %s3288_s21 }
 0x6b3   :  { %s3419_s12 = sadd.f32 %s1270_s4, %s1269_s25  ;;  %s1297_s4 = smul.f32 %s3408_s29, %s4223_s17 }
 0x6b4   :  { %s3423_s3 = sadd.f32 %s1280_s2, %s1279_s8  ;;  %s1305_s7 = smul.f32 %s4224_s1, %s3412_s5 }
 0x6b5   :  { %s1285_s16 = sadd.f32 %s1284_s14, %s1282_s27  ;;  %s1299_s8 = smul.f32 %s4224_s1, %s3419_s12 }
 0x6b6   :  { %s4227_s11 = sld [smem:[#allocation52_spill]] }
 0x6b7   :  { %s1290_s23 = sadd.f32 %s1289_s10, %s1287_s13 }
 0x6b8   :  { %s3432_s15 = sadd.f32 %s1285_s16, %s3371_s28  ;;  %s1303_s2 = smul.f32 %s4226_s19, %s4223_s17 }
 0x6b9   :  { %s3437_s9 = sadd.f32 %s1290_s23, %s3373_s18  ;;  %s1311_s16 = smul.f32 %s4224_s1, %s3423_s3 }
 0x6ba   :  { %s4228_s24 = sld [smem:[#allocation40_spill]]  ;;  %s1301_s26 = smul.f32 %s4225_s0, %s3432_s15 }
 0x6bb   :  { %s1295_s25 = sadd.f32 %s1294_s6, %s1292_s30  ;;  %s1307_s18 = smul.f32 %s4225_s0, %s3437_s9 }
 0x6bc   :  { %s4229_s20 = sld [smem:[#allocation38_spill]]  ;;  %s1309_s10 = smul.f32 %s4227_s11, %s4223_s17 }
 0x6bd   :  { %s1300_s14 = sadd.f32 %s1299_s8, %s1297_s4 }
 0x6be   :  { %s3446_s27 = sadd.f32 %s1295_s25, %s3375_s22 }
 0x6bf   :  { %s4230_s21 = sld [smem:[#allocation39_spill]] }
 0x6c0   :  { %s3450_s28 = sadd.f32 %s1301_s26, %s1300_s14  ;;  %s1313_s30 = smul.f32 %s4225_s0, %s3446_s27 }
 0x6c1   :  { %s1306_s13 = sadd.f32 %s1305_s7, %s1303_s2  ;;  %s1315_s6 = smul.f32 %s4228_s24, %s3408_s29 }
 0x6c2   :  { %4231 = sst [smem:[#allocation58_spill]] %s3450_s28  ;;  %s1317_s4 = smul.f32 %s4229_s20, %s3419_s12  ;;  %v1352_v55 = vstv %s3450_s28 }
 0x6c3   :  { %1628 = sst [smem:[#allocation12]] %s3450_s28  ;;  %s1321_s26 = smul.f32 %s4228_s24, %s4226_s19  ;;  %v1353_v61 = vsel %vm1351_vm7, %v1352_v55, 0.0 }
 0x6c4   :  { %s3459_s22 = sadd.f32 %s1307_s18, %s1306_s13  ;;  %s1323_s14 = smul.f32 %s4229_s20, %s3412_s5 }
 0x6c5   :  { %s1312_s23 = sadd.f32 %s1311_s16, %s1309_s10  ;;  %s1319_s8 = smul.f32 %s4230_s21, %s3432_s15 }
 0x6c6   :  { %4232 = sst [smem:[#allocation59_spill]] %s3459_s22  ;;  %s1325_s7 = smul.f32 %s4230_s21, %s3437_s9  ;;  %v1355_v56 = vstv %s3459_s22 }
 0x6c7   :  { %1630 = sst [smem:[#allocation12 + $0x1]] %s3459_s22  ;;  %s1327_s10 = smul.f32 %s4228_s24, %s4227_s11  ;;  %v1356_v62 = vsel %vm1354_vm8, %v1355_v56, 0.0 }
 0x6c8   :  { %s3468_s17 = sadd.f32 %s1313_s30, %s1312_s23  ;;  %s1329_s16 = smul.f32 %s4229_s20, %s3423_s3  ;;  %v1378_v4 = vadd.f32 %v1356_v62, %v1353_v61 }
 0x6c9   :  { %s4234_s1 = sld [smem:[#allocation44_spill]]  ;;  %s1331_s23 = smul.f32 %s4230_s21, %s3446_s27 }
 0x6ca   :  { %4233 = sst [smem:[#allocation57_spill]] %s3468_s17  ;;  %v1358_v57 = vstv %s3468_s17 }
 0x6cb   :  { %s4235_s25 = sld [smem:[#allocation41_spill]]  ;;  %v1359_v63 = vsel %vm1357_vm10, %v1358_v57, 0.0 }
 0x6cc   :  { %s1318_s0 = sadd.f32 %s1317_s4, %s1315_s6 }
 0x6cd   :  { %1632 = sst [smem:[#allocation12 + $0x2]] %s3468_s17 }
 0x6ce   :  { %s3477_s2 = sadd.f32 %s1319_s8, %s1318_s0 }
 0x6cf   :  { %s4237_s18 = sld [smem:[#allocation43_spill]]  ;;  %s1333_s4 = smul.f32 %s4234_s1, %s3408_s29 }
 0x6d0   :  { %4236 = sst [smem:[#allocation60_spill]] %s3477_s2  ;;  %v1361_v58 = vstv %s3477_s2  ;;  %s1339_s0 = smul.f32 %s4234_s1, %s4226_s19 }
 0x6d1   :  { %s1324_s13 = sadd.f32 %s1323_s14, %s1321_s26  ;;  %s1335_s8 = smul.f32 %s4235_s25, %s3419_s12  ;;  %v1362_v0 = vsel %vm1360_vm11, %v1361_v58, 0.0 }
 0x6d2   :  { %1636 = sst [smem:[#allocation12 + $0x80]] %s3477_s2  ;;  %s1341_s26 = smul.f32 %s4235_s25, %s3412_s5  ;;  %v1379_v5 = vadd.f32 %v1362_v0, %v1359_v63 }
 0x6d3   :  { %s3488_s30 = sadd.f32 %s1325_s7, %s1324_s13 }
 0x6d4   :  { %s1330_s6 = sadd.f32 %s1329_s16, %s1327_s10  ;;  %s1345_s16 = smul.f32 %s4234_s1, %s4227_s11  ;;  %v1382_v11 = vadd.f32 %v1379_v5, %v1378_v4 }
 0x6d5   :  { %4238 = sst [smem:[#allocation54_spill]] %s3488_s30  ;;  %s1337_s20 = smul.f32 %s4237_s18, %s3432_s15  ;;  %v1364_v59 = vstv %s3488_s30 }
 0x6d6   :  { %1638 = sst [smem:[#allocation12 + $0x81]] %s3488_s30  ;;  %s1343_s7 = smul.f32 %s4237_s18, %s3437_s9  ;;  %v1365_v1 = vsel %vm1363_vm12, %v1364_v59, 0.0 }
 0x6d7   :  { %s3501_s24 = sadd.f32 %s1331_s23, %s1330_s6  ;;  %s1347_s6 = smul.f32 %s4235_s25, %s3423_s3 }
 0x6d8   :  { %s1336_s21 = sadd.f32 %s1335_s8, %s1333_s4 }
 0x6d9   :  { %4239 = sst [smem:[#allocation55_spill]] %s3501_s24  ;;  %v1367_v60 = vstv %s3501_s24 }
 0x6da   :  { %1640 = sst [smem:[#allocation12 + $0x82]] %s3501_s24  ;;  %v1368_v2 = vsel %vm1366_vm13, %v1367_v60, 0.0 }
 0x6db   :  { %s3518_s14 = sadd.f32 %s1337_s20, %s1336_s21  ;;  %s1349_s20 = smul.f32 %s4237_s18, %s3446_s27  ;;  %v1380_v8 = vadd.f32 %v1368_v2, %v1365_v1 }
 0x6dc   :  { %s4241_s13 = sld [smem:[#allocation45_spill]] }
 0x6dd   :  { %4240 = sst [smem:[#allocation61_spill]] %s3518_s14  ;;  %v1370_v3 = vstv %s3518_s14 }
 0x6de   :  { %s1342_s10 = sadd.f32 %s1341_s26, %s1339_s0  ;;  %v1371_v6 = vsel %vm1369_vm14, %v1370_v3, 0.0 }
 0x6df   :  { %s4242_s23 = sld [smem:[#allocation46_spill]] }
 0x6e0   :  { %s4243_s4 = sld [smem:[#allocation42_spill]] }
 0x6e1   :  { %1644 = sst [smem:[#allocation12 + $0x100]] %s3518_s14 }
 0x6e2   :  { %s3537_s8 = sadd.f32 %s1343_s7, %s1342_s10  ;;  %s1571_s0 = smul.f32 %s4227_s11, %s4241_s13 }
 0x6e3   :  { %s4245_s21 = sld [smem:[#allocation48_spill]]  ;;  %s1559_s30 = smul.f32 %s3408_s29, %s4241_s13 }
 0x6e4   :  { %4244 = sst [smem:[#allocation62_spill]] %s3537_s8  ;;  %v1373_v7 = vstv %s3537_s8 }
 0x6e5   :  { %s4246_s1 = sld [smem:[#allocation49_spill]]  ;;  %s1573_s7 = smul.f32 %s3423_s3, %s4242_s23  ;;  %v1374_v9 = vsel %vm1372_vm15, %v1373_v7, 0.0 }
 0x6e6   :  { %s1348_s25 = sadd.f32 %s1347_s6, %s1345_s16  ;;  %s1575_s10 = smul.f32 %s3446_s27, %s4243_s4  ;;  %v1381_v10 = vadd.f32 %v1374_v9, %v1371_v6 }
 0x6e7   :  { %s4247_s26 = sld [smem:[#allocation47_spill]] }
 0x6e8   :  { %1646 = sst [smem:[#allocation12 + $0x101]] %s3537_s8  ;;  %v1383_v13 = vadd.f32 %v1381_v10, %v1380_v8 }
 0x6e9   :  { %s3548_s18 = sadd.f32 %s1349_s20, %s1348_s25  ;;  %s1589_s6 = smul.f32 %s4227_s11, %s4245_s21 }
 0x6ea   :  { %s1574_s16 = sadd.f32 %s1573_s7, %s1571_s0  ;;  %v1384_v14 = vadd.f32 %v1383_v13, %v1382_v11  ;;  %s1561_s11 = smul.f32 %s3419_s12, %s4242_s23 }
 0x6eb   :  { %4248 = sst [smem:[#allocation69_spill]] %s3548_s18  ;;  %s1591_s8 = smul.f32 %s3423_s3, %s4246_s1  ;;  %v1376_v12 = vstv %s3548_s18 }
 0x6ec   :  { %1648 = sst [smem:[#allocation12 + $0x102]] %s3548_s18  ;;  %v1377_v15 = vsel %vm1375_vm2, %v1376_v12, 0.0  ;;  %s1563_s0 = smul.f32 %s3432_s15, %s4243_s4 }
 0x6ed   :  { %s1576_s20 = sadd.f32 %s1575_s10, %s1574_s16  ;;  %s1593_s25 = smul.f32 %s3446_s27, %s4247_s26  ;;  %v1385_v16 = vadd.f32 %v1384_v14, %v1377_v15 }
 0x6ee   :  { %s1592_s14 = sadd.f32 %s1591_s8, %s1589_s6  ;;  %s1565_s7 = smul.f32 %s4226_s19, %s4241_s13 }
 0x6ef   :  { %s1562_s27 = sadd.f32 %s1561_s11, %s1559_s30  ;;  %1729 = vmatmul.msk.f32.vlgmr.msrb.gmra.mxu2 %vm194_vm0, %v1385_v16  ;;  %s1567_s16 = smul.f32 %s3412_s5, %s4242_s23 }
 0x6f0   :  { %s1594_s3 = sadd.f32 %s1593_s25, %s1592_s14  ;;  %s1569_s18 = smul.f32 %s3437_s9, %s4243_s4 }
 0x6f1   :  { %s1564_s10 = sadd.f32 %s1563_s0, %s1562_s27  ;;  %s1577_s14 = smul.f32 %s3408_s29, %s4245_s21 }
 0x6f2   :  { %s1603_s8 = smul.f32 0.0005, %s1594_s3  ;;  %s1568_s2 = sadd.f32 %s1567_s16, %s1565_s7 }
 0x6f3   :  { %s1579_s25 = smul.f32 %s3419_s12, %s4246_s1  ;;  %s4252_s29 = smov 125  }
 0x6f4   :  { %s3572_s6 = sadd.f32 %s1603_s8, %s1576_s20  ;;  %s1581_s28 = smul.f32 %s3432_s15, %s4247_s26 }
 0x6f5   :  { %s1570_s24 = sadd.f32 %s1569_s18, %s1568_s2  ;;  %s1583_s17 = smul.f32 %s4226_s19, %s4245_s21 }
 0x6f6   :  { %4249 = sst [smem:[#allocation72_spill]] %s3572_s6  ;;  %s1585_s11 = smul.f32 %s3412_s5, %s4246_s1 }
 0x6f7   :  { %s1580_s22 = sadd.f32 %s1579_s25, %s1577_s14  ;;  %s1587_s3 = smul.f32 %s3437_s9, %s4247_s26 }
 0x6f8   :  { %s1586_s13 = sadd.f32 %s1585_s11, %s1583_s17  ;;  %s4253_s5 = smov 126  }
 0x6f9   :  { %s1582_s30 = sadd.f32 %s1581_s28, %s1580_s22  ;;  %s4254_s19 = smov 127  }
 0x6fa   :  { %s1588_s27 = sadd.f32 %s1587_s3, %s1586_s13  ;;  %s4255_s12 = smov 122  }
 0x6fb   :  { %s1595_s0 = smul.f32 0.0005, %s1582_s30  ;;  %s4256_s15 = smov 123  }
 0x6fc   :  { %s1599_s8 = smul.f32 0.0005, %s1588_s27  ;;  %s4257_s9 = smov 124  }
 0x6fd   :  { %s3588_s23 = sadd.f32 %s1595_s0, %s1564_s10  ;;  %s4258_s28 = smov 120  }
 0x6fe   :  { %s3590_s20 = sadd.f32 %s1599_s8, %s1570_s24  ;;  %s4259_s22 = smov 121  }
 0x6ff   :  { %4250 = sst [smem:[#allocation51_spill]] %s3588_s23  ;;  %s1939_s21 = smov [#allocation12]  }
 0x700   :  { %4251 = sst [smem:[#allocation64_spill]] %s3590_s20 }
 0x701   :  { %s4260_s24 = sld [smem:[#allocation75_spill]] }
 0x702   :  { %s4261_s1 = sld [smem:[#allocation31_spill]] }
 0x703   :  { %s4262_s26 = sld [smem:[#allocation24_spill]] }
 0x704   :  { %s4263_s18 = sld [smem:[#allocation29_spill]] }
 0x705   :  { %s4264_s7 = sld [smem:[#allocation25_spill]] }
 0x706   :  { %s4265_s10 = sld [smem:[#allocation28_spill]] }
 0x707   :  { %s1654_s4 = sshll.u32 %s4260_s24, 4  ;;  %s4266_s16 = sld [smem:[#allocation23_spill]]  ;;  %s1655_s4 = int_to_ptr.hbm [resolvable:$true] %s1654_s4 }
 0x708   :  { %1657 = dma.smem_to_hbm %s1939_s21, 64, %s1655_s4, [#allocation6]  }
 0x709   :  { %s4267_s14 = sld [smem:[#allocation22_spill]]  ;;  %s148_s13 = smul.f32 %s4262_s26, %s4261_s1 }
 0x70a   :  { %s4268_s25 = sld [smem:[#allocation21_spill]] }
 0x70b   :  { %s4269_s11 = sld [smem:[#allocation37_spill]]  ;;  %s149_s3 = smul.f32 %s4264_s7, %s4263_s18 }
 0x70c   :  { %s4270_s30 = sld [smem:[#allocation26_spill]]  ;;  %s158_s27 = smul.f32 %s4264_s7, %s4265_s10 }
 0x70d   :  { %s159_s8 = smul.f32 %s4266_s16, %s4261_s1  ;;  %s4278_s2 = sld [smem:[#allocation59_spill]] }
 0x70e   :  { %s4279_s21 = sld [smem:[#allocation58_spill]] }
 0x70f   :  { %s4282_s4 = sld [smem:[#allocation60_spill]] }
 0x710   :  { %s153_s24 = smul.f32 %s4268_s25, %s4261_s1 }
 0x712   :  { %s172_s6 = smul.f32 %s4270_s30, %s4263_s18 }
 0x772   :  { %v1406_v17 = vpop.f32.mrf.mxu2 }
 0x773   :  { %v1407_v20 = vadd.f32 %v1825_v19, %v1406_v17 }
 0x775   :  { %vm1409_vm0 = vcmp.gt.f32.partialorder %v1407_v20, 0.0 }
 0x776   :  { %v1730_v21 = vsel %vm1409_vm0, 1.0, %v1930_v18 }
 0x777   :  { %v1412_v22 = vmul.f32 %v1730_v21, %v1407_v20 }
 0x779   :  { %1738 = vmatmul.msk.f32.vlgmr.msrb.gmra.mxu3 %vm243_vm1, %v1412_v22 }
 0x7fc   :  { %v1433_v23 = vpop.f32.mrf.mxu3 }
 0x7fd   :  { %v1434_v25 = vadd.f32 %v1826_v24, %v1433_v23 }
 0x7ff   :  { %vm1436_vm3 = vcmp.gt.f32.partialorder %v1434_v25, 0.0 }
 0x800   :  { %v1739_v26 = vsel %vm1436_vm3, 1.0, %v1930_v18 }
 0x801   :  { %v1439_v28 = vmul.f32 %v1827_v27, %v1739_v26 }
 0x803   :  { %1741 = vmatmul.msk.f32.vlgmr.msrb.gmra.mxu0 %vm243_vm1, %v1439_v28 }
 0x880   :  { %v1460_v29 = vpop.f32.mrf.mxu0 }
 0x881   :  { %v1463_v30 = vmul.f32 %v1730_v21, %v1460_v29 }
 0x883   :  { %1743 = vmatmul.msk.f32.vlgmr.msrb.gmra.mxu1 %vm243_vm1, %v1463_v30 }
 0x900   :  { %v1484_v31 = vpop.f32.mrf.mxu1 }
 0x901   :  { %1487 = vst.msk [vmem:[#allocation2] sm:$0x1] %vm344_vm9, %v1484_v31 }
 0x908   :  { %v1488_v32 = vld [vmem:[#allocation2] sm:$0x1] }
 0x909   :  { %1499 = vrot.lane.b32.xlu1 %v1488_v32, %s4252_s29  ;;  %1495 = vrot.lane.b32.xlu0 %v1488_v32, %s4253_s5  ;;  %1776 = vpush %v1488_v32  ;;  %s167_s29 = smul.f32 %s4266_s16, %s4263_s18 }
 0x90a   :  { %1491 = vrot.lane.b32.xlu2 %v1488_v32, %s4254_s19  ;;  %s168_s5 = smul.f32 %s4262_s26, %s4265_s10  ;;  %s3621_s19 = ssub.f32 %s148_s13, %s149_s3 }
 0x90b   :  { %s162_s13 = smul.f32 %s4270_s30, %s4261_s1  ;;  %s4286_s30 = sld [smem:[#allocation69_spill]] }
 0x90c   :  { %4272 = sst [smem:[#allocation63_spill]] %s3621_s19  ;;  %s163_s3 = smul.f32 %s4267_s14, %s4265_s10 }
 0x90d   :  { %s3627_s17 = ssub.f32 %s167_s29, %s168_s5  ;;  %s171_s5 = smul.f32 %s4268_s25, %s4265_s10 }
 0x90e   :  { %s4281_s29 = sld [smem:[#allocation55_spill]] }
 0x90f   :  { %4277 = sst [smem:[#allocation67_spill]] %s3627_s17 }
 0x910   :  { %s3662_s25 = ssub.f32 %s171_s5, %s172_s6 }
 0x911   :  { %1511 = vrot.lane.b32.xlu1 %v1488_v32, %s4255_s12  ;;  %1507 = vrot.lane.b32.xlu0 %v1488_v32, %s4256_s15  ;;  %s3623_s12 = ssub.f32 %s158_s27, %s159_s8 }
 0x912   :  { %1503 = vrot.lane.b32.xlu2 %v1488_v32, %s4257_s9  ;;  %s4274_s15 = sld [smem:[#allocation57_spill]]  ;;  %s152_s9 = smul.f32 %s4267_s14, %s4263_s18 }
 0x913   :  { %4273 = sst [smem:[#allocation70_spill]] %s3623_s12 }
 0x914   :  { %s3637_s16 = ssub.f32 %s152_s9, %s153_s24 }
 0x915   :  { %s4283_s24 = sld [smem:[#allocation54_spill]] }
 0x916   :  { %4280 = sst [smem:[#allocation73_spill]] %s3637_s16 }
 0x917   :  { %s3657_s14 = ssub.f32 %s162_s13, %s163_s3 }
 0x918   :  { %4285 = sst [smem:[#allocation71_spill]] %s3662_s25 }
 0x919   :  { %1519 = vrot.lane.b32.xlu0 %v1488_v32, %s4258_s28  ;;  %s4275_s28 = sld [smem:[#allocation30_spill]] }
 0x91a   :  { %1515 = vrot.lane.b32.xlu2 %v1488_v32, %s4259_s22  ;;  %s4276_s22 = sld [smem:[#allocation27_spill]] }
 0x91b   :  { %4284 = sst [smem:[#allocation53_spill]] %s3657_s14 }
 0x91c   :  { %s4289_s3 = sld [smem:[#allocation62_spill]] }
 0x91d   :  { %s4290_s25 = sld [smem:[#allocation53_spill]] }
 0x920   :  { %s156_s12 = ssub.f32 %s4276_s22, %s4275_s28 }
 0x93a   :  { %s1777_s8 = spop %1776 }
 0x93b   :  { %s1535_s19 = smul.f32 %s1777_s8, %s4274_s15 }
 0x93c   :  { %s1549_s7 = smul.f32 %s1777_s8, %s4278_s2  ;;  %s4287_s8 = sld [smem:[#allocation61_spill]] }
 0x964   :  { %v1492_v18 = vpop.permute.xlu2 %1491 }
 0x965   :  { %1778 = vpush %v1492_v18 }
 0x96c   :  { %v1504_v33 = vpop.permute.xlu2 %1503 }
 0x974   :  { %v1516_v38 = vpop.permute.xlu2 %1515 }
 0x97b   :  { %v1500_v34 = vpop.permute.xlu1 %1499  ;;  %v1496_v35 = vpop.permute.xlu0 %1495 }
 0x97c   :  { %1780 = vpush %v1496_v35 }
 0x97d   :  { %1782 = vpush %v1500_v34 }
 0x97e   :  { %1784 = vpush %v1504_v33 }
 0x983   :  { %v1512_v36 = vpop.permute.xlu1 %1511  ;;  %v1508_v37 = vpop.permute.xlu0 %1507 }
 0x984   :  { %1786 = vpush %v1508_v37 }
 0x985   :  { %1788 = vpush %v1512_v36 }
 0x986   :  { %1790 = vpush %v1516_v38 }
 0x98b   :  { %v1520_v39 = vpop.permute.xlu0 %1519 }
 0x98c   :  { %1792 = vpush %v1520_v39 }
 0x996   :  { %s1779_s20 = spop %1778 }
 0x997   :  { %s1547_s9 = smul.f32 %s1779_s20, %s4279_s21 }
 0x998   :  { %s1525_s0 = smul.f32 %s1779_s20, %s4274_s15 }
 0x999   :  { %s1550_s28 = ssub.f32 %s1547_s9, %s1549_s7 }
 0x9ad   :  { %s1781_s26 = spop %1780 }
 0x9ae   :  { %s1783_s17 = spop %1782  ;;  %s1537_s1 = smul.f32 %s1781_s26, %s4279_s21 }
 0x9af   :  { %s1523_s27 = smul.f32 %s1781_s26, %s4278_s2  ;;  %s1785_s23 = spop %1784 }
 0x9b0   :  { %s1538_s10 = ssub.f32 %s1535_s19, %s1537_s1  ;;  %s1539_s18 = smul.f32 %s1783_s17, %s4281_s29 }
 0x9b1   :  { %s1551_s22 = smul.f32 %s1785_s23, %s4282_s4  ;;  %s1526_s16 = ssub.f32 %s1523_s27, %s1525_s0 }
 0x9b2   :  { %s3666_s21 = smul.f32 %s4269_s11, %s156_s12  ;;  %s1540_s13 = sadd.f32 %s1539_s18, %s1538_s10 }
 0x9b3   :  { %s1552_s15 = sadd.f32 %s1551_s22, %s1550_s28  ;;  %s1553_s19 = smul.f32 %s1783_s17, %s4283_s24 }
 0x9b4   :  { %4288 = sst [smem:[#allocation68_spill]] %s3666_s21  ;;  %s1529_s5 = smul.f32 %s1785_s23, %s4281_s29 }
 0x9b5   :  { %s1787_s14 = spop %1786  ;;  %s1554_s0 = ssub.f32 %s1552_s15, %s1553_s19 }
 0x9b6   :  { %s1527_s2 = smul.f32 %s1787_s14, %s4283_s24  ;;  %s1789_s26 = spop %1788 }
 0x9b7   :  { %s1541_s20 = smul.f32 %s1787_s14, %s4282_s4  ;;  %s1791_s6 = spop %1790 }
 0x9b8   :  { %s1528_s7 = sadd.f32 %s1527_s2, %s1526_s16  ;;  %s1543_s9 = smul.f32 %s1789_s26, %s4286_s30 }
 0x9b9   :  { %s1542_s1 = ssub.f32 %s1540_s13, %s1541_s20  ;;  %s1555_s27 = smul.f32 %s1791_s6, %s4287_s8 }
 0x9ba   :  { %s4291_s12 = sld [smem:[#allocation72_spill]]  ;;  %s1557_s18 = smul.f32 %s1789_s26, %s4289_s3 }
 0x9bb   :  { %s1544_s10 = sadd.f32 %s1543_s9, %s1542_s1  ;;  %s1533_s20 = smul.f32 %s1791_s6, %s4286_s30 }
 0x9bc   :  { %s4292_s21 = sld [smem:[#allocation64_spill]] }
 0x9bd   :  { %s1556_s22 = sadd.f32 %s1555_s27, %s1554_s0  ;;  %s1793_s4 = spop %1792 }
 0x9be   :  { %s4293_s28 = sld [smem:[#allocation33_spill]]  ;;  %s1531_s23 = smul.f32 %s1793_s4, %s4289_s3 }
 0x9bf   :  { %s4294_s14 = sld [smem:[#allocation51_spill]]  ;;  %s1545_s2 = smul.f32 %s1793_s4, %s4287_s8 }
 0x9c0   :  { %s1530_s17 = ssub.f32 %s1528_s7, %s1529_s5  ;;  %s165_s5 = smul.f32 %s4269_s11, %s4290_s25 }
 0x9c1   :  { %s4295_s24 = sld [smem:[#allocation71_spill]] }
 0x9c2   :  { %s4296_s16 = sld [smem:[#allocation73_spill]] }
 0x9c3   :  { %s1558_s29 = ssub.f32 %s1556_s22, %s1557_s18 }
 0x9c4   :  { %s4297_s13 = sld [smem:[#allocation63_spill]]  ;;  %s166_s8 = smul.f32 %s4269_s11, %s4293_s28 }
 0x9c5   :  { %s4298_s15 = sld [smem:[#allocation70_spill]]  ;;  %s1605_s9 = smul.f32 0.0005, %s1558_s29 }
 0x9c6   :  { %s4299_s26 = sld [smem:[#allocation32_spill]] }
 0x9c7   :  { %s1532_s19 = sadd.f32 %s1531_s23, %s1530_s17  ;;  %s174_s30 = smul.f32 %s4269_s11, %s4295_s24 }
 0x9c8   :  { %s4300_s1 = sld [smem:[#allocation68_spill]]  ;;  %s4302_s17 = smul.f32 %s4269_s11, %s4296_s16 }
 0x9c9   :  { %s1546_s0 = ssub.f32 %s1544_s10, %s1545_s2 }
 0x9ca   :  { %s1534_s27 = ssub.f32 %s1532_s19, %s1533_s20  ;;  %s4303_s29 = smul.f32 %s4269_s11, %s4297_s13 }
 0x9cb   :  { %s1606_s7 = sadd.f32 %s1605_s9, %s4291_s12  ;;  %s1601_s18 = smul.f32 0.0005, %s1546_s0 }
 0x9cc   :  { %s4301_s3 = sld [smem:[#allocation67_spill]]  ;;  %s1597_s22 = smul.f32 0.0005, %s1534_s27 }
 0x9cd   :  { %s1602_s4 = sadd.f32 %s1601_s18, %s4292_s21  ;;  %s1611_s23 = smul.f32 %s1606_s7, %s4302_s17 }
 0x9ce   :  { %s1598_s6 = sadd.f32 %s1597_s22, %s4294_s14  ;;  %s4304_s10 = smul.f32 %s4269_s11, %s4298_s15 }
 0x9cf   :  { %s1609_s2 = smul.f32 %s1602_s4, %s4303_s29  ;;  %s4307_s17 = sld [smem:[#allocation76_spill]] }
 0x9d0   :  { %s1615_s19 = smul.f32 %s1602_s4, %s4304_s10 }
 0x9d1   :  { %s4305_s20 = smul.f32 %s4269_s11, %s4299_s26  ;;  %s1940_s26 = smov [#allocation13]  }
 0x9d2   :  { %s1613_s9 = smul.f32 %s1598_s6, %s4300_s1 }
 0x9d3   :  { %s1607_s25 = smul.f32 %s1598_s6, %s4305_s20 }
 0x9d4   :  { %s1619_s0 = smul.f32 %s1598_s6, %s166_s8  ;;  %s1616_s27 = sadd.f32 %s1615_s19, %s1613_s9 }
 0x9d5   :  { %s1610_s12 = sadd.f32 %s1609_s2, %s1607_s25  ;;  %s1617_s18 = smul.f32 %s1606_s7, %s165_s5 }
 0x9d6   :  { %s4306_s21 = smul.f32 %s4269_s11, %s4301_s3  ;;  %s1663_s13 = sshll.u32 %s4307_s17, 4  ;;  %s1664_s13 = int_to_ptr.hbm [resolvable:$true] %s1663_s13 }
 0x9d7   :  { %s1612_s14 = sadd.f32 %s1611_s23, %s1610_s12  ;;  %s1623_s15 = smul.f32 %s1606_s7, %s174_s30 }
 0x9d8   :  { %s1621_s28 = smul.f32 %s1602_s4, %s4306_s21  ;;  %s1618_s22 = sadd.f32 %s1617_s18, %s1616_s27 }
 0x9d9   :  { %1626 = sst [smem:[#allocation13]] %s1612_s14 }
 0x9da   :  { %s1622_s29 = sadd.f32 %s1621_s28, %s1619_s0 }
 0x9db   :  { %1634 = sst [smem:[#allocation13 + $0x1]] %s1618_s22 }
 0x9dc   :  { %s1624_s10 = sadd.f32 %s1623_s15, %s1622_s29 }
 0x9de   :  { %1642 = sst [smem:[#allocation13 + $0x2]] %s1624_s10 }
 0x9df   :  { %1666 = dma.smem_to_hbm %s1940_s26, 16, %s1664_s13, [#allocation14]  }
 0x9e0   :  { %1920 = dma.done.wait [#allocation6], 64  }
 0x9e1   :  { %1921 = vsyncadd [#allocation6], 4294967232 }
 0x9e2   :  { %1922 = dma.done.wait [#allocation14], 16  }
 0x9e3   :  { %1923 = vsyncadd [#allocation14], 4294967280 }
 0x9e4   :  { %1675 = sfence }
 0x9e5   :  { %1676 = vsyncpa [#allocation4], 1 }
 0x9e6   :  { %1677 = vsyncpa [#allocation5], 1 }
 0x9e7   :  { %1678 = vsyncpa [#allocation6], 1 }
 0x9e8   :  { %1679 = vsyncpa [#allocation14], 1 }
 0x9e9   :  { %1680 = vsyncpa [#allocation7], 1 }
 0x9ea   :  { %1681 = vsyncpa [#allocation10], 1 }

</bundles_post_ra>
